<compile_context>
chip_gen: v7x
topology: tpu7x:2x2x1
jax: 0.10.0
libtpu: 0.0.40
codegen_flags: <defaults>
</compile_context>

<pallas_src>
import numpy as np

import jax
import jax.numpy as jnp
from jax.experimental import pallas as pl
from jax.experimental.pallas import tpu as pltpu

NDF = 64
EPS = 1e-5
LRELU_SLOPE = 0.2
CPAD = 128                       # lane padding for the 1-channel classifier output
VMEM_GUARD = 24 * 1024 * 1024    # v7x-safe scoped-VMEM budget for whole-image blocks


# ----------------------------- Pallas kernels ------------------------------ #

def _make_conv_stats_kernel(n_in, taps, o_lo, r_rows, cin, cout):
    """Fused 3x3 conv (9 shifted taps, bf16 MXU, f32 acc) + partial BN stats, per image.

    taps: static list of (input_ref_index, start_row) for the 9 taps (kh,kw row-major).
    Writes: y (bf16, padded-flat, zeroed border band) and one lane-dense stats row
    [channel_sum | channel_sumsq] (rows 1..7 of the stats block are unused).
    """
    def kernel(*refs):
        x_refs = refs[:n_in]
        wk_ref = refs[n_in]
        mask_ref = refs[n_in + 1]
        y_ref = refs[n_in + 2]
        stats_ref = refs[n_in + 3]

        acc = jnp.zeros((r_rows, cout), jnp.float32)
        for t, (src, start) in enumerate(taps):
            lhs = x_refs[src][start:start + r_rows, :]            # (R, Cin) bf16
            rhs = wk_ref[t * cin:(t + 1) * cin, :]                # (Cin, Cout) bf16
            acc = acc + jnp.dot(lhs, rhs, preferred_element_type=jnp.float32)

        # BN partial stats from the f32 accumulator, restricted to valid (interior) rows.
        valid = acc * mask_ref[o_lo:o_lo + r_rows, :]
        s_row = jnp.sum(valid, axis=0, keepdims=True)             # (1, Cout)
        ss_row = jnp.sum(valid * valid, axis=0, keepdims=True)    # (1, Cout)
        stats_ref[0:1, :] = jnp.concatenate([s_row, ss_row], axis=-1)  # lane-dense (1, 2*Cout)

        # Store raw conv output in bf16; zero the top/bottom padded bands explicitly.
        border = jnp.zeros((o_lo, cout), y_ref.dtype)
        y_ref[0:o_lo, :] = border
        y_ref[o_lo:o_lo + r_rows, :] = acc.astype(y_ref.dtype)
        y_ref[o_lo + r_rows:, :] = border

    return kernel


def _make_conv_bias_kernel(n_in, taps, o_lo, r_rows, cin, cpad):
    """Classifier: fused 3x3 conv + bias, output padded to 128 lanes, f32."""
    def kernel(*refs):
        x_refs = refs[:n_in]
        wk_ref = refs[n_in]
        b_ref = refs[n_in + 1]
        y_ref = refs[n_in + 2]

        acc = jnp.zeros((r_rows, cpad), jnp.float32)
        for t, (src, start) in enumerate(taps):
            acc = acc + jnp.dot(x_refs[src][start:start + r_rows, :],
                                wk_ref[t * cin:(t + 1) * cin, :],
                                preferred_element_type=jnp.float32)
        acc = acc + b_ref[...]

        border = jnp.zeros((o_lo, cpad), y_ref.dtype)
        y_ref[0:o_lo, :] = border
        y_ref[o_lo:o_lo + r_rows, :] = acc
        y_ref[o_lo + r_rows:, :] = border

    return kernel


def _bn_lrelu_mask_kernel(y_ref, mask_ref, sc_ref, sh_ref, o_ref):
    """BatchNorm apply (folded scale/shift) + LeakyReLU(0.2) + re-zero padded border."""
    v = y_ref[...].astype(jnp.float32) * sc_ref[...] + sh_ref[...]
    v = jnp.where(v > 0, v, LRELU_SLOPE * v)
    o_ref[...] = jnp.where(mask_ref[...] > 0.0, v, 0.0).astype(o_ref.dtype)


# ------------------------------- JAX glue ---------------------------------- #

def _out_hw(h, w, stride):
    return (h - 1) // stride + 1, (w - 1) // stride + 1


def _taps_stride1(wp):
    # tap (kh,kw) reads input rows starting at kh*Wp + kw for the [Wp+1, Mp-Wp-1) band.
    return tuple((0, dh * wp + dw) for dh in range(3) for dw in range(3))


def _taps_stride2(wp_o):
    # 4 even/odd phase inputs; tap (kh,kw) -> phase (kh%2, kw%2), shift (kh//2, kw//2).
    o_lo = wp_o + 1
    return tuple(((dh % 2) * 2 + (dw % 2), o_lo + (dh // 2) * wp_o + (dw // 2))
                 for dh in range(3) for dw in range(3))


def _weight_to_matrix(w_oihw):
    # (Cout, Cin, 3, 3) -> (9*Cin, Cout), (kh, kw, cin) major->minor; bf16 for the MXU.
    cout, cin = w_oihw.shape[0], w_oihw.shape[1]
    return jnp.transpose(w_oihw, (2, 3, 1, 0)).reshape(9 * cin, cout).astype(jnp.bfloat16)


def _interior_mask(ho, wo):
    """(Mp, 1) f32 mask: 1 at valid output pixels, 0 at the padded border (trace-time const)."""
    m = np.zeros((ho + 2, wo + 2), np.float32)
    m[1:1 + ho, 1:1 + wo] = 1.0
    return jnp.asarray(m.reshape((ho + 2) * (wo + 2), 1))


def _to_phases(xpad_nhwc, ho, wo):
    """Even/odd space-to-depth of a zero-padded NHWC tensor into 4 padded-flat phase arrays.

    phase[(pr, pc)][n, (i+1)*(wo+2) + (j+1), c] == xpad[n, 2*i + pr, 2*j + pc, c],
    so every stride-2 conv tap becomes a uniform row shift of one phase array.
    """
    n, hp, wp, c = xpad_nhwc.shape
    ext_h = max(0, 2 * ho + 2 - hp)
    ext_w = max(0, 2 * wo + 2 - wp)
    if ext_h or ext_w:
        xpad_nhwc = jnp.pad(xpad_nhwc, ((0, 0), (0, ext_h), (0, ext_w), (0, 0)))
    phases = []
    for pr in range(2):
        for pc in range(2):
            ph = xpad_nhwc[:, pr:pr + 2 * ho + 1:2, pc:pc + 2 * wo + 1:2, :]  # (N,ho+1,wo+1,C)
            ph = jnp.pad(ph, ((0, 0), (1, 0), (1, 0), (0, 0)))                # (N,ho+2,wo+2,C)
            phases.append(ph.reshape(n, (ho + 2) * (wo + 2), c))
    return phases


def _assert_vmem_fits(x_inputs, mp, cout, r_rows):
    # v7x guardrail: whole-image blocks are double-buffered by the Pallas pipeline.
    bytes_in = sum(2 * xi.shape[1] * xi.shape[2] * 2 for xi in x_inputs)   # bf16, 2 buffers
    bytes_out = 2 * mp * cout * 4                                          # <= f32 out, 2 buffers
    bytes_scratch = r_rows * cout * 4 + mp * 128 * 4                       # f32 acc + lane-padded mask
    est = bytes_in + bytes_out + bytes_scratch
    assert est <= VMEM_GUARD, (
        f"per-image VMEM footprint ~{est / 2**20:.1f} MiB exceeds the {VMEM_GUARD >> 20} MiB "
        "v7x guardrail; row-tile the image (see TODO) for inputs this large")


def _conv_bn_lrelu(x_inputs, w_oihw, gamma, beta, taps, ho, wo):
    """Fused 3x3 conv (bias cancelled by train-mode BN) + BatchNorm + LeakyReLU(0.2).

    x_inputs: 1 padded-flat array (stride-1) or 4 phase arrays (stride-2), bf16.
    Returns the activation in padded-flat layout (N, (ho+2)*(wo+2), Cout), bf16,
    with exact zeros on the padded border (ready to be the next layer's input).
    """
    n_img = x_inputs[0].shape[0]
    cin = x_inputs[0].shape[-1]
    cout = w_oihw.shape[0]
    wp = wo + 2
    mp = (ho + 2) * wp
    o_lo = wp + 1
    r_rows = mp - 2 * o_lo
    n_in = len(x_inputs)

    _assert_vmem_fits(x_inputs, mp, cout, r_rows)

    wk = _weight_to_matrix(w_oihw)                      # (9*Cin, Cout) bf16, resident
    mask = _interior_mask(ho, wo)                       # (Mp, 1) f32, resident

    kernel = _make_conv_stats_kernel(n_in, taps, o_lo, r_rows, cin, cout)

    in_bytes = sum(xi.shape[0] * xi.shape[1] * xi.shape[2] * 2 for xi in x_inputs)
    in_bytes += 9 * cin * cout * 2 + mp * 4
    out_bytes = n_img * mp * cout * 2 + n_img * 8 * 2 * cout * 4
    ce = pl.CostEstimate(flops=2 * n_img * r_rows * 9 * cin * cout,
                         transcendentals=0,
                         bytes_accessed=in_bytes + out_bytes)

    y, stats = pl.pallas_call(
        kernel,
        out_shape=(jax.ShapeDtypeStruct((n_img, mp, cout), jnp.bfloat16),
                   jax.ShapeDtypeStruct((n_img, 8, 2 * cout), jnp.float32)),
        grid=(n_img,),
        in_specs=[pl.BlockSpec((None, xi.shape[1], cin), lambda n: (n, 0, 0))
                  for xi in x_inputs]
                 + [pl.BlockSpec((9 * cin, cout), lambda n: (0, 0)),
                    pl.BlockSpec((mp, 1), lambda n: (0, 0))],
        out_specs=(pl.BlockSpec((None, mp, cout), lambda n: (n, 0, 0)),
                   pl.BlockSpec((None, 8, 2 * cout), lambda n: (n, 0, 0))),
        compiler_params=pltpu.CompilerParams(dimension_semantics=("parallel",)),
        cost_estimate=ce,
    )(*x_inputs, wk, mask)

    # Finalize global (biased) batch statistics in f32; only row 0 of each stats block is used.
    count = n_img * ho * wo
    total = jnp.sum(stats[:, 0, :cout], axis=0)
    total_sq = jnp.sum(stats[:, 0, cout:], axis=0)
    mean = total / count
    var = jnp.maximum(total_sq / count - mean * mean, 0.0)   # f32; see cancellation note above
    scale = (gamma * jax.lax.rsqrt(var + EPS)).astype(jnp.float32)
    shift = (beta - mean * scale).astype(jnp.float32)

    ce2 = pl.CostEstimate(flops=4 * n_img * mp * cout,
                          transcendentals=0,
                          bytes_accessed=2 * n_img * mp * cout * 2 + mp * 4 + 8 * cout)
    act = pl.pallas_call(
        _bn_lrelu_mask_kernel,
        out_shape=jax.ShapeDtypeStruct((n_img, mp, cout), jnp.bfloat16),
        grid=(n_img,),
        in_specs=[pl.BlockSpec((None, mp, cout), lambda n: (n, 0, 0)),
                  pl.BlockSpec((mp, 1), lambda n: (0, 0)),
                  pl.BlockSpec((1, cout), lambda n: (0, 0)),
                  pl.BlockSpec((1, cout), lambda n: (0, 0))],
        out_specs=pl.BlockSpec((None, mp, cout), lambda n: (n, 0, 0)),
        compiler_params=pltpu.CompilerParams(dimension_semantics=("parallel",)),
        cost_estimate=ce2,
    )(y, mask, scale.reshape(1, cout), shift.reshape(1, cout))

    return act


def _conv_classifier(x_inputs, w_oihw, b, taps, ho, wo):
    """Final 3x3 stride-2 conv (Cout=1) with bias; lanes padded to 128 for dense stores."""
    n_img = x_inputs[0].shape[0]
    cin = x_inputs[0].shape[-1]
    cout = w_oihw.shape[0]
    wp = wo + 2
    mp = (ho + 2) * wp
    o_lo = wp + 1
    r_rows = mp - 2 * o_lo
    n_in = len(x_inputs)

    _assert_vmem_fits(x_inputs, mp, CPAD, r_rows)

    wk_small = _weight_to_matrix(w_oihw)                                    # (9*Cin, 1)
    wk = jnp.zeros((9 * cin, CPAD), jnp.bfloat16).at[:, :cout].set(wk_small)
    bpad = jnp.zeros((1, CPAD), jnp.float32).at[:, :cout].set(b.reshape(1, cout))

    kernel = _make_conv_bias_kernel(n_in, taps, o_lo, r_rows, cin, CPAD)

    in_bytes = sum(xi.shape[0] * xi.shape[1] * xi.shape[2] * 2 for xi in x_inputs)
    in_bytes += 9 * cin * CPAD * 2 + CPAD * 4
    out_bytes = n_img * mp * CPAD * 4
    ce = pl.CostEstimate(flops=2 * n_img * r_rows * 9 * cin * CPAD,
                         transcendentals=0,
                         bytes_accessed=in_bytes + out_bytes)

    y = pl.pallas_call(
        kernel,
        out_shape=jax.ShapeDtypeStruct((n_img, mp, CPAD), jnp.float32),
        grid=(n_img,),
        in_specs=[pl.BlockSpec((None, xi.shape[1], cin), lambda n: (n, 0, 0))
                  for xi in x_inputs]
                 + [pl.BlockSpec((9 * cin, CPAD), lambda n: (0, 0)),
                    pl.BlockSpec((1, CPAD), lambda n: (0, 0))],
        out_specs=pl.BlockSpec((None, mp, CPAD), lambda n: (n, 0, 0)),
        compiler_params=pltpu.CompilerParams(dimension_semantics=("parallel",)),
        cost_estimate=ce,
    )(*x_inputs, wk, bpad)

    out = y.reshape(n_img, ho + 2, wo + 2, CPAD)[:, 1:1 + ho, 1:1 + wo, :cout]
    return out


# ------------------------------ Parameters --------------------------------- #

def init_params(key, ndf=NDF):
    """Deterministic init mimicking PyTorch defaults (uniform +-1/sqrt(fan_in))."""
    def conv_init(key, cout, cin):
        k_w, k_b = jax.random.split(key)
        bound = 1.0 / jnp.sqrt(cin * 9.0)
        w = jax.random.uniform(k_w, (cout, cin, 3, 3), jnp.float32, -bound, bound)
        b = jax.random.uniform(k_b, (cout,), jnp.float32, -bound, bound)
        return w, b

    keys = jax.random.split(key, 5)
    p = {}
    p["w1"], p["b1"] = conv_init(keys[0], ndf, 4)    # conv1_2 (bias cancelled by train BN)
    p["w2"], p["b2"] = conv_init(keys[1], ndf, ndf)  # conv2   (bias cancelled by train BN)
    p["w3"], p["b3"] = conv_init(keys[2], ndf, ndf)  # conv3   (bias cancelled by train BN)
    p["w4"], p["b4"] = conv_init(keys[3], ndf, ndf)  # conv4   (bias cancelled by train BN)
    p["wc"], p["bc"] = conv_init(keys[4], 1, ndf)    # classifier (bias used)
    for i in ("1", "2", "3", "4"):                   # bn gamma=1, beta=0 (PyTorch init)
        p["g" + i] = jnp.ones((ndf,), jnp.float32)
        p["bt" + i] = jnp.zeros((ndf,), jnp.float32)
    return p


# ------------------------------- Forward ----------------------------------- #

@jax.jit
def fc_discriminator(params, x_nchw, pred_nchw):
    n_img, _, h, w = x_nchw.shape

    # torch.cat((x, pred), 1): channel concat in NCHW, then NHWC bf16 + zero spatial pad.
    x = jnp.concatenate([x_nchw, pred_nchw], axis=1)
    x = jnp.transpose(x, (0, 2, 3, 1)).astype(jnp.bfloat16)
    xp = jnp.pad(x, ((0, 0), (1, 1), (1, 1), (0, 0)))          # (N, H+2, W+2, 4)

    # conv1_2 (stride 2) + bn1_2 + lrelu.  Cin=4 is lane-sparse but <1% of total work.
    ho, wo = _out_hw(h, w, 2)
    act = _conv_bn_lrelu(_to_phases(xp, ho, wo), params["w1"], params["g1"], params["bt1"],
                         _taps_stride2(wo + 2), ho, wo)
    h, w = ho, wo

    # conv2 (stride 1) + bn2 + lrelu: padded-flat input used directly (uniform-shift taps).
    act = _conv_bn_lrelu([act], params["w2"], params["g2"], params["bt2"],
                         _taps_stride1(w + 2), h, w)

    # conv3 (stride 2) + bn3 + lrelu.
    ho, wo = _out_hw(h, w, 2)
    xp3 = act.reshape(n_img, h + 2, w + 2, NDF)
    act = _conv_bn_lrelu(_to_phases(xp3, ho, wo), params["w3"], params["g3"], params["bt3"],
                         _taps_stride2(wo + 2), ho, wo)
    h, w = ho, wo

    # conv4 (stride 1) + bn4 + lrelu.
    act = _conv_bn_lrelu([act], params["w4"], params["g4"], params["bt4"],
                         _taps_stride1(w + 2), h, w)

    # classifier (stride 2, Cout=1, bias, no BN / activation).
    ho, wo = _out_hw(h, w, 2)
    xp5 = act.reshape(n_img, h + 2, w + 2, NDF)
    out = _conv_classifier(_to_phases(xp5, ho, wo), params["wc"], params["bc"],
                           _taps_stride2(wo + 2), ho, wo)     # (N, ho, wo, 1) f32

    return jnp.transpose(out, (0, 3, 1, 2))                    # back to NCHW


# --------------------------------- Main ------------------------------------ #

if __name__ == "__main__":
    key = jax.random.PRNGKey(0)
    k_p, k_x, k_pred = jax.random.split(key, 3)

    params = init_params(k_p)
    # conv1_2 expects 4 input channels => x has 3 channels, pred has 1 channel.
    x = jax.random.normal(k_x, (2, 3, 16, 16), jnp.float32)
    pred = jax.random.normal(k_pred, (2, 1, 16, 16), jnp.float32)

    out = fc_discriminator(params, x, pred)
    jax.block_until_ready(out)
    assert out.shape == (2, 1, 2, 2), out.shape
    assert bool(jnp.all(jnp.isfinite(out)))
    print("KERNEL_OK")
</pallas_src>

<mosaic_0001>
module attributes {stable_mosaic.version = 11 : i64} {
  func.func @kernel(%arg0: i32, %arg1: memref<1x100x4xbf16, #tpu.memory_space<vmem>>, %arg2: memref<1x100x4xbf16, #tpu.memory_space<vmem>>, %arg3: memref<1x100x4xbf16, #tpu.memory_space<vmem>>, %arg4: memref<1x100x4xbf16, #tpu.memory_space<vmem>>, %arg5: memref<36x64xbf16, #tpu.memory_space<vmem>>, %arg6: memref<100x1xf32, #tpu.memory_space<vmem>>, %arg7: memref<1x100x64xbf16, #tpu.memory_space<vmem>>, %arg8: memref<1x8x128xf32, #tpu.memory_space<vmem>>) attributes {dimension_semantics = [#tpu.dimension_semantics<parallel>], iteration_bounds = array<i64: 2>, scalar_prefetch = 0 : i64, scratch_operands = 0 : i64, tpu.core_type = #tpu.core_type<tc>, window_params = [{transform_indices = @transform_0, window_bounds = array<i64: 1, 100, 4>}, {transform_indices = @transform_1, window_bounds = array<i64: 1, 100, 4>}, {transform_indices = @transform_2, window_bounds = array<i64: 1, 100, 4>}, {transform_indices = @transform_3, window_bounds = array<i64: 1, 100, 4>}, {pipeline_mode = #tpu.pipeline_mode<synchronous>, transform_indices = @transform_4, window_bounds = array<i64: 36, 64>}, {pipeline_mode = #tpu.pipeline_mode<synchronous>, transform_indices = @transform_5, window_bounds = array<i64: 100, 1>}, {transform_indices = @transform_6, window_bounds = array<i64: 1, 100, 64>}, {transform_indices = @transform_7, window_bounds = array<i64: 1, 8, 128>}]} {
    %cst = arith.constant 0.000000e+00 : f32
    %0 = vector.broadcast %cst : f32 to vector<78x64xf32>
    %c0 = arith.constant 0 : index
    %c11 = arith.constant 11 : index
    %c0_0 = arith.constant 0 : index
    %1 = vector.load %arg1[%c0, %c11, %c0_0] : memref<1x100x4xbf16, #tpu.memory_space<vmem>>, vector<1x78x4xbf16>
    %2 = vector.shape_cast %1 : vector<1x78x4xbf16> to vector<78x4xbf16>
    %c0_1 = arith.constant 0 : index
    %c0_2 = arith.constant 0 : index
    %3 = vector.load %arg5[%c0_1, %c0_2] : memref<36x64xbf16, #tpu.memory_space<vmem>>, vector<4x64xbf16>
    %cst_3 = arith.constant dense<0.000000e+00> : vector<78x64xf32>
    %4 = tpu.matmul %2, %3, %cst_3 {dimension_numbers = #tpu.dot_dimension_numbers<[1], [0], [0], [1], [0, 0, 1, 1], [], []>} : vector<78x4xbf16>, vector<4x64xbf16>, vector<78x64xf32> -> vector<78x64xf32>
    %5 = arith.addf %0, %4 : vector<78x64xf32>
    %c0_4 = arith.constant 0 : index
    %c11_5 = arith.constant 11 : index
    %c0_6 = arith.constant 0 : index
    %6 = vector.load %arg2[%c0_4, %c11_5, %c0_6] : memref<1x100x4xbf16, #tpu.memory_space<vmem>>, vector<1x78x4xbf16>
    %7 = vector.shape_cast %6 : vector<1x78x4xbf16> to vector<78x4xbf16>
    %c4 = arith.constant 4 : index
    %c0_7 = arith.constant 0 : index
    %8 = vector.load %arg5[%c4, %c0_7] : memref<36x64xbf16, #tpu.memory_space<vmem>>, vector<4x64xbf16>
    %cst_8 = arith.constant dense<0.000000e+00> : vector<78x64xf32>
    %9 = tpu.matmul %7, %8, %cst_8 {dimension_numbers = #tpu.dot_dimension_numbers<[1], [0], [0], [1], [0, 0, 1, 1], [], []>} : vector<78x4xbf16>, vector<4x64xbf16>, vector<78x64xf32> -> vector<78x64xf32>
    %10 = arith.addf %5, %9 : vector<78x64xf32>
    %c0_9 = arith.constant 0 : index
    %c12 = arith.constant 12 : index
    %c0_10 = arith.constant 0 : index
    %11 = vector.load %arg1[%c0_9, %c12, %c0_10] : memref<1x100x4xbf16, #tpu.memory_space<vmem>>, vector<1x78x4xbf16>
    %12 = vector.shape_cast %11 : vector<1x78x4xbf16> to vector<78x4xbf16>
    %c8 = arith.constant 8 : index
    %c0_11 = arith.constant 0 : index
    %13 = vector.load %arg5[%c8, %c0_11] : memref<36x64xbf16, #tpu.memory_space<vmem>>, vector<4x64xbf16>
    %cst_12 = arith.constant dense<0.000000e+00> : vector<78x64xf32>
    %14 = tpu.matmul %12, %13, %cst_12 {dimension_numbers = #tpu.dot_dimension_numbers<[1], [0], [0], [1], [0, 0, 1, 1], [], []>} : vector<78x4xbf16>, vector<4x64xbf16>, vector<78x64xf32> -> vector<78x64xf32>
    %15 = arith.addf %10, %14 : vector<78x64xf32>
    %c0_13 = arith.constant 0 : index
    %c11_14 = arith.constant 11 : index
    %c0_15 = arith.constant 0 : index
    %16 = vector.load %arg3[%c0_13, %c11_14, %c0_15] : memref<1x100x4xbf16, #tpu.memory_space<vmem>>, vector<1x78x4xbf16>
    %17 = vector.shape_cast %16 : vector<1x78x4xbf16> to vector<78x4xbf16>
    %c12_16 = arith.constant 12 : index
    %c0_17 = arith.constant 0 : index
    %18 = vector.load %arg5[%c12_16, %c0_17] : memref<36x64xbf16, #tpu.memory_space<vmem>>, vector<4x64xbf16>
    %cst_18 = arith.constant dense<0.000000e+00> : vector<78x64xf32>
    %19 = tpu.matmul %17, %18, %cst_18 {dimension_numbers = #tpu.dot_dimension_numbers<[1], [0], [0], [1], [0, 0, 1, 1], [], []>} : vector<78x4xbf16>, vector<4x64xbf16>, vector<78x64xf32> -> vector<78x64xf32>
    %20 = arith.addf %15, %19 : vector<78x64xf32>
    %c0_19 = arith.constant 0 : index
    %c11_20 = arith.constant 11 : index
    %c0_21 = arith.constant 0 : index
    %21 = vector.load %arg4[%c0_19, %c11_20, %c0_21] : memref<1x100x4xbf16, #tpu.memory_space<vmem>>, vector<1x78x4xbf16>
    %22 = vector.shape_cast %21 : vector<1x78x4xbf16> to vector<78x4xbf16>
    %c16 = arith.constant 16 : index
    %c0_22 = arith.constant 0 : index
    %23 = vector.load %arg5[%c16, %c0_22] : memref<36x64xbf16, #tpu.memory_space<vmem>>, vector<4x64xbf16>
    %cst_23 = arith.constant dense<0.000000e+00> : vector<78x64xf32>
    %24 = tpu.matmul %22, %23, %cst_23 {dimension_numbers = #tpu.dot_dimension_numbers<[1], [0], [0], [1], [0, 0, 1, 1], [], []>} : vector<78x4xbf16>, vector<4x64xbf16>, vector<78x64xf32> -> vector<78x64xf32>
    %25 = arith.addf %20, %24 : vector<78x64xf32>
    %c0_24 = arith.constant 0 : index
    %c12_25 = arith.constant 12 : index
    %c0_26 = arith.constant 0 : index
    %26 = vector.load %arg3[%c0_24, %c12_25, %c0_26] : memref<1x100x4xbf16, #tpu.memory_space<vmem>>, vector<1x78x4xbf16>
    %27 = vector.shape_cast %26 : vector<1x78x4xbf16> to vector<78x4xbf16>
    %c20 = arith.constant 20 : index
    %c0_27 = arith.constant 0 : index
    %28 = vector.load %arg5[%c20, %c0_27] : memref<36x64xbf16, #tpu.memory_space<vmem>>, vector<4x64xbf16>
    %cst_28 = arith.constant dense<0.000000e+00> : vector<78x64xf32>
    %29 = tpu.matmul %27, %28, %cst_28 {dimension_numbers = #tpu.dot_dimension_numbers<[1], [0], [0], [1], [0, 0, 1, 1], [], []>} : vector<78x4xbf16>, vector<4x64xbf16>, vector<78x64xf32> -> vector<78x64xf32>
    %30 = arith.addf %25, %29 : vector<78x64xf32>
    %c0_29 = arith.constant 0 : index
    %c21 = arith.constant 21 : index
    %c0_30 = arith.constant 0 : index
    %31 = vector.load %arg1[%c0_29, %c21, %c0_30] : memref<1x100x4xbf16, #tpu.memory_space<vmem>>, vector<1x78x4xbf16>
    %32 = vector.shape_cast %31 : vector<1x78x4xbf16> to vector<78x4xbf16>
    %c24 = arith.constant 24 : index
    %c0_31 = arith.constant 0 : index
    %33 = vector.load %arg5[%c24, %c0_31] : memref<36x64xbf16, #tpu.memory_space<vmem>>, vector<4x64xbf16>
    %cst_32 = arith.constant dense<0.000000e+00> : vector<78x64xf32>
    %34 = tpu.matmul %32, %33, %cst_32 {dimension_numbers = #tpu.dot_dimension_numbers<[1], [0], [0], [1], [0, 0, 1, 1], [], []>} : vector<78x4xbf16>, vector<4x64xbf16>, vector<78x64xf32> -> vector<78x64xf32>
    %35 = arith.addf %30, %34 : vector<78x64xf32>
    %c0_33 = arith.constant 0 : index
    %c21_34 = arith.constant 21 : index
    %c0_35 = arith.constant 0 : index
    %36 = vector.load %arg2[%c0_33, %c21_34, %c0_35] : memref<1x100x4xbf16, #tpu.memory_space<vmem>>, vector<1x78x4xbf16>
    %37 = vector.shape_cast %36 : vector<1x78x4xbf16> to vector<78x4xbf16>
    %c28 = arith.constant 28 : index
    %c0_36 = arith.constant 0 : index
    %38 = vector.load %arg5[%c28, %c0_36] : memref<36x64xbf16, #tpu.memory_space<vmem>>, vector<4x64xbf16>
    %cst_37 = arith.constant dense<0.000000e+00> : vector<78x64xf32>
    %39 = tpu.matmul %37, %38, %cst_37 {dimension_numbers = #tpu.dot_dimension_numbers<[1], [0], [0], [1], [0, 0, 1, 1], [], []>} : vector<78x4xbf16>, vector<4x64xbf16>, vector<78x64xf32> -> vector<78x64xf32>
    %40 = arith.addf %35, %39 : vector<78x64xf32>
    %c0_38 = arith.constant 0 : index
    %c22 = arith.constant 22 : index
    %c0_39 = arith.constant 0 : index
    %41 = vector.load %arg1[%c0_38, %c22, %c0_39] : memref<1x100x4xbf16, #tpu.memory_space<vmem>>, vector<1x78x4xbf16>
    %42 = vector.shape_cast %41 : vector<1x78x4xbf16> to vector<78x4xbf16>
    %c32 = arith.constant 32 : index
    %c0_40 = arith.constant 0 : index
    %43 = vector.load %arg5[%c32, %c0_40] : memref<36x64xbf16, #tpu.memory_space<vmem>>, vector<4x64xbf16>
    %cst_41 = arith.constant dense<0.000000e+00> : vector<78x64xf32>
    %44 = tpu.matmul %42, %43, %cst_41 {dimension_numbers = #tpu.dot_dimension_numbers<[1], [0], [0], [1], [0, 0, 1, 1], [], []>} : vector<78x4xbf16>, vector<4x64xbf16>, vector<78x64xf32> -> vector<78x64xf32>
    %45 = arith.addf %40, %44 : vector<78x64xf32>
    %c11_42 = arith.constant 11 : index
    %c0_43 = arith.constant 0 : index
    %46 = vector.load %arg6[%c11_42, %c0_43] : memref<100x1xf32, #tpu.memory_space<vmem>>, vector<78x1xf32>
    %47 = vector.broadcast %46 : vector<78x1xf32> to vector<78x64xf32>
    %48 = arith.mulf %45, %47 : vector<78x64xf32>
    %cst_44 = arith.constant dense<0.000000e+00> : vector<64xf32>
    %49 = vector.multi_reduction <add>, %48, %cst_44 [0] : vector<78x64xf32> to vector<64xf32>
    %50 = vector.shape_cast %49 : vector<64xf32> to vector<1x64xf32>
    %51 = arith.mulf %48, %48 : vector<78x64xf32>
    %cst_45 = arith.constant dense<0.000000e+00> : vector<64xf32>
    %52 = vector.multi_reduction <add>, %51, %cst_45 [0] : vector<78x64xf32> to vector<64xf32>
    %53 = vector.shape_cast %52 : vector<64xf32> to vector<1x64xf32>
    %54 = tpu.concatenate %50, %53 in 1 : vector<1x64xf32>, vector<1x64xf32> -> vector<1x128xf32>
    %c0_46 = arith.constant 0 : index
    %c0_47 = arith.constant 0 : index
    %c0_48 = arith.constant 0 : index
    %55 = vector.load %arg8[%c0_46, %c0_47, %c0_48] : memref<1x8x128xf32, #tpu.memory_space<vmem>>, vector<1x1x128xf32>
    %56 = vector.shape_cast %55 : vector<1x1x128xf32> to vector<1x128xf32>
    %57 = vector.shape_cast %54 : vector<1x128xf32> to vector<1x1x128xf32>
    tpu.vector_store %arg8[%c0_46, %c0_47, %c0_48], %57 {strides = array<i32>} : memref<1x8x128xf32, #tpu.memory_space<vmem>>, vector<1x1x128xf32>,
    %cst_49 = arith.constant 0.000000e+00 : bf16
    %58 = vector.broadcast %cst_49 : bf16 to vector<11x64xbf16>
    %c0_50 = arith.constant 0 : index
    %c0_51 = arith.constant 0 : index
    %c0_52 = arith.constant 0 : index
    %59 = vector.load %arg7[%c0_50, %c0_51, %c0_52] : memref<1x100x64xbf16, #tpu.memory_space<vmem>>, vector<1x11x64xbf16>
    %60 = vector.shape_cast %59 : vector<1x11x64xbf16> to vector<11x64xbf16>
    %61 = vector.shape_cast %58 : vector<11x64xbf16> to vector<1x11x64xbf16>
    tpu.vector_store %arg7[%c0_50, %c0_51, %c0_52], %61 {strides = array<i32>} : memref<1x100x64xbf16, #tpu.memory_space<vmem>>, vector<1x11x64xbf16>,
    %62 = arith.truncf %45 : vector<78x64xf32> to vector<78x64xbf16>
    %c0_53 = arith.constant 0 : index
    %c11_54 = arith.constant 11 : index
    %c0_55 = arith.constant 0 : index
    %63 = vector.load %arg7[%c0_53, %c11_54, %c0_55] : memref<1x100x64xbf16, #tpu.memory_space<vmem>>, vector<1x78x64xbf16>
    %64 = vector.shape_cast %63 : vector<1x78x64xbf16> to vector<78x64xbf16>
    %65 = vector.shape_cast %62 : vector<78x64xbf16> to vector<1x78x64xbf16>
    tpu.vector_store %arg7[%c0_53, %c11_54, %c0_55], %65 {strides = array<i32>} : memref<1x100x64xbf16, #tpu.memory_space<vmem>>, vector<1x78x64xbf16>,
    %c0_56 = arith.constant 0 : index
    %c89 = arith.constant 89 : index
    %c0_57 = arith.constant 0 : index
    %66 = vector.load %arg7[%c0_56, %c89, %c0_57] : memref<1x100x64xbf16, #tpu.memory_space<vmem>>, vector<1x11x64xbf16>
    %67 = vector.shape_cast %66 : vector<1x11x64xbf16> to vector<11x64xbf16>
    %68 = vector.shape_cast %58 : vector<11x64xbf16> to vector<1x11x64xbf16>
    tpu.vector_store %arg7[%c0_56, %c89, %c0_57], %68 {strides = array<i32>} : memref<1x100x64xbf16, #tpu.memory_space<vmem>>, vector<1x11x64xbf16>,
    return
  }
  func.func @transform_0(%arg0: i32) -> (i32, i32, i32) {
    %c0_i32 = arith.constant 0 : i32
    %c0_i32_0 = arith.constant 0 : i32
    %c0_i32_1 = arith.constant 0 : i32
    return %arg0, %c0_i32, %c0_i32_0 : i32, i32, i32
  }
  func.func @transform_1(%arg0: i32) -> (i32, i32, i32) {
    %c0_i32 = arith.constant 0 : i32
    %c0_i32_0 = arith.constant 0 : i32
    %c0_i32_1 = arith.constant 0 : i32
    return %arg0, %c0_i32, %c0_i32_0 : i32, i32, i32
  }
  func.func @transform_2(%arg0: i32) -> (i32, i32, i32) {
    %c0_i32 = arith.constant 0 : i32
    %c0_i32_0 = arith.constant 0 : i32
    %c0_i32_1 = arith.constant 0 : i32
    return %arg0, %c0_i32, %c0_i32_0 : i32, i32, i32
  }
  func.func @transform_3(%arg0: i32) -> (i32, i32, i32) {
    %c0_i32 = arith.constant 0 : i32
    %c0_i32_0 = arith.constant 0 : i32
    %c0_i32_1 = arith.constant 0 : i32
    return %arg0, %c0_i32, %c0_i32_0 : i32, i32, i32
  }
  func.func @transform_4(%arg0: i32) -> (i32, i32) {
    %c0_i32 = arith.constant 0 : i32
    %c0_i32_0 = arith.constant 0 : i32
    %c0_i32_1 = arith.constant 0 : i32
    return %c0_i32, %c0_i32_0 : i32, i32
  }
  func.func @transform_5(%arg0: i32) -> (i32, i32) {
    %c0_i32 = arith.constant 0 : i32
    %c0_i32_0 = arith.constant 0 : i32
    %c0_i32_1 = arith.constant 0 : i32
    return %c0_i32, %c0_i32_0 : i32, i32
  }
  func.func @transform_6(%arg0: i32) -> (i32, i32, i32) {
    %c0_i32 = arith.constant 0 : i32
    %c0_i32_0 = arith.constant 0 : i32
    %c0_i32_1 = arith.constant 0 : i32
    return %arg0, %c0_i32, %c0_i32_0 : i32, i32, i32
  }
  func.func @transform_7(%arg0: i32) -> (i32, i32, i32) {
    %c0_i32 = arith.constant 0 : i32
    %c0_i32_0 = arith.constant 0 : i32
    %c0_i32_1 = arith.constant 0 : i32
    return %arg0, %c0_i32, %c0_i32_0 : i32, i32, i32
  }
}

module attributes {stable_mosaic.version = 11 : i64} {
  func.func @_bn_lrelu_mask_kernel(%arg0: i32, %arg1: memref<1x100x64xbf16, #tpu.memory_space<vmem>>, %arg2: memref<100x1xf32, #tpu.memory_space<vmem>>, %arg3: memref<1x64xf32, #tpu.memory_space<vmem>>, %arg4: memref<1x64xf32, #tpu.memory_space<vmem>>, %arg5: memref<1x100x64xbf16, #tpu.memory_space<vmem>>) attributes {dimension_semantics = [#tpu.dimension_semantics<parallel>], iteration_bounds = array<i64: 2>, scalar_prefetch = 0 : i64, scratch_operands = 0 : i64, tpu.core_type = #tpu.core_type<tc>, window_params = [{transform_indices = @transform_0, window_bounds = array<i64: 1, 100, 64>}, {pipeline_mode = #tpu.pipeline_mode<synchronous>, transform_indices = @transform_1, window_bounds = array<i64: 100, 1>}, {pipeline_mode = #tpu.pipeline_mode<synchronous>, transform_indices = @transform_2, window_bounds = array<i64: 1, 64>}, {pipeline_mode = #tpu.pipeline_mode<synchronous>, transform_indices = @transform_3, window_bounds = array<i64: 1, 64>}, {transform_indices = @transform_4, window_bounds = array<i64: 1, 100, 64>}]} {
    %c0 = arith.constant 0 : index
    %c0_0 = arith.constant 0 : index
    %c0_1 = arith.constant 0 : index
    %0 = vector.load %arg1[%c0, %c0_0, %c0_1] : memref<1x100x64xbf16, #tpu.memory_space<vmem>>, vector<1x100x64xbf16>
    %1 = vector.shape_cast %0 : vector<1x100x64xbf16> to vector<100x64xbf16>
    %2 = arith.extf %1 : vector<100x64xbf16> to vector<100x64xf32>
    %c0_2 = arith.constant 0 : index
    %c0_3 = arith.constant 0 : index
    %3 = vector.load %arg3[%c0_2, %c0_3] : memref<1x64xf32, #tpu.memory_space<vmem>>, vector<1x64xf32>
    %4 = vector.broadcast %3 : vector<1x64xf32> to vector<100x64xf32>
    %5 = arith.mulf %2, %4 : vector<100x64xf32>
    %c0_4 = arith.constant 0 : index
    %c0_5 = arith.constant 0 : index
    %6 = vector.load %arg4[%c0_4, %c0_5] : memref<1x64xf32, #tpu.memory_space<vmem>>, vector<1x64xf32>
    %7 = vector.broadcast %6 : vector<1x64xf32> to vector<100x64xf32>
    %8 = arith.addf %5, %7 : vector<100x64xf32>
    %cst = arith.constant 0.000000e+00 : f32
    %9 = vector.broadcast %cst : f32 to vector<100x64xf32>
    %10 = arith.cmpf ogt, %8, %9 : vector<100x64xf32>
    %cst_6 = arith.constant 2.000000e-01 : f32
    %11 = vector.broadcast %cst_6 : f32 to vector<100x64xf32>
    %12 = arith.mulf %11, %8 : vector<100x64xf32>
    %13 = arith.select %10, %8, %12 : vector<100x64xi1>, vector<100x64xf32>
    %c0_7 = arith.constant 0 : index
    %c0_8 = arith.constant 0 : index
    %14 = vector.load %arg2[%c0_7, %c0_8] : memref<100x1xf32, #tpu.memory_space<vmem>>, vector<100x1xf32>
    %cst_9 = arith.constant 0.000000e+00 : f32
    %15 = vector.broadcast %cst_9 : f32 to vector<100x1xf32>
    %16 = arith.cmpf ogt, %14, %15 : vector<100x1xf32>
    %cst_10 = arith.constant 0.000000e+00 : f32
    %17 = vector.shape_cast %16 : vector<100x1xi1> to vector<100x1xi1>
    %18 = vector.broadcast %17 : vector<100x1xi1> to vector<100x64xi1>
    %19 = vector.broadcast %cst_10 : f32 to vector<100x64xf32>
    %20 = arith.select %18, %13, %19 : vector<100x64xi1>, vector<100x64xf32>
    %21 = arith.truncf %20 : vector<100x64xf32> to vector<100x64xbf16>
    %c0_11 = arith.constant 0 : index
    %c0_12 = arith.constant 0 : index
    %c0_13 = arith.constant 0 : index
    %22 = vector.load %arg5[%c0_11, %c0_12, %c0_13] : memref<1x100x64xbf16, #tpu.memory_space<vmem>>, vector<1x100x64xbf16>
    %23 = vector.shape_cast %22 : vector<1x100x64xbf16> to vector<100x64xbf16>
    %24 = vector.shape_cast %21 : vector<100x64xbf16> to vector<1x100x64xbf16>
    tpu.vector_store %arg5[%c0_11, %c0_12, %c0_13], %24 {strides = array<i32>} : memref<1x100x64xbf16, #tpu.memory_space<vmem>>, vector<1x100x64xbf16>,
    return
  }
  func.func @transform_0(%arg0: i32) -> (i32, i32, i32) {
    %c0_i32 = arith.constant 0 : i32
    %c0_i32_0 = arith.constant 0 : i32
    %c0_i32_1 = arith.constant 0 : i32
    return %arg0, %c0_i32, %c0_i32_0 : i32, i32, i32
  }
  func.func @transform_1(%arg0: i32) -> (i32, i32) {
    %c0_i32 = arith.constant 0 : i32
    %c0_i32_0 = arith.constant 0 : i32
    %c0_i32_1 = arith.constant 0 : i32
    return %c0_i32, %c0_i32_0 : i32, i32
  }
  func.func @transform_2(%arg0: i32) -> (i32, i32) {
    %c0_i32 = arith.constant 0 : i32
    %c0_i32_0 = arith.constant 0 : i32
    %c0_i32_1 = arith.constant 0 : i32
    return %c0_i32, %c0_i32_0 : i32, i32
  }
  func.func @transform_3(%arg0: i32) -> (i32, i32) {
    %c0_i32 = arith.constant 0 : i32
    %c0_i32_0 = arith.constant 0 : i32
    %c0_i32_1 = arith.constant 0 : i32
    return %c0_i32, %c0_i32_0 : i32, i32
  }
  func.func @transform_4(%arg0: i32) -> (i32, i32, i32) {
    %c0_i32 = arith.constant 0 : i32
    %c0_i32_0 = arith.constant 0 : i32
    %c0_i32_1 = arith.constant 0 : i32
    return %arg0, %c0_i32, %c0_i32_0 : i32, i32, i32
  }
}

module attributes {stable_mosaic.version = 11 : i64} {
  func.func @kernel(%arg0: i32, %arg1: memref<1x100x64xbf16, #tpu.memory_space<vmem>>, %arg2: memref<576x64xbf16, #tpu.memory_space<vmem>>, %arg3: memref<100x1xf32, #tpu.memory_space<vmem>>, %arg4: memref<1x100x64xbf16, #tpu.memory_space<vmem>>, %arg5: memref<1x8x128xf32, #tpu.memory_space<vmem>>) attributes {dimension_semantics = [#tpu.dimension_semantics<parallel>], iteration_bounds = array<i64: 2>, scalar_prefetch = 0 : i64, scratch_operands = 0 : i64, tpu.core_type = #tpu.core_type<tc>, window_params = [{transform_indices = @transform_0, window_bounds = array<i64: 1, 100, 64>}, {pipeline_mode = #tpu.pipeline_mode<synchronous>, transform_indices = @transform_1, window_bounds = array<i64: 576, 64>}, {pipeline_mode = #tpu.pipeline_mode<synchronous>, transform_indices = @transform_2, window_bounds = array<i64: 100, 1>}, {transform_indices = @transform_3, window_bounds = array<i64: 1, 100, 64>}, {transform_indices = @transform_4, window_bounds = array<i64: 1, 8, 128>}]} {
    %cst = arith.constant 0.000000e+00 : f32
    %0 = vector.broadcast %cst : f32 to vector<78x64xf32>
    %c0 = arith.constant 0 : index
    %c0_0 = arith.constant 0 : index
    %c0_1 = arith.constant 0 : index
    %1 = vector.load %arg1[%c0, %c0_0, %c0_1] : memref<1x100x64xbf16, #tpu.memory_space<vmem>>, vector<1x78x64xbf16>
    %2 = vector.shape_cast %1 : vector<1x78x64xbf16> to vector<78x64xbf16>
    %c0_2 = arith.constant 0 : index
    %c0_3 = arith.constant 0 : index
    %3 = vector.load %arg2[%c0_2, %c0_3] : memref<576x64xbf16, #tpu.memory_space<vmem>>, vector<64x64xbf16>
    %cst_4 = arith.constant dense<0.000000e+00> : vector<78x64xf32>
    %4 = tpu.matmul %2, %3, %cst_4 {dimension_numbers = #tpu.dot_dimension_numbers<[1], [0], [0], [1], [0, 0, 1, 1], [], []>} : vector<78x64xbf16>, vector<64x64xbf16>, vector<78x64xf32> -> vector<78x64xf32>
    %5 = arith.addf %0, %4 : vector<78x64xf32>
    %c0_5 = arith.constant 0 : index
    %c1 = arith.constant 1 : index
    %c0_6 = arith.constant 0 : index
    %6 = vector.load %arg1[%c0_5, %c1, %c0_6] : memref<1x100x64xbf16, #tpu.memory_space<vmem>>, vector<1x78x64xbf16>
    %7 = vector.shape_cast %6 : vector<1x78x64xbf16> to vector<78x64xbf16>
    %c64 = arith.constant 64 : index
    %c0_7 = arith.constant 0 : index
    %8 = vector.load %arg2[%c64, %c0_7] : memref<576x64xbf16, #tpu.memory_space<vmem>>, vector<64x64xbf16>
    %cst_8 = arith.constant dense<0.000000e+00> : vector<78x64xf32>
    %9 = tpu.matmul %7, %8, %cst_8 {dimension_numbers = #tpu.dot_dimension_numbers<[1], [0], [0], [1], [0, 0, 1, 1], [], []>} : vector<78x64xbf16>, vector<64x64xbf16>, vector<78x64xf32> -> vector<78x64xf32>
    %10 = arith.addf %5, %9 : vector<78x64xf32>
    %c0_9 = arith.constant 0 : index
    %c2 = arith.constant 2 : index
    %c0_10 = arith.constant 0 : index
    %11 = vector.load %arg1[%c0_9, %c2, %c0_10] : memref<1x100x64xbf16, #tpu.memory_space<vmem>>, vector<1x78x64xbf16>
    %12 = vector.shape_cast %11 : vector<1x78x64xbf16> to vector<78x64xbf16>
    %c128 = arith.constant 128 : index
    %c0_11 = arith.constant 0 : index
    %13 = vector.load %arg2[%c128, %c0_11] : memref<576x64xbf16, #tpu.memory_space<vmem>>, vector<64x64xbf16>
    %cst_12 = arith.constant dense<0.000000e+00> : vector<78x64xf32>
    %14 = tpu.matmul %12, %13, %cst_12 {dimension_numbers = #tpu.dot_dimension_numbers<[1], [0], [0], [1], [0, 0, 1, 1], [], []>} : vector<78x64xbf16>, vector<64x64xbf16>, vector<78x64xf32> -> vector<78x64xf32>
    %15 = arith.addf %10, %14 : vector<78x64xf32>
    %c0_13 = arith.constant 0 : index
    %c10 = arith.constant 10 : index
    %c0_14 = arith.constant 0 : index
    %16 = vector.load %arg1[%c0_13, %c10, %c0_14] : memref<1x100x64xbf16, #tpu.memory_space<vmem>>, vector<1x78x64xbf16>
    %17 = vector.shape_cast %16 : vector<1x78x64xbf16> to vector<78x64xbf16>
    %c192 = arith.constant 192 : index
    %c0_15 = arith.constant 0 : index
    %18 = vector.load %arg2[%c192, %c0_15] : memref<576x64xbf16, #tpu.memory_space<vmem>>, vector<64x64xbf16>
    %cst_16 = arith.constant dense<0.000000e+00> : vector<78x64xf32>
    %19 = tpu.matmul %17, %18, %cst_16 {dimension_numbers = #tpu.dot_dimension_numbers<[1], [0], [0], [1], [0, 0, 1, 1], [], []>} : vector<78x64xbf16>, vector<64x64xbf16>, vector<78x64xf32> -> vector<78x64xf32>
    %20 = arith.addf %15, %19 : vector<78x64xf32>
    %c0_17 = arith.constant 0 : index
    %c11 = arith.constant 11 : index
    %c0_18 = arith.constant 0 : index
    %21 = vector.load %arg1[%c0_17, %c11, %c0_18] : memref<1x100x64xbf16, #tpu.memory_space<vmem>>, vector<1x78x64xbf16>
    %22 = vector.shape_cast %21 : vector<1x78x64xbf16> to vector<78x64xbf16>
    %c256 = arith.constant 256 : index
    %c0_19 = arith.constant 0 : index
    %23 = vector.load %arg2[%c256, %c0_19] : memref<576x64xbf16, #tpu.memory_space<vmem>>, vector<64x64xbf16>
    %cst_20 = arith.constant dense<0.000000e+00> : vector<78x64xf32>
    %24 = tpu.matmul %22, %23, %cst_20 {dimension_numbers = #tpu.dot_dimension_numbers<[1], [0], [0], [1], [0, 0, 1, 1], [], []>} : vector<78x64xbf16>, vector<64x64xbf16>, vector<78x64xf32> -> vector<78x64xf32>
    %25 = arith.addf %20, %24 : vector<78x64xf32>
    %c0_21 = arith.constant 0 : index
    %c12 = arith.constant 12 : index
    %c0_22 = arith.constant 0 : index
    %26 = vector.load %arg1[%c0_21, %c12, %c0_22] : memref<1x100x64xbf16, #tpu.memory_space<vmem>>, vector<1x78x64xbf16>
    %27 = vector.shape_cast %26 : vector<1x78x64xbf16> to vector<78x64xbf16>
    %c320 = arith.constant 320 : index
    %c0_23 = arith.constant 0 : index
    %28 = vector.load %arg2[%c320, %c0_23] : memref<576x64xbf16, #tpu.memory_space<vmem>>, vector<64x64xbf16>
    %cst_24 = arith.constant dense<0.000000e+00> : vector<78x64xf32>
    %29 = tpu.matmul %27, %28, %cst_24 {dimension_numbers = #tpu.dot_dimension_numbers<[1], [0], [0], [1], [0, 0, 1, 1], [], []>} : vector<78x64xbf16>, vector<64x64xbf16>, vector<78x64xf32> -> vector<78x64xf32>
    %30 = arith.addf %25, %29 : vector<78x64xf32>
    %c0_25 = arith.constant 0 : index
    %c20 = arith.constant 20 : index
    %c0_26 = arith.constant 0 : index
    %31 = vector.load %arg1[%c0_25, %c20, %c0_26] : memref<1x100x64xbf16, #tpu.memory_space<vmem>>, vector<1x78x64xbf16>
    %32 = vector.shape_cast %31 : vector<1x78x64xbf16> to vector<78x64xbf16>
    %c384 = arith.constant 384 : index
    %c0_27 = arith.constant 0 : index
    %33 = vector.load %arg2[%c384, %c0_27] : memref<576x64xbf16, #tpu.memory_space<vmem>>, vector<64x64xbf16>
    %cst_28 = arith.constant dense<0.000000e+00> : vector<78x64xf32>
    %34 = tpu.matmul %32, %33, %cst_28 {dimension_numbers = #tpu.dot_dimension_numbers<[1], [0], [0], [1], [0, 0, 1, 1], [], []>} : vector<78x64xbf16>, vector<64x64xbf16>, vector<78x64xf32> -> vector<78x64xf32>
    %35 = arith.addf %30, %34 : vector<78x64xf32>
    %c0_29 = arith.constant 0 : index
    %c21 = arith.constant 21 : index
    %c0_30 = arith.constant 0 : index
    %36 = vector.load %arg1[%c0_29, %c21, %c0_30] : memref<1x100x64xbf16, #tpu.memory_space<vmem>>, vector<1x78x64xbf16>
    %37 = vector.shape_cast %36 : vector<1x78x64xbf16> to vector<78x64xbf16>
    %c448 = arith.constant 448 : index
    %c0_31 = arith.constant 0 : index
    %38 = vector.load %arg2[%c448, %c0_31] : memref<576x64xbf16, #tpu.memory_space<vmem>>, vector<64x64xbf16>
    %cst_32 = arith.constant dense<0.000000e+00> : vector<78x64xf32>
    %39 = tpu.matmul %37, %38, %cst_32 {dimension_numbers = #tpu.dot_dimension_numbers<[1], [0], [0], [1], [0, 0, 1, 1], [], []>} : vector<78x64xbf16>, vector<64x64xbf16>, vector<78x64xf32> -> vector<78x64xf32>
    %40 = arith.addf %35, %39 : vector<78x64xf32>
    %c0_33 = arith.constant 0 : index
    %c22 = arith.constant 22 : index
    %c0_34 = arith.constant 0 : index
    %41 = vector.load %arg1[%c0_33, %c22, %c0_34] : memref<1x100x64xbf16, #tpu.memory_space<vmem>>, vector<1x78x64xbf16>
    %42 = vector.shape_cast %41 : vector<1x78x64xbf16> to vector<78x64xbf16>
    %c512 = arith.constant 512 : index
    %c0_35 = arith.constant 0 : index
    %43 = vector.load %arg2[%c512, %c0_35] : memref<576x64xbf16, #tpu.memory_space<vmem>>, vector<64x64xbf16>
    %cst_36 = arith.constant dense<0.000000e+00> : vector<78x64xf32>
    %44 = tpu.matmul %42, %43, %cst_36 {dimension_numbers = #tpu.dot_dimension_numbers<[1], [0], [0], [1], [0, 0, 1, 1], [], []>} : vector<78x64xbf16>, vector<64x64xbf16>, vector<78x64xf32> -> vector<78x64xf32>
    %45 = arith.addf %40, %44 : vector<78x64xf32>
    %c11_37 = arith.constant 11 : index
    %c0_38 = arith.constant 0 : index
    %46 = vector.load %arg3[%c11_37, %c0_38] : memref<100x1xf32, #tpu.memory_space<vmem>>, vector<78x1xf32>
    %47 = vector.broadcast %46 : vector<78x1xf32> to vector<78x64xf32>
    %48 = arith.mulf %45, %47 : vector<78x64xf32>
    %cst_39 = arith.constant dense<0.000000e+00> : vector<64xf32>
    %49 = vector.multi_reduction <add>, %48, %cst_39 [0] : vector<78x64xf32> to vector<64xf32>
    %50 = vector.shape_cast %49 : vector<64xf32> to vector<1x64xf32>
    %51 = arith.mulf %48, %48 : vector<78x64xf32>
    %cst_40 = arith.constant dense<0.000000e+00> : vector<64xf32>
    %52 = vector.multi_reduction <add>, %51, %cst_40 [0] : vector<78x64xf32> to vector<64xf32>
    %53 = vector.shape_cast %52 : vector<64xf32> to vector<1x64xf32>
    %54 = tpu.concatenate %50, %53 in 1 : vector<1x64xf32>, vector<1x64xf32> -> vector<1x128xf32>
    %c0_41 = arith.constant 0 : index
    %c0_42 = arith.constant 0 : index
    %c0_43 = arith.constant 0 : index
    %55 = vector.load %arg5[%c0_41, %c0_42, %c0_43] : memref<1x8x128xf32, #tpu.memory_space<vmem>>, vector<1x1x128xf32>
    %56 = vector.shape_cast %55 : vector<1x1x128xf32> to vector<1x128xf32>
    %57 = vector.shape_cast %54 : vector<1x128xf32> to vector<1x1x128xf32>
    tpu.vector_store %arg5[%c0_41, %c0_42, %c0_43], %57 {strides = array<i32>} : memref<1x8x128xf32, #tpu.memory_space<vmem>>, vector<1x1x128xf32>,
    %cst_44 = arith.constant 0.000000e+00 : bf16
    %58 = vector.broadcast %cst_44 : bf16 to vector<11x64xbf16>
    %c0_45 = arith.constant 0 : index
    %c0_46 = arith.constant 0 : index
    %c0_47 = arith.constant 0 : index
    %59 = vector.load %arg4[%c0_45, %c0_46, %c0_47] : memref<1x100x64xbf16, #tpu.memory_space<vmem>>, vector<1x11x64xbf16>
    %60 = vector.shape_cast %59 : vector<1x11x64xbf16> to vector<11x64xbf16>
    %61 = vector.shape_cast %58 : vector<11x64xbf16> to vector<1x11x64xbf16>
    tpu.vector_store %arg4[%c0_45, %c0_46, %c0_47], %61 {strides = array<i32>} : memref<1x100x64xbf16, #tpu.memory_space<vmem>>, vector<1x11x64xbf16>,
    %62 = arith.truncf %45 : vector<78x64xf32> to vector<78x64xbf16>
    %c0_48 = arith.constant 0 : index
    %c11_49 = arith.constant 11 : index
    %c0_50 = arith.constant 0 : index
    %63 = vector.load %arg4[%c0_48, %c11_49, %c0_50] : memref<1x100x64xbf16, #tpu.memory_space<vmem>>, vector<1x78x64xbf16>
    %64 = vector.shape_cast %63 : vector<1x78x64xbf16> to vector<78x64xbf16>
    %65 = vector.shape_cast %62 : vector<78x64xbf16> to vector<1x78x64xbf16>
    tpu.vector_store %arg4[%c0_48, %c11_49, %c0_50], %65 {strides = array<i32>} : memref<1x100x64xbf16, #tpu.memory_space<vmem>>, vector<1x78x64xbf16>,
    %c0_51 = arith.constant 0 : index
    %c89 = arith.constant 89 : index
    %c0_52 = arith.constant 0 : index
    %66 = vector.load %arg4[%c0_51, %c89, %c0_52] : memref<1x100x64xbf16, #tpu.memory_space<vmem>>, vector<1x11x64xbf16>
    %67 = vector.shape_cast %66 : vector<1x11x64xbf16> to vector<11x64xbf16>
    %68 = vector.shape_cast %58 : vector<11x64xbf16> to vector<1x11x64xbf16>
    tpu.vector_store %arg4[%c0_51, %c89, %c0_52], %68 {strides = array<i32>} : memref<1x100x64xbf16, #tpu.memory_space<vmem>>, vector<1x11x64xbf16>,
    return
  }
  func.func @transform_0(%arg0: i32) -> (i32, i32, i32) {
    %c0_i32 = arith.constant 0 : i32
    %c0_i32_0 = arith.constant 0 : i32
    %c0_i32_1 = arith.constant 0 : i32
    return %arg0, %c0_i32, %c0_i32_0 : i32, i32, i32
  }
  func.func @transform_1(%arg0: i32) -> (i32, i32) {
    %c0_i32 = arith.constant 0 : i32
    %c0_i32_0 = arith.constant 0 : i32
    %c0_i32_1 = arith.constant 0 : i32
    return %c0_i32, %c0_i32_0 : i32, i32
  }
  func.func @transform_2(%arg0: i32) -> (i32, i32) {
    %c0_i32 = arith.constant 0 : i32
    %c0_i32_0 = arith.constant 0 : i32
    %c0_i32_1 = arith.constant 0 : i32
    return %c0_i32, %c0_i32_0 : i32, i32
  }
  func.func @transform_3(%arg0: i32) -> (i32, i32, i32) {
    %c0_i32 = arith.constant 0 : i32
    %c0_i32_0 = arith.constant 0 : i32
    %c0_i32_1 = arith.constant 0 : i32
    return %arg0, %c0_i32, %c0_i32_0 : i32, i32, i32
  }
  func.func @transform_4(%arg0: i32) -> (i32, i32, i32) {
    %c0_i32 = arith.constant 0 : i32
    %c0_i32_0 = arith.constant 0 : i32
    %c0_i32_1 = arith.constant 0 : i32
    return %arg0, %c0_i32, %c0_i32_0 : i32, i32, i32
  }
}

module attributes {stable_mosaic.version = 11 : i64} {
  func.func @kernel(%arg0: i32, %arg1: memref<1x36x64xbf16, #tpu.memory_space<vmem>>, %arg2: memref<1x36x64xbf16, #tpu.memory_space<vmem>>, %arg3: memref<1x36x64xbf16, #tpu.memory_space<vmem>>, %arg4: memref<1x36x64xbf16, #tpu.memory_space<vmem>>, %arg5: memref<576x64xbf16, #tpu.memory_space<vmem>>, %arg6: memref<36x1xf32, #tpu.memory_space<vmem>>, %arg7: memref<1x36x64xbf16, #tpu.memory_space<vmem>>, %arg8: memref<1x8x128xf32, #tpu.memory_space<vmem>>) attributes {dimension_semantics = [#tpu.dimension_semantics<parallel>], iteration_bounds = array<i64: 2>, scalar_prefetch = 0 : i64, scratch_operands = 0 : i64, tpu.core_type = #tpu.core_type<tc>, window_params = [{transform_indices = @transform_0, window_bounds = array<i64: 1, 36, 64>}, {transform_indices = @transform_1, window_bounds = array<i64: 1, 36, 64>}, {transform_indices = @transform_2, window_bounds = array<i64: 1, 36, 64>}, {transform_indices = @transform_3, window_bounds = array<i64: 1, 36, 64>}, {pipeline_mode = #tpu.pipeline_mode<synchronous>, transform_indices = @transform_4, window_bounds = array<i64: 576, 64>}, {pipeline_mode = #tpu.pipeline_mode<synchronous>, transform_indices = @transform_5, window_bounds = array<i64: 36, 1>}, {transform_indices = @transform_6, window_bounds = array<i64: 1, 36, 64>}, {transform_indices = @transform_7, window_bounds = array<i64: 1, 8, 128>}]} {
    %cst = arith.constant 0.000000e+00 : f32
    %0 = vector.broadcast %cst : f32 to vector<22x64xf32>
    %c0 = arith.constant 0 : index
    %c7 = arith.constant 7 : index
    %c0_0 = arith.constant 0 : index
    %1 = vector.load %arg1[%c0, %c7, %c0_0] : memref<1x36x64xbf16, #tpu.memory_space<vmem>>, vector<1x22x64xbf16>
    %2 = vector.shape_cast %1 : vector<1x22x64xbf16> to vector<22x64xbf16>
    %c0_1 = arith.constant 0 : index
    %c0_2 = arith.constant 0 : index
    %3 = vector.load %arg5[%c0_1, %c0_2] : memref<576x64xbf16, #tpu.memory_space<vmem>>, vector<64x64xbf16>
    %cst_3 = arith.constant dense<0.000000e+00> : vector<22x64xf32>
    %4 = tpu.matmul %2, %3, %cst_3 {dimension_numbers = #tpu.dot_dimension_numbers<[1], [0], [0], [1], [0, 0, 1, 1], [], []>} : vector<22x64xbf16>, vector<64x64xbf16>, vector<22x64xf32> -> vector<22x64xf32>
    %5 = arith.addf %0, %4 : vector<22x64xf32>
    %c0_4 = arith.constant 0 : index
    %c7_5 = arith.constant 7 : index
    %c0_6 = arith.constant 0 : index
    %6 = vector.load %arg2[%c0_4, %c7_5, %c0_6] : memref<1x36x64xbf16, #tpu.memory_space<vmem>>, vector<1x22x64xbf16>
    %7 = vector.shape_cast %6 : vector<1x22x64xbf16> to vector<22x64xbf16>
    %c64 = arith.constant 64 : index
    %c0_7 = arith.constant 0 : index
    %8 = vector.load %arg5[%c64, %c0_7] : memref<576x64xbf16, #tpu.memory_space<vmem>>, vector<64x64xbf16>
    %cst_8 = arith.constant dense<0.000000e+00> : vector<22x64xf32>
    %9 = tpu.matmul %7, %8, %cst_8 {dimension_numbers = #tpu.dot_dimension_numbers<[1], [0], [0], [1], [0, 0, 1, 1], [], []>} : vector<22x64xbf16>, vector<64x64xbf16>, vector<22x64xf32> -> vector<22x64xf32>
    %10 = arith.addf %5, %9 : vector<22x64xf32>
    %c0_9 = arith.constant 0 : index
    %c8 = arith.constant 8 : index
    %c0_10 = arith.constant 0 : index
    %11 = vector.load %arg1[%c0_9, %c8, %c0_10] : memref<1x36x64xbf16, #tpu.memory_space<vmem>>, vector<1x22x64xbf16>
    %12 = vector.shape_cast %11 : vector<1x22x64xbf16> to vector<22x64xbf16>
    %c128 = arith.constant 128 : index
    %c0_11 = arith.constant 0 : index
    %13 = vector.load %arg5[%c128, %c0_11] : memref<576x64xbf16, #tpu.memory_space<vmem>>, vector<64x64xbf16>
    %cst_12 = arith.constant dense<0.000000e+00> : vector<22x64xf32>
    %14 = tpu.matmul %12, %13, %cst_12 {dimension_numbers = #tpu.dot_dimension_numbers<[1], [0], [0], [1], [0, 0, 1, 1], [], []>} : vector<22x64xbf16>, vector<64x64xbf16>, vector<22x64xf32> -> vector<22x64xf32>
    %15 = arith.addf %10, %14 : vector<22x64xf32>
    %c0_13 = arith.constant 0 : index
    %c7_14 = arith.constant 7 : index
    %c0_15 = arith.constant 0 : index
    %16 = vector.load %arg3[%c0_13, %c7_14, %c0_15] : memref<1x36x64xbf16, #tpu.memory_space<vmem>>, vector<1x22x64xbf16>
    %17 = vector.shape_cast %16 : vector<1x22x64xbf16> to vector<22x64xbf16>
    %c192 = arith.constant 192 : index
    %c0_16 = arith.constant 0 : index
    %18 = vector.load %arg5[%c192, %c0_16] : memref<576x64xbf16, #tpu.memory_space<vmem>>, vector<64x64xbf16>
    %cst_17 = arith.constant dense<0.000000e+00> : vector<22x64xf32>
    %19 = tpu.matmul %17, %18, %cst_17 {dimension_numbers = #tpu.dot_dimension_numbers<[1], [0], [0], [1], [0, 0, 1, 1], [], []>} : vector<22x64xbf16>, vector<64x64xbf16>, vector<22x64xf32> -> vector<22x64xf32>
    %20 = arith.addf %15, %19 : vector<22x64xf32>
    %c0_18 = arith.constant 0 : index
    %c7_19 = arith.constant 7 : index
    %c0_20 = arith.constant 0 : index
    %21 = vector.load %arg4[%c0_18, %c7_19, %c0_20] : memref<1x36x64xbf16, #tpu.memory_space<vmem>>, vector<1x22x64xbf16>
    %22 = vector.shape_cast %21 : vector<1x22x64xbf16> to vector<22x64xbf16>
    %c256 = arith.constant 256 : index
    %c0_21 = arith.constant 0 : index
    %23 = vector.load %arg5[%c256, %c0_21] : memref<576x64xbf16, #tpu.memory_space<vmem>>, vector<64x64xbf16>
    %cst_22 = arith.constant dense<0.000000e+00> : vector<22x64xf32>
    %24 = tpu.matmul %22, %23, %cst_22 {dimension_numbers = #tpu.dot_dimension_numbers<[1], [0], [0], [1], [0, 0, 1, 1], [], []>} : vector<22x64xbf16>, vector<64x64xbf16>, vector<22x64xf32> -> vector<22x64xf32>
    %25 = arith.addf %20, %24 : vector<22x64xf32>
    %c0_23 = arith.constant 0 : index
    %c8_24 = arith.constant 8 : index
    %c0_25 = arith.constant 0 : index
    %26 = vector.load %arg3[%c0_23, %c8_24, %c0_25] : memref<1x36x64xbf16, #tpu.memory_space<vmem>>, vector<1x22x64xbf16>
    %27 = vector.shape_cast %26 : vector<1x22x64xbf16> to vector<22x64xbf16>
    %c320 = arith.constant 320 : index
    %c0_26 = arith.constant 0 : index
    %28 = vector.load %arg5[%c320, %c0_26] : memref<576x64xbf16, #tpu.memory_space<vmem>>, vector<64x64xbf16>
    %cst_27 = arith.constant dense<0.000000e+00> : vector<22x64xf32>
    %29 = tpu.matmul %27, %28, %cst_27 {dimension_numbers = #tpu.dot_dimension_numbers<[1], [0], [0], [1], [0, 0, 1, 1], [], []>} : vector<22x64xbf16>, vector<64x64xbf16>, vector<22x64xf32> -> vector<22x64xf32>
    %30 = arith.addf %25, %29 : vector<22x64xf32>
    %c0_28 = arith.constant 0 : index
    %c13 = arith.constant 13 : index
    %c0_29 = arith.constant 0 : index
    %31 = vector.load %arg1[%c0_28, %c13, %c0_29] : memref<1x36x64xbf16, #tpu.memory_space<vmem>>, vector<1x22x64xbf16>
    %32 = vector.shape_cast %31 : vector<1x22x64xbf16> to vector<22x64xbf16>
    %c384 = arith.constant 384 : index
    %c0_30 = arith.constant 0 : index
    %33 = vector.load %arg5[%c384, %c0_30] : memref<576x64xbf16, #tpu.memory_space<vmem>>, vector<64x64xbf16>
    %cst_31 = arith.constant dense<0.000000e+00> : vector<22x64xf32>
    %34 = tpu.matmul %32, %33, %cst_31 {dimension_numbers = #tpu.dot_dimension_numbers<[1], [0], [0], [1], [0, 0, 1, 1], [], []>} : vector<22x64xbf16>, vector<64x64xbf16>, vector<22x64xf32> -> vector<22x64xf32>
    %35 = arith.addf %30, %34 : vector<22x64xf32>
    %c0_32 = arith.constant 0 : index
    %c13_33 = arith.constant 13 : index
    %c0_34 = arith.constant 0 : index
    %36 = vector.load %arg2[%c0_32, %c13_33, %c0_34] : memref<1x36x64xbf16, #tpu.memory_space<vmem>>, vector<1x22x64xbf16>
    %37 = vector.shape_cast %36 : vector<1x22x64xbf16> to vector<22x64xbf16>
    %c448 = arith.constant 448 : index
    %c0_35 = arith.constant 0 : index
    %38 = vector.load %arg5[%c448, %c0_35] : memref<576x64xbf16, #tpu.memory_space<vmem>>, vector<64x64xbf16>
    %cst_36 = arith.constant dense<0.000000e+00> : vector<22x64xf32>
    %39 = tpu.matmul %37, %38, %cst_36 {dimension_numbers = #tpu.dot_dimension_numbers<[1], [0], [0], [1], [0, 0, 1, 1], [], []>} : vector<22x64xbf16>, vector<64x64xbf16>, vector<22x64xf32> -> vector<22x64xf32>
    %40 = arith.addf %35, %39 : vector<22x64xf32>
    %c0_37 = arith.constant 0 : index
    %c14 = arith.constant 14 : index
    %c0_38 = arith.constant 0 : index
    %41 = vector.load %arg1[%c0_37, %c14, %c0_38] : memref<1x36x64xbf16, #tpu.memory_space<vmem>>, vector<1x22x64xbf16>
    %42 = vector.shape_cast %41 : vector<1x22x64xbf16> to vector<22x64xbf16>
    %c512 = arith.constant 512 : index
    %c0_39 = arith.constant 0 : index
    %43 = vector.load %arg5[%c512, %c0_39] : memref<576x64xbf16, #tpu.memory_space<vmem>>, vector<64x64xbf16>
    %cst_40 = arith.constant dense<0.000000e+00> : vector<22x64xf32>
    %44 = tpu.matmul %42, %43, %cst_40 {dimension_numbers = #tpu.dot_dimension_numbers<[1], [0], [0], [1], [0, 0, 1, 1], [], []>} : vector<22x64xbf16>, vector<64x64xbf16>, vector<22x64xf32> -> vector<22x64xf32>
    %45 = arith.addf %40, %44 : vector<22x64xf32>
    %c7_41 = arith.constant 7 : index
    %c0_42 = arith.constant 0 : index
    %46 = vector.load %arg6[%c7_41, %c0_42] : memref<36x1xf32, #tpu.memory_space<vmem>>, vector<22x1xf32>
    %47 = vector.broadcast %46 : vector<22x1xf32> to vector<22x64xf32>
    %48 = arith.mulf %45, %47 : vector<22x64xf32>
    %cst_43 = arith.constant dense<0.000000e+00> : vector<64xf32>
    %49 = vector.multi_reduction <add>, %48, %cst_43 [0] : vector<22x64xf32> to vector<64xf32>
    %50 = vector.shape_cast %49 : vector<64xf32> to vector<1x64xf32>
    %51 = arith.mulf %48, %48 : vector<22x64xf32>
    %cst_44 = arith.constant dense<0.000000e+00> : vector<64xf32>
    %52 = vector.multi_reduction <add>, %51, %cst_44 [0] : vector<22x64xf32> to vector<64xf32>
    %53 = vector.shape_cast %52 : vector<64xf32> to vector<1x64xf32>
    %54 = tpu.concatenate %50, %53 in 1 : vector<1x64xf32>, vector<1x64xf32> -> vector<1x128xf32>
    %c0_45 = arith.constant 0 : index
    %c0_46 = arith.constant 0 : index
    %c0_47 = arith.constant 0 : index
    %55 = vector.load %arg8[%c0_45, %c0_46, %c0_47] : memref<1x8x128xf32, #tpu.memory_space<vmem>>, vector<1x1x128xf32>
    %56 = vector.shape_cast %55 : vector<1x1x128xf32> to vector<1x128xf32>
    %57 = vector.shape_cast %54 : vector<1x128xf32> to vector<1x1x128xf32>
    tpu.vector_store %arg8[%c0_45, %c0_46, %c0_47], %57 {strides = array<i32>} : memref<1x8x128xf32, #tpu.memory_space<vmem>>, vector<1x1x128xf32>,
    %cst_48 = arith.constant 0.000000e+00 : bf16
    %58 = vector.broadcast %cst_48 : bf16 to vector<7x64xbf16>
    %c0_49 = arith.constant 0 : index
    %c0_50 = arith.constant 0 : index
    %c0_51 = arith.constant 0 : index
    %59 = vector.load %arg7[%c0_49, %c0_50, %c0_51] : memref<1x36x64xbf16, #tpu.memory_space<vmem>>, vector<1x7x64xbf16>
    %60 = vector.shape_cast %59 : vector<1x7x64xbf16> to vector<7x64xbf16>
    %61 = vector.shape_cast %58 : vector<7x64xbf16> to vector<1x7x64xbf16>
    tpu.vector_store %arg7[%c0_49, %c0_50, %c0_51], %61 {strides = array<i32>} : memref<1x36x64xbf16, #tpu.memory_space<vmem>>, vector<1x7x64xbf16>,
    %62 = arith.truncf %45 : vector<22x64xf32> to vector<22x64xbf16>
    %c0_52 = arith.constant 0 : index
    %c7_53 = arith.constant 7 : index
    %c0_54 = arith.constant 0 : index
    %63 = vector.load %arg7[%c0_52, %c7_53, %c0_54] : memref<1x36x64xbf16, #tpu.memory_space<vmem>>, vector<1x22x64xbf16>
    %64 = vector.shape_cast %63 : vector<1x22x64xbf16> to vector<22x64xbf16>
    %65 = vector.shape_cast %62 : vector<22x64xbf16> to vector<1x22x64xbf16>
    tpu.vector_store %arg7[%c0_52, %c7_53, %c0_54], %65 {strides = array<i32>} : memref<1x36x64xbf16, #tpu.memory_space<vmem>>, vector<1x22x64xbf16>,
    %c0_55 = arith.constant 0 : index
    %c29 = arith.constant 29 : index
    %c0_56 = arith.constant 0 : index
    %66 = vector.load %arg7[%c0_55, %c29, %c0_56] : memref<1x36x64xbf16, #tpu.memory_space<vmem>>, vector<1x7x64xbf16>
    %67 = vector.shape_cast %66 : vector<1x7x64xbf16> to vector<7x64xbf16>
    %68 = vector.shape_cast %58 : vector<7x64xbf16> to vector<1x7x64xbf16>
    tpu.vector_store %arg7[%c0_55, %c29, %c0_56], %68 {strides = array<i32>} : memref<1x36x64xbf16, #tpu.memory_space<vmem>>, vector<1x7x64xbf16>,
    return
  }
  func.func @transform_0(%arg0: i32) -> (i32, i32, i32) {
    %c0_i32 = arith.constant 0 : i32
    %c0_i32_0 = arith.constant 0 : i32
    %c0_i32_1 = arith.constant 0 : i32
    return %arg0, %c0_i32, %c0_i32_0 : i32, i32, i32
  }
  func.func @transform_1(%arg0: i32) -> (i32, i32, i32) {
    %c0_i32 = arith.constant 0 : i32
    %c0_i32_0 = arith.constant 0 : i32
    %c0_i32_1 = arith.constant 0 : i32
    return %arg0, %c0_i32, %c0_i32_0 : i32, i32, i32
  }
  func.func @transform_2(%arg0: i32) -> (i32, i32, i32) {
    %c0_i32 = arith.constant 0 : i32
    %c0_i32_0 = arith.constant 0 : i32
    %c0_i32_1 = arith.constant 0 : i32
    return %arg0, %c0_i32, %c0_i32_0 : i32, i32, i32
  }
  func.func @transform_3(%arg0: i32) -> (i32, i32, i32) {
    %c0_i32 = arith.constant 0 : i32
    %c0_i32_0 = arith.constant 0 : i32
    %c0_i32_1 = arith.constant 0 : i32
    return %arg0, %c0_i32, %c0_i32_0 : i32, i32, i32
  }
  func.func @transform_4(%arg0: i32) -> (i32, i32) {
    %c0_i32 = arith.constant 0 : i32
    %c0_i32_0 = arith.constant 0 : i32
    %c0_i32_1 = arith.constant 0 : i32
    return %c0_i32, %c0_i32_0 : i32, i32
  }
  func.func @transform_5(%arg0: i32) -> (i32, i32) {
    %c0_i32 = arith.constant 0 : i32
    %c0_i32_0 = arith.constant 0 : i32
    %c0_i32_1 = arith.constant 0 : i32
    return %c0_i32, %c0_i32_0 : i32, i32
  }
  func.func @transform_6(%arg0: i32) -> (i32, i32, i32) {
    %c0_i32 = arith.constant 0 : i32
    %c0_i32_0 = arith.constant 0 : i32
    %c0_i32_1 = arith.constant 0 : i32
    return %arg0, %c0_i32, %c0_i32_0 : i32, i32, i32
  }
  func.func @transform_7(%arg0: i32) -> (i32, i32, i32) {
    %c0_i32 = arith.constant 0 : i32
    %c0_i32_0 = arith.constant 0 : i32
    %c0_i32_1 = arith.constant 0 : i32
    return %arg0, %c0_i32, %c0_i32_0 : i32, i32, i32
  }
}

module attributes {stable_mosaic.version = 11 : i64} {
  func.func @_bn_lrelu_mask_kernel(%arg0: i32, %arg1: memref<1x36x64xbf16, #tpu.memory_space<vmem>>, %arg2: memref<36x1xf32, #tpu.memory_space<vmem>>, %arg3: memref<1x64xf32, #tpu.memory_space<vmem>>, %arg4: memref<1x64xf32, #tpu.memory_space<vmem>>, %arg5: memref<1x36x64xbf16, #tpu.memory_space<vmem>>) attributes {dimension_semantics = [#tpu.dimension_semantics<parallel>], iteration_bounds = array<i64: 2>, scalar_prefetch = 0 : i64, scratch_operands = 0 : i64, tpu.core_type = #tpu.core_type<tc>, window_params = [{transform_indices = @transform_0, window_bounds = array<i64: 1, 36, 64>}, {pipeline_mode = #tpu.pipeline_mode<synchronous>, transform_indices = @transform_1, window_bounds = array<i64: 36, 1>}, {pipeline_mode = #tpu.pipeline_mode<synchronous>, transform_indices = @transform_2, window_bounds = array<i64: 1, 64>}, {pipeline_mode = #tpu.pipeline_mode<synchronous>, transform_indices = @transform_3, window_bounds = array<i64: 1, 64>}, {transform_indices = @transform_4, window_bounds = array<i64: 1, 36, 64>}]} {
    %c0 = arith.constant 0 : index
    %c0_0 = arith.constant 0 : index
    %c0_1 = arith.constant 0 : index
    %0 = vector.load %arg1[%c0, %c0_0, %c0_1] : memref<1x36x64xbf16, #tpu.memory_space<vmem>>, vector<1x36x64xbf16>
    %1 = vector.shape_cast %0 : vector<1x36x64xbf16> to vector<36x64xbf16>
    %2 = arith.extf %1 : vector<36x64xbf16> to vector<36x64xf32>
    %c0_2 = arith.constant 0 : index
    %c0_3 = arith.constant 0 : index
    %3 = vector.load %arg3[%c0_2, %c0_3] : memref<1x64xf32, #tpu.memory_space<vmem>>, vector<1x64xf32>
    %4 = vector.broadcast %3 : vector<1x64xf32> to vector<36x64xf32>
    %5 = arith.mulf %2, %4 : vector<36x64xf32>
    %c0_4 = arith.constant 0 : index
    %c0_5 = arith.constant 0 : index
    %6 = vector.load %arg4[%c0_4, %c0_5] : memref<1x64xf32, #tpu.memory_space<vmem>>, vector<1x64xf32>
    %7 = vector.broadcast %6 : vector<1x64xf32> to vector<36x64xf32>
    %8 = arith.addf %5, %7 : vector<36x64xf32>
    %cst = arith.constant 0.000000e+00 : f32
    %9 = vector.broadcast %cst : f32 to vector<36x64xf32>
    %10 = arith.cmpf ogt, %8, %9 : vector<36x64xf32>
    %cst_6 = arith.constant 2.000000e-01 : f32
    %11 = vector.broadcast %cst_6 : f32 to vector<36x64xf32>
    %12 = arith.mulf %11, %8 : vector<36x64xf32>
    %13 = arith.select %10, %8, %12 : vector<36x64xi1>, vector<36x64xf32>
    %c0_7 = arith.constant 0 : index
    %c0_8 = arith.constant 0 : index
    %14 = vector.load %arg2[%c0_7, %c0_8] : memref<36x1xf32, #tpu.memory_space<vmem>>, vector<36x1xf32>
    %cst_9 = arith.constant 0.000000e+00 : f32
    %15 = vector.broadcast %cst_9 : f32 to vector<36x1xf32>
    %16 = arith.cmpf ogt, %14, %15 : vector<36x1xf32>
    %cst_10 = arith.constant 0.000000e+00 : f32
    %17 = vector.shape_cast %16 : vector<36x1xi1> to vector<36x1xi1>
    %18 = vector.broadcast %17 : vector<36x1xi1> to vector<36x64xi1>
    %19 = vector.broadcast %cst_10 : f32 to vector<36x64xf32>
    %20 = arith.select %18, %13, %19 : vector<36x64xi1>, vector<36x64xf32>
    %21 = arith.truncf %20 : vector<36x64xf32> to vector<36x64xbf16>
    %c0_11 = arith.constant 0 : index
    %c0_12 = arith.constant 0 : index
    %c0_13 = arith.constant 0 : index
    %22 = vector.load %arg5[%c0_11, %c0_12, %c0_13] : memref<1x36x64xbf16, #tpu.memory_space<vmem>>, vector<1x36x64xbf16>
    %23 = vector.shape_cast %22 : vector<1x36x64xbf16> to vector<36x64xbf16>
    %24 = vector.shape_cast %21 : vector<36x64xbf16> to vector<1x36x64xbf16>
    tpu.vector_store %arg5[%c0_11, %c0_12, %c0_13], %24 {strides = array<i32>} : memref<1x36x64xbf16, #tpu.memory_space<vmem>>, vector<1x36x64xbf16>,
    return
  }
  func.func @transform_0(%arg0: i32) -> (i32, i32, i32) {
    %c0_i32 = arith.constant 0 : i32
    %c0_i32_0 = arith.constant 0 : i32
    %c0_i32_1 = arith.constant 0 : i32
    return %arg0, %c0_i32, %c0_i32_0 : i32, i32, i32
  }
  func.func @transform_1(%arg0: i32) -> (i32, i32) {
    %c0_i32 = arith.constant 0 : i32
    %c0_i32_0 = arith.constant 0 : i32
    %c0_i32_1 = arith.constant 0 : i32
    return %c0_i32, %c0_i32_0 : i32, i32
  }
  func.func @transform_2(%arg0: i32) -> (i32, i32) {
    %c0_i32 = arith.constant 0 : i32
    %c0_i32_0 = arith.constant 0 : i32
    %c0_i32_1 = arith.constant 0 : i32
    return %c0_i32, %c0_i32_0 : i32, i32
  }
  func.func @transform_3(%arg0: i32) -> (i32, i32) {
    %c0_i32 = arith.constant 0 : i32
    %c0_i32_0 = arith.constant 0 : i32
    %c0_i32_1 = arith.constant 0 : i32
    return %c0_i32, %c0_i32_0 : i32, i32
  }
  func.func @transform_4(%arg0: i32) -> (i32, i32, i32) {
    %c0_i32 = arith.constant 0 : i32
    %c0_i32_0 = arith.constant 0 : i32
    %c0_i32_1 = arith.constant 0 : i32
    return %arg0, %c0_i32, %c0_i32_0 : i32, i32, i32
  }
}

module attributes {stable_mosaic.version = 11 : i64} {
  func.func @kernel(%arg0: i32, %arg1: memref<1x36x64xbf16, #tpu.memory_space<vmem>>, %arg2: memref<576x64xbf16, #tpu.memory_space<vmem>>, %arg3: memref<36x1xf32, #tpu.memory_space<vmem>>, %arg4: memref<1x36x64xbf16, #tpu.memory_space<vmem>>, %arg5: memref<1x8x128xf32, #tpu.memory_space<vmem>>) attributes {dimension_semantics = [#tpu.dimension_semantics<parallel>], iteration_bounds = array<i64: 2>, scalar_prefetch = 0 : i64, scratch_operands = 0 : i64, tpu.core_type = #tpu.core_type<tc>, window_params = [{transform_indices = @transform_0, window_bounds = array<i64: 1, 36, 64>}, {pipeline_mode = #tpu.pipeline_mode<synchronous>, transform_indices = @transform_1, window_bounds = array<i64: 576, 64>}, {pipeline_mode = #tpu.pipeline_mode<synchronous>, transform_indices = @transform_2, window_bounds = array<i64: 36, 1>}, {transform_indices = @transform_3, window_bounds = array<i64: 1, 36, 64>}, {transform_indices = @transform_4, window_bounds = array<i64: 1, 8, 128>}]} {
    %cst = arith.constant 0.000000e+00 : f32
    %0 = vector.broadcast %cst : f32 to vector<22x64xf32>
    %c0 = arith.constant 0 : index
    %c0_0 = arith.constant 0 : index
    %c0_1 = arith.constant 0 : index
    %1 = vector.load %arg1[%c0, %c0_0, %c0_1] : memref<1x36x64xbf16, #tpu.memory_space<vmem>>, vector<1x22x64xbf16>
    %2 = vector.shape_cast %1 : vector<1x22x64xbf16> to vector<22x64xbf16>
    %c0_2 = arith.constant 0 : index
    %c0_3 = arith.constant 0 : index
    %3 = vector.load %arg2[%c0_2, %c0_3] : memref<576x64xbf16, #tpu.memory_space<vmem>>, vector<64x64xbf16>
    %cst_4 = arith.constant dense<0.000000e+00> : vector<22x64xf32>
    %4 = tpu.matmul %2, %3, %cst_4 {dimension_numbers = #tpu.dot_dimension_numbers<[1], [0], [0], [1], [0, 0, 1, 1], [], []>} : vector<22x64xbf16>, vector<64x64xbf16>, vector<22x64xf32> -> vector<22x64xf32>
    %5 = arith.addf %0, %4 : vector<22x64xf32>
    %c0_5 = arith.constant 0 : index
    %c1 = arith.constant 1 : index
    %c0_6 = arith.constant 0 : index
    %6 = vector.load %arg1[%c0_5, %c1, %c0_6] : memref<1x36x64xbf16, #tpu.memory_space<vmem>>, vector<1x22x64xbf16>
    %7 = vector.shape_cast %6 : vector<1x22x64xbf16> to vector<22x64xbf16>
    %c64 = arith.constant 64 : index
    %c0_7 = arith.constant 0 : index
    %8 = vector.load %arg2[%c64, %c0_7] : memref<576x64xbf16, #tpu.memory_space<vmem>>, vector<64x64xbf16>
    %cst_8 = arith.constant dense<0.000000e+00> : vector<22x64xf32>
    %9 = tpu.matmul %7, %8, %cst_8 {dimension_numbers = #tpu.dot_dimension_numbers<[1], [0], [0], [1], [0, 0, 1, 1], [], []>} : vector<22x64xbf16>, vector<64x64xbf16>, vector<22x64xf32> -> vector<22x64xf32>
    %10 = arith.addf %5, %9 : vector<22x64xf32>
    %c0_9 = arith.constant 0 : index
    %c2 = arith.constant 2 : index
    %c0_10 = arith.constant 0 : index
    %11 = vector.load %arg1[%c0_9, %c2, %c0_10] : memref<1x36x64xbf16, #tpu.memory_space<vmem>>, vector<1x22x64xbf16>
    %12 = vector.shape_cast %11 : vector<1x22x64xbf16> to vector<22x64xbf16>
    %c128 = arith.constant 128 : index
    %c0_11 = arith.constant 0 : index
    %13 = vector.load %arg2[%c128, %c0_11] : memref<576x64xbf16, #tpu.memory_space<vmem>>, vector<64x64xbf16>
    %cst_12 = arith.constant dense<0.000000e+00> : vector<22x64xf32>
    %14 = tpu.matmul %12, %13, %cst_12 {dimension_numbers = #tpu.dot_dimension_numbers<[1], [0], [0], [1], [0, 0, 1, 1], [], []>} : vector<22x64xbf16>, vector<64x64xbf16>, vector<22x64xf32> -> vector<22x64xf32>
    %15 = arith.addf %10, %14 : vector<22x64xf32>
    %c0_13 = arith.constant 0 : index
    %c6 = arith.constant 6 : index
    %c0_14 = arith.constant 0 : index
    %16 = vector.load %arg1[%c0_13, %c6, %c0_14] : memref<1x36x64xbf16, #tpu.memory_space<vmem>>, vector<1x22x64xbf16>
    %17 = vector.shape_cast %16 : vector<1x22x64xbf16> to vector<22x64xbf16>
    %c192 = arith.constant 192 : index
    %c0_15 = arith.constant 0 : index
    %18 = vector.load %arg2[%c192, %c0_15] : memref<576x64xbf16, #tpu.memory_space<vmem>>, vector<64x64xbf16>
    %cst_16 = arith.constant dense<0.000000e+00> : vector<22x64xf32>
    %19 = tpu.matmul %17, %18, %cst_16 {dimension_numbers = #tpu.dot_dimension_numbers<[1], [0], [0], [1], [0, 0, 1, 1], [], []>} : vector<22x64xbf16>, vector<64x64xbf16>, vector<22x64xf32> -> vector<22x64xf32>
    %20 = arith.addf %15, %19 : vector<22x64xf32>
    %c0_17 = arith.constant 0 : index
    %c7 = arith.constant 7 : index
    %c0_18 = arith.constant 0 : index
    %21 = vector.load %arg1[%c0_17, %c7, %c0_18] : memref<1x36x64xbf16, #tpu.memory_space<vmem>>, vector<1x22x64xbf16>
    %22 = vector.shape_cast %21 : vector<1x22x64xbf16> to vector<22x64xbf16>
    %c256 = arith.constant 256 : index
    %c0_19 = arith.constant 0 : index
    %23 = vector.load %arg2[%c256, %c0_19] : memref<576x64xbf16, #tpu.memory_space<vmem>>, vector<64x64xbf16>
    %cst_20 = arith.constant dense<0.000000e+00> : vector<22x64xf32>
    %24 = tpu.matmul %22, %23, %cst_20 {dimension_numbers = #tpu.dot_dimension_numbers<[1], [0], [0], [1], [0, 0, 1, 1], [], []>} : vector<22x64xbf16>, vector<64x64xbf16>, vector<22x64xf32> -> vector<22x64xf32>
    %25 = arith.addf %20, %24 : vector<22x64xf32>
    %c0_21 = arith.constant 0 : index
    %c8 = arith.constant 8 : index
    %c0_22 = arith.constant 0 : index
    %26 = vector.load %arg1[%c0_21, %c8, %c0_22] : memref<1x36x64xbf16, #tpu.memory_space<vmem>>, vector<1x22x64xbf16>
    %27 = vector.shape_cast %26 : vector<1x22x64xbf16> to vector<22x64xbf16>
    %c320 = arith.constant 320 : index
    %c0_23 = arith.constant 0 : index
    %28 = vector.load %arg2[%c320, %c0_23] : memref<576x64xbf16, #tpu.memory_space<vmem>>, vector<64x64xbf16>
    %cst_24 = arith.constant dense<0.000000e+00> : vector<22x64xf32>
    %29 = tpu.matmul %27, %28, %cst_24 {dimension_numbers = #tpu.dot_dimension_numbers<[1], [0], [0], [1], [0, 0, 1, 1], [], []>} : vector<22x64xbf16>, vector<64x64xbf16>, vector<22x64xf32> -> vector<22x64xf32>
    %30 = arith.addf %25, %29 : vector<22x64xf32>
    %c0_25 = arith.constant 0 : index
    %c12 = arith.constant 12 : index
    %c0_26 = arith.constant 0 : index
    %31 = vector.load %arg1[%c0_25, %c12, %c0_26] : memref<1x36x64xbf16, #tpu.memory_space<vmem>>, vector<1x22x64xbf16>
    %32 = vector.shape_cast %31 : vector<1x22x64xbf16> to vector<22x64xbf16>
    %c384 = arith.constant 384 : index
    %c0_27 = arith.constant 0 : index
    %33 = vector.load %arg2[%c384, %c0_27] : memref<576x64xbf16, #tpu.memory_space<vmem>>, vector<64x64xbf16>
    %cst_28 = arith.constant dense<0.000000e+00> : vector<22x64xf32>
    %34 = tpu.matmul %32, %33, %cst_28 {dimension_numbers = #tpu.dot_dimension_numbers<[1], [0], [0], [1], [0, 0, 1, 1], [], []>} : vector<22x64xbf16>, vector<64x64xbf16>, vector<22x64xf32> -> vector<22x64xf32>
    %35 = arith.addf %30, %34 : vector<22x64xf32>
    %c0_29 = arith.constant 0 : index
    %c13 = arith.constant 13 : index
    %c0_30 = arith.constant 0 : index
    %36 = vector.load %arg1[%c0_29, %c13, %c0_30] : memref<1x36x64xbf16, #tpu.memory_space<vmem>>, vector<1x22x64xbf16>
    %37 = vector.shape_cast %36 : vector<1x22x64xbf16> to vector<22x64xbf16>
    %c448 = arith.constant 448 : index
    %c0_31 = arith.constant 0 : index
    %38 = vector.load %arg2[%c448, %c0_31] : memref<576x64xbf16, #tpu.memory_space<vmem>>, vector<64x64xbf16>
    %cst_32 = arith.constant dense<0.000000e+00> : vector<22x64xf32>
    %39 = tpu.matmul %37, %38, %cst_32 {dimension_numbers = #tpu.dot_dimension_numbers<[1], [0], [0], [1], [0, 0, 1, 1], [], []>} : vector<22x64xbf16>, vector<64x64xbf16>, vector<22x64xf32> -> vector<22x64xf32>
    %40 = arith.addf %35, %39 : vector<22x64xf32>
    %c0_33 = arith.constant 0 : index
    %c14 = arith.constant 14 : index
    %c0_34 = arith.constant 0 : index
    %41 = vector.load %arg1[%c0_33, %c14, %c0_34] : memref<1x36x64xbf16, #tpu.memory_space<vmem>>, vector<1x22x64xbf16>
    %42 = vector.shape_cast %41 : vector<1x22x64xbf16> to vector<22x64xbf16>
    %c512 = arith.constant 512 : index
    %c0_35 = arith.constant 0 : index
    %43 = vector.load %arg2[%c512, %c0_35] : memref<576x64xbf16, #tpu.memory_space<vmem>>, vector<64x64xbf16>
    %cst_36 = arith.constant dense<0.000000e+00> : vector<22x64xf32>
    %44 = tpu.matmul %42, %43, %cst_36 {dimension_numbers = #tpu.dot_dimension_numbers<[1], [0], [0], [1], [0, 0, 1, 1], [], []>} : vector<22x64xbf16>, vector<64x64xbf16>, vector<22x64xf32> -> vector<22x64xf32>
    %45 = arith.addf %40, %44 : vector<22x64xf32>
    %c7_37 = arith.constant 7 : index
    %c0_38 = arith.constant 0 : index
    %46 = vector.load %arg3[%c7_37, %c0_38] : memref<36x1xf32, #tpu.memory_space<vmem>>, vector<22x1xf32>
    %47 = vector.broadcast %46 : vector<22x1xf32> to vector<22x64xf32>
    %48 = arith.mulf %45, %47 : vector<22x64xf32>
    %cst_39 = arith.constant dense<0.000000e+00> : vector<64xf32>
    %49 = vector.multi_reduction <add>, %48, %cst_39 [0] : vector<22x64xf32> to vector<64xf32>
    %50 = vector.shape_cast %49 : vector<64xf32> to vector<1x64xf32>
    %51 = arith.mulf %48, %48 : vector<22x64xf32>
    %cst_40 = arith.constant dense<0.000000e+00> : vector<64xf32>
    %52 = vector.multi_reduction <add>, %51, %cst_40 [0] : vector<22x64xf32> to vector<64xf32>
    %53 = vector.shape_cast %52 : vector<64xf32> to vector<1x64xf32>
    %54 = tpu.concatenate %50, %53 in 1 : vector<1x64xf32>, vector<1x64xf32> -> vector<1x128xf32>
    %c0_41 = arith.constant 0 : index
    %c0_42 = arith.constant 0 : index
    %c0_43 = arith.constant 0 : index
    %55 = vector.load %arg5[%c0_41, %c0_42, %c0_43] : memref<1x8x128xf32, #tpu.memory_space<vmem>>, vector<1x1x128xf32>
    %56 = vector.shape_cast %55 : vector<1x1x128xf32> to vector<1x128xf32>
    %57 = vector.shape_cast %54 : vector<1x128xf32> to vector<1x1x128xf32>
    tpu.vector_store %arg5[%c0_41, %c0_42, %c0_43], %57 {strides = array<i32>} : memref<1x8x128xf32, #tpu.memory_space<vmem>>, vector<1x1x128xf32>,
    %cst_44 = arith.constant 0.000000e+00 : bf16
    %58 = vector.broadcast %cst_44 : bf16 to vector<7x64xbf16>
    %c0_45 = arith.constant 0 : index
    %c0_46 = arith.constant 0 : index
    %c0_47 = arith.constant 0 : index
    %59 = vector.load %arg4[%c0_45, %c0_46, %c0_47] : memref<1x36x64xbf16, #tpu.memory_space<vmem>>, vector<1x7x64xbf16>
    %60 = vector.shape_cast %59 : vector<1x7x64xbf16> to vector<7x64xbf16>
    %61 = vector.shape_cast %58 : vector<7x64xbf16> to vector<1x7x64xbf16>
    tpu.vector_store %arg4[%c0_45, %c0_46, %c0_47], %61 {strides = array<i32>} : memref<1x36x64xbf16, #tpu.memory_space<vmem>>, vector<1x7x64xbf16>,
    %62 = arith.truncf %45 : vector<22x64xf32> to vector<22x64xbf16>
    %c0_48 = arith.constant 0 : index
    %c7_49 = arith.constant 7 : index
    %c0_50 = arith.constant 0 : index
    %63 = vector.load %arg4[%c0_48, %c7_49, %c0_50] : memref<1x36x64xbf16, #tpu.memory_space<vmem>>, vector<1x22x64xbf16>
    %64 = vector.shape_cast %63 : vector<1x22x64xbf16> to vector<22x64xbf16>
    %65 = vector.shape_cast %62 : vector<22x64xbf16> to vector<1x22x64xbf16>
    tpu.vector_store %arg4[%c0_48, %c7_49, %c0_50], %65 {strides = array<i32>} : memref<1x36x64xbf16, #tpu.memory_space<vmem>>, vector<1x22x64xbf16>,
    %c0_51 = arith.constant 0 : index
    %c29 = arith.constant 29 : index
    %c0_52 = arith.constant 0 : index
    %66 = vector.load %arg4[%c0_51, %c29, %c0_52] : memref<1x36x64xbf16, #tpu.memory_space<vmem>>, vector<1x7x64xbf16>
    %67 = vector.shape_cast %66 : vector<1x7x64xbf16> to vector<7x64xbf16>
    %68 = vector.shape_cast %58 : vector<7x64xbf16> to vector<1x7x64xbf16>
    tpu.vector_store %arg4[%c0_51, %c29, %c0_52], %68 {strides = array<i32>} : memref<1x36x64xbf16, #tpu.memory_space<vmem>>, vector<1x7x64xbf16>,
    return
  }
  func.func @transform_0(%arg0: i32) -> (i32, i32, i32) {
    %c0_i32 = arith.constant 0 : i32
    %c0_i32_0 = arith.constant 0 : i32
    %c0_i32_1 = arith.constant 0 : i32
    return %arg0, %c0_i32, %c0_i32_0 : i32, i32, i32
  }
  func.func @transform_1(%arg0: i32) -> (i32, i32) {
    %c0_i32 = arith.constant 0 : i32
    %c0_i32_0 = arith.constant 0 : i32
    %c0_i32_1 = arith.constant 0 : i32
    return %c0_i32, %c0_i32_0 : i32, i32
  }
  func.func @transform_2(%arg0: i32) -> (i32, i32) {
    %c0_i32 = arith.constant 0 : i32
    %c0_i32_0 = arith.constant 0 : i32
    %c0_i32_1 = arith.constant 0 : i32
    return %c0_i32, %c0_i32_0 : i32, i32
  }
  func.func @transform_3(%arg0: i32) -> (i32, i32, i32) {
    %c0_i32 = arith.constant 0 : i32
    %c0_i32_0 = arith.constant 0 : i32
    %c0_i32_1 = arith.constant 0 : i32
    return %arg0, %c0_i32, %c0_i32_0 : i32, i32, i32
  }
  func.func @transform_4(%arg0: i32) -> (i32, i32, i32) {
    %c0_i32 = arith.constant 0 : i32
    %c0_i32_0 = arith.constant 0 : i32
    %c0_i32_1 = arith.constant 0 : i32
    return %arg0, %c0_i32, %c0_i32_0 : i32, i32, i32
  }
}

module attributes {stable_mosaic.version = 11 : i64} {
  func.func @kernel(%arg0: i32, %arg1: memref<1x16x64xbf16, #tpu.memory_space<vmem>>, %arg2: memref<1x16x64xbf16, #tpu.memory_space<vmem>>, %arg3: memref<1x16x64xbf16, #tpu.memory_space<vmem>>, %arg4: memref<1x16x64xbf16, #tpu.memory_space<vmem>>, %arg5: memref<576x128xbf16, #tpu.memory_space<vmem>>, %arg6: memref<1x128xf32, #tpu.memory_space<vmem>>, %arg7: memref<1x16x128xf32, #tpu.memory_space<vmem>>) attributes {dimension_semantics = [#tpu.dimension_semantics<parallel>], iteration_bounds = array<i64: 2>, scalar_prefetch = 0 : i64, scratch_operands = 0 : i64, tpu.core_type = #tpu.core_type<tc>, window_params = [{transform_indices = @transform_0, window_bounds = array<i64: 1, 16, 64>}, {transform_indices = @transform_1, window_bounds = array<i64: 1, 16, 64>}, {transform_indices = @transform_2, window_bounds = array<i64: 1, 16, 64>}, {transform_indices = @transform_3, window_bounds = array<i64: 1, 16, 64>}, {pipeline_mode = #tpu.pipeline_mode<synchronous>, transform_indices = @transform_4, window_bounds = array<i64: 576, 128>}, {pipeline_mode = #tpu.pipeline_mode<synchronous>, transform_indices = @transform_5, window_bounds = array<i64: 1, 128>}, {transform_indices = @transform_6, window_bounds = array<i64: 1, 16, 128>}]} {
    %cst = arith.constant 0.000000e+00 : f32
    %0 = vector.broadcast %cst : f32 to vector<6x128xf32>
    %c0 = arith.constant 0 : index
    %c5 = arith.constant 5 : index
    %c0_0 = arith.constant 0 : index
    %1 = vector.load %arg1[%c0, %c5, %c0_0] : memref<1x16x64xbf16, #tpu.memory_space<vmem>>, vector<1x6x64xbf16>
    %2 = vector.shape_cast %1 : vector<1x6x64xbf16> to vector<6x64xbf16>
    %c0_1 = arith.constant 0 : index
    %c0_2 = arith.constant 0 : index
    %3 = vector.load %arg5[%c0_1, %c0_2] : memref<576x128xbf16, #tpu.memory_space<vmem>>, vector<64x128xbf16>
    %cst_3 = arith.constant dense<0.000000e+00> : vector<6x128xf32>
    %4 = tpu.matmul %2, %3, %cst_3 {dimension_numbers = #tpu.dot_dimension_numbers<[1], [0], [0], [1], [0, 0, 1, 1], [], []>} : vector<6x64xbf16>, vector<64x128xbf16>, vector<6x128xf32> -> vector<6x128xf32>
    %5 = arith.addf %0, %4 : vector<6x128xf32>
    %c0_4 = arith.constant 0 : index
    %c5_5 = arith.constant 5 : index
    %c0_6 = arith.constant 0 : index
    %6 = vector.load %arg2[%c0_4, %c5_5, %c0_6] : memref<1x16x64xbf16, #tpu.memory_space<vmem>>, vector<1x6x64xbf16>
    %7 = vector.shape_cast %6 : vector<1x6x64xbf16> to vector<6x64xbf16>
    %c64 = arith.constant 64 : index
    %c0_7 = arith.constant 0 : index
    %8 = vector.load %arg5[%c64, %c0_7] : memref<576x128xbf16, #tpu.memory_space<vmem>>, vector<64x128xbf16>
    %cst_8 = arith.constant dense<0.000000e+00> : vector<6x128xf32>
    %9 = tpu.matmul %7, %8, %cst_8 {dimension_numbers = #tpu.dot_dimension_numbers<[1], [0], [0], [1], [0, 0, 1, 1], [], []>} : vector<6x64xbf16>, vector<64x128xbf16>, vector<6x128xf32> -> vector<6x128xf32>
    %10 = arith.addf %5, %9 : vector<6x128xf32>
    %c0_9 = arith.constant 0 : index
    %c6 = arith.constant 6 : index
    %c0_10 = arith.constant 0 : index
    %11 = vector.load %arg1[%c0_9, %c6, %c0_10] : memref<1x16x64xbf16, #tpu.memory_space<vmem>>, vector<1x6x64xbf16>
    %12 = vector.shape_cast %11 : vector<1x6x64xbf16> to vector<6x64xbf16>
    %c128 = arith.constant 128 : index
    %c0_11 = arith.constant 0 : index
    %13 = vector.load %arg5[%c128, %c0_11] : memref<576x128xbf16, #tpu.memory_space<vmem>>, vector<64x128xbf16>
    %cst_12 = arith.constant dense<0.000000e+00> : vector<6x128xf32>
    %14 = tpu.matmul %12, %13, %cst_12 {dimension_numbers = #tpu.dot_dimension_numbers<[1], [0], [0], [1], [0, 0, 1, 1], [], []>} : vector<6x64xbf16>, vector<64x128xbf16>, vector<6x128xf32> -> vector<6x128xf32>
    %15 = arith.addf %10, %14 : vector<6x128xf32>
    %c0_13 = arith.constant 0 : index
    %c5_14 = arith.constant 5 : index
    %c0_15 = arith.constant 0 : index
    %16 = vector.load %arg3[%c0_13, %c5_14, %c0_15] : memref<1x16x64xbf16, #tpu.memory_space<vmem>>, vector<1x6x64xbf16>
    %17 = vector.shape_cast %16 : vector<1x6x64xbf16> to vector<6x64xbf16>
    %c192 = arith.constant 192 : index
    %c0_16 = arith.constant 0 : index
    %18 = vector.load %arg5[%c192, %c0_16] : memref<576x128xbf16, #tpu.memory_space<vmem>>, vector<64x128xbf16>
    %cst_17 = arith.constant dense<0.000000e+00> : vector<6x128xf32>
    %19 = tpu.matmul %17, %18, %cst_17 {dimension_numbers = #tpu.dot_dimension_numbers<[1], [0], [0], [1], [0, 0, 1, 1], [], []>} : vector<6x64xbf16>, vector<64x128xbf16>, vector<6x128xf32> -> vector<6x128xf32>
    %20 = arith.addf %15, %19 : vector<6x128xf32>
    %c0_18 = arith.constant 0 : index
    %c5_19 = arith.constant 5 : index
    %c0_20 = arith.constant 0 : index
    %21 = vector.load %arg4[%c0_18, %c5_19, %c0_20] : memref<1x16x64xbf16, #tpu.memory_space<vmem>>, vector<1x6x64xbf16>
    %22 = vector.shape_cast %21 : vector<1x6x64xbf16> to vector<6x64xbf16>
    %c256 = arith.constant 256 : index
    %c0_21 = arith.constant 0 : index
    %23 = vector.load %arg5[%c256, %c0_21] : memref<576x128xbf16, #tpu.memory_space<vmem>>, vector<64x128xbf16>
    %cst_22 = arith.constant dense<0.000000e+00> : vector<6x128xf32>
    %24 = tpu.matmul %22, %23, %cst_22 {dimension_numbers = #tpu.dot_dimension_numbers<[1], [0], [0], [1], [0, 0, 1, 1], [], []>} : vector<6x64xbf16>, vector<64x128xbf16>, vector<6x128xf32> -> vector<6x128xf32>
    %25 = arith.addf %20, %24 : vector<6x128xf32>
    %c0_23 = arith.constant 0 : index
    %c6_24 = arith.constant 6 : index
    %c0_25 = arith.constant 0 : index
    %26 = vector.load %arg3[%c0_23, %c6_24, %c0_25] : memref<1x16x64xbf16, #tpu.memory_space<vmem>>, vector<1x6x64xbf16>
    %27 = vector.shape_cast %26 : vector<1x6x64xbf16> to vector<6x64xbf16>
    %c320 = arith.constant 320 : index
    %c0_26 = arith.constant 0 : index
    %28 = vector.load %arg5[%c320, %c0_26] : memref<576x128xbf16, #tpu.memory_space<vmem>>, vector<64x128xbf16>
    %cst_27 = arith.constant dense<0.000000e+00> : vector<6x128xf32>
    %29 = tpu.matmul %27, %28, %cst_27 {dimension_numbers = #tpu.dot_dimension_numbers<[1], [0], [0], [1], [0, 0, 1, 1], [], []>} : vector<6x64xbf16>, vector<64x128xbf16>, vector<6x128xf32> -> vector<6x128xf32>
    %30 = arith.addf %25, %29 : vector<6x128xf32>
    %c0_28 = arith.constant 0 : index
    %c9 = arith.constant 9 : index
    %c0_29 = arith.constant 0 : index
    %31 = vector.load %arg1[%c0_28, %c9, %c0_29] : memref<1x16x64xbf16, #tpu.memory_space<vmem>>, vector<1x6x64xbf16>
    %32 = vector.shape_cast %31 : vector<1x6x64xbf16> to vector<6x64xbf16>
    %c384 = arith.constant 384 : index
    %c0_30 = arith.constant 0 : index
    %33 = vector.load %arg5[%c384, %c0_30] : memref<576x128xbf16, #tpu.memory_space<vmem>>, vector<64x128xbf16>
    %cst_31 = arith.constant dense<0.000000e+00> : vector<6x128xf32>
    %34 = tpu.matmul %32, %33, %cst_31 {dimension_numbers = #tpu.dot_dimension_numbers<[1], [0], [0], [1], [0, 0, 1, 1], [], []>} : vector<6x64xbf16>, vector<64x128xbf16>, vector<6x128xf32> -> vector<6x128xf32>
    %35 = arith.addf %30, %34 : vector<6x128xf32>
    %c0_32 = arith.constant 0 : index
    %c9_33 = arith.constant 9 : index
    %c0_34 = arith.constant 0 : index
    %36 = vector.load %arg2[%c0_32, %c9_33, %c0_34] : memref<1x16x64xbf16, #tpu.memory_space<vmem>>, vector<1x6x64xbf16>
    %37 = vector.shape_cast %36 : vector<1x6x64xbf16> to vector<6x64xbf16>
    %c448 = arith.constant 448 : index
    %c0_35 = arith.constant 0 : index
    %38 = vector.load %arg5[%c448, %c0_35] : memref<576x128xbf16, #tpu.memory_space<vmem>>, vector<64x128xbf16>
    %cst_36 = arith.constant dense<0.000000e+00> : vector<6x128xf32>
    %39 = tpu.matmul %37, %38, %cst_36 {dimension_numbers = #tpu.dot_dimension_numbers<[1], [0], [0], [1], [0, 0, 1, 1], [], []>} : vector<6x64xbf16>, vector<64x128xbf16>, vector<6x128xf32> -> vector<6x128xf32>
    %40 = arith.addf %35, %39 : vector<6x128xf32>
    %c0_37 = arith.constant 0 : index
    %c10 = arith.constant 10 : index
    %c0_38 = arith.constant 0 : index
    %41 = vector.load %arg1[%c0_37, %c10, %c0_38] : memref<1x16x64xbf16, #tpu.memory_space<vmem>>, vector<1x6x64xbf16>
    %42 = vector.shape_cast %41 : vector<1x6x64xbf16> to vector<6x64xbf16>
    %c512 = arith.constant 512 : index
    %c0_39 = arith.constant 0 : index
    %43 = vector.load %arg5[%c512, %c0_39] : memref<576x128xbf16, #tpu.memory_space<vmem>>, vector<64x128xbf16>
    %cst_40 = arith.constant dense<0.000000e+00> : vector<6x128xf32>
    %44 = tpu.matmul %42, %43, %cst_40 {dimension_numbers = #tpu.dot_dimension_numbers<[1], [0], [0], [1], [0, 0, 1, 1], [], []>} : vector<6x64xbf16>, vector<64x128xbf16>, vector<6x128xf32> -> vector<6x128xf32>
    %45 = arith.addf %40, %44 : vector<6x128xf32>
    %c0_41 = arith.constant 0 : index
    %c0_42 = arith.constant 0 : index
    %46 = vector.load %arg6[%c0_41, %c0_42] : memref<1x128xf32, #tpu.memory_space<vmem>>, vector<1x128xf32>
    %47 = vector.broadcast %46 : vector<1x128xf32> to vector<6x128xf32>
    %48 = arith.addf %45, %47 : vector<6x128xf32>
    %cst_43 = arith.constant 0.000000e+00 : f32
    %49 = vector.broadcast %cst_43 : f32 to vector<5x128xf32>
    %c0_44 = arith.constant 0 : index
    %c0_45 = arith.constant 0 : index
    %c0_46 = arith.constant 0 : index
    %50 = vector.load %arg7[%c0_44, %c0_45, %c0_46] : memref<1x16x128xf32, #tpu.memory_space<vmem>>, vector<1x5x128xf32>
    %51 = vector.shape_cast %50 : vector<1x5x128xf32> to vector<5x128xf32>
    %52 = vector.shape_cast %49 : vector<5x128xf32> to vector<1x5x128xf32>
    tpu.vector_store %arg7[%c0_44, %c0_45, %c0_46], %52 {strides = array<i32>} : memref<1x16x128xf32, #tpu.memory_space<vmem>>, vector<1x5x128xf32>,
    %c0_47 = arith.constant 0 : index
    %c5_48 = arith.constant 5 : index
    %c0_49 = arith.constant 0 : index
    %53 = vector.load %arg7[%c0_47, %c5_48, %c0_49] : memref<1x16x128xf32, #tpu.memory_space<vmem>>, vector<1x6x128xf32>
    %54 = vector.shape_cast %53 : vector<1x6x128xf32> to vector<6x128xf32>
    %55 = vector.shape_cast %48 : vector<6x128xf32> to vector<1x6x128xf32>
    tpu.vector_store %arg7[%c0_47, %c5_48, %c0_49], %55 {strides = array<i32>} : memref<1x16x128xf32, #tpu.memory_space<vmem>>, vector<1x6x128xf32>,
    %c0_50 = arith.constant 0 : index
    %c11 = arith.constant 11 : index
    %c0_51 = arith.constant 0 : index
    %56 = vector.load %arg7[%c0_50, %c11, %c0_51] : memref<1x16x128xf32, #tpu.memory_space<vmem>>, vector<1x5x128xf32>
    %57 = vector.shape_cast %56 : vector<1x5x128xf32> to vector<5x128xf32>
    %58 = vector.shape_cast %49 : vector<5x128xf32> to vector<1x5x128xf32>
    tpu.vector_store %arg7[%c0_50, %c11, %c0_51], %58 {strides = array<i32>} : memref<1x16x128xf32, #tpu.memory_space<vmem>>, vector<1x5x128xf32>,
    return
  }
  func.func @transform_0(%arg0: i32) -> (i32, i32, i32) {
    %c0_i32 = arith.constant 0 : i32
    %c0_i32_0 = arith.constant 0 : i32
    %c0_i32_1 = arith.constant 0 : i32
    return %arg0, %c0_i32, %c0_i32_0 : i32, i32, i32
  }
  func.func @transform_1(%arg0: i32) -> (i32, i32, i32) {
    %c0_i32 = arith.constant 0 : i32
    %c0_i32_0 = arith.constant 0 : i32
    %c0_i32_1 = arith.constant 0 : i32
    return %arg0, %c0_i32, %c0_i32_0 : i32, i32, i32
  }
  func.func @transform_2(%arg0: i32) -> (i32, i32, i32) {
    %c0_i32 = arith.constant 0 : i32
    %c0_i32_0 = arith.constant 0 : i32
    %c0_i32_1 = arith.constant 0 : i32
    return %arg0, %c0_i32, %c0_i32_0 : i32, i32, i32
  }
  func.func @transform_3(%arg0: i32) -> (i32, i32, i32) {
    %c0_i32 = arith.constant 0 : i32
    %c0_i32_0 = arith.constant 0 : i32
    %c0_i32_1 = arith.constant 0 : i32
    return %arg0, %c0_i32, %c0_i32_0 : i32, i32, i32
  }
  func.func @transform_4(%arg0: i32) -> (i32, i32) {
    %c0_i32 = arith.constant 0 : i32
    %c0_i32_0 = arith.constant 0 : i32
    %c0_i32_1 = arith.constant 0 : i32
    return %c0_i32, %c0_i32_0 : i32, i32
  }
  func.func @transform_5(%arg0: i32) -> (i32, i32) {
    %c0_i32 = arith.constant 0 : i32
    %c0_i32_0 = arith.constant 0 : i32
    %c0_i32_1 = arith.constant 0 : i32
    return %c0_i32, %c0_i32_0 : i32, i32
  }
  func.func @transform_6(%arg0: i32) -> (i32, i32, i32) {
    %c0_i32 = arith.constant 0 : i32
    %c0_i32_0 = arith.constant 0 : i32
    %c0_i32_1 = arith.constant 0 : i32
    return %arg0, %c0_i32, %c0_i32_0 : i32, i32, i32
  }
}

</mosaic_0001>

<bundles_post_ra>
// kernel: fc_discriminator.10
= control target key start
LH: loop header
LB: loop body
LE: loop exit
PB: predicated region body
PF: predicated region fallthrough
CT: control target
= control target key end

     0   :  { %s642_s15 = smov 0   ;;  %s786_s0 = inlined_call_operand.vmem [shape: bf16[2,100,64], index: 0, kind: input, shape index: {}]   ;;  %s787_s1 = inlined_call_operand.vmem [shape: f32[100,1], index: 1, kind: input, shape index: {}]   ;;  %s788_s2 = inlined_call_operand.vmem [shape: f32[1,64], index: 2, kind: input, shape index: {}]   ;;  %s789_s3 = inlined_call_operand.vmem [shape: f32[1,64], index: 3, kind: input, shape index: {}]   ;;  %s790_s4 = inlined_call_operand.vmem [shape: bf16[2,100,64], index: 4, kind: output, shape index: {}]  }
   0x1 LB: > { %s530_s16 = sadd.s32 4294967295, %s614_s15   ;;  %p534_p0 = scmp.ge.s32.totalorder %s614_s15, 1  ;;  %s614_s15 = sphi %s642_s15, %s14_s15  }
   0x2   : > { %p162_p1 = scmp.lt.s32.totalorder %s614_s15, 3 }
   0x4   : > { %p163_p2 = pnand %p534_p0, %p162_p1 }
   0x5   : > { %v305_v0 = vld [vmem:[%s787_s1 + $0x10] sm:$0xff] (!%p163_p2)  ;;  %v303_v1 = vld [vmem:[%s787_s1] sm:$0xff] (!%p163_p2)  ;;  %v306_v2 = vld [vmem:[%s787_s1 + $0x18] sm:$0xff] (!%p163_p2)  ;;  %v616_v3 = vmov (!%p163_p2), 0   ;;  %p188_p3 = scmp.lt.s32.totalorder (!%p163_p2), %s530_s16, 1 }
   0x6   : > { %166 = sbr.rel (%p163_p2) target bundleno = 165 (0xa5), region = 36  ;;  %607 = vset.pattern.permute.xlu1 (!%p163_p2), %v616_v3  ;;  %606 = vset.pattern.permute.xlu0 (!%p163_p2), %v616_v3  ;;  %vm318_vm0 = vcmp.gt.f32.partialorder (!%p163_p2), %v305_v0, 0.0  ;;  %vm316_vm1 = vcmp.gt.f32.partialorder (!%p163_p2), %v303_v1, 0.0  ;;  %vm319_vm2 = vcmp.gt.f32.partialorder (!%p163_p2), %v306_v2, 0.0  ;;  %v304_v4 = vld [vmem:[%s787_s1 + $0x8] sm:$0xff] (!%p163_p2)  ;;  %v307_v8 = vld [vmem:[%s787_s1 + $0x20] sm:$0xff] (!%p163_p2) }
   0x7   : > { %v331_v5 = vsel (!%p163_p2), %vm318_vm0, 1, %v616_v3  ;;  %v329_v6 = vsel (!%p163_p2), %vm316_vm1, 1, %v616_v3  ;;  %vm317_vm3 = vcmp.gt.f32.partialorder (!%p163_p2), %v304_v4, 0.0  ;;  %v308_v7 = vld [vmem:[%s787_s1 + $0x28] sm:$0xff] (!%p163_p2)  ;;  %v332_v9 = vsel (!%p163_p2), %vm319_vm2, 1, %v616_v3  ;;  %v310_v11 = vld [vmem:[%s787_s1 + $0x38] sm:$0xff] (!%p163_p2) }
   0x8   : > { %349 = vperm.xlu1 (!%p163_p2), %607, %v331_v5   ;;  %343 = vperm.xlu0 (!%p163_p2), %606, %v329_v6   ;;  %v330_v10 = vsel (!%p163_p2), %vm317_vm3, 1, %v616_v3  ;;  %vm321_vm4 = vcmp.gt.f32.partialorder (!%p163_p2), %v308_v7, 0.0  ;;  %vm320_vm5 = vcmp.gt.f32.partialorder (!%p163_p2), %v307_v8, 0.0  ;;  %v309_v12 = vld [vmem:[%s787_s1 + $0x30] sm:$0xff] (!%p163_p2)  ;;  %vm323_vm6 = vcmp.gt.f32.partialorder (!%p163_p2), %v310_v11, 0.0  ;;  %v312_v15 = vld [vmem:[%s787_s1 + $0x48] sm:$0xff] (!%p163_p2) }
   0x9   : > { %v334_v13 = vsel (!%p163_p2), %vm321_vm4, 1, %v616_v3  ;;  %v333_v14 = vsel (!%p163_p2), %vm320_vm5, 1, %v616_v3  ;;  %vm322_vm7 = vcmp.gt.f32.partialorder (!%p163_p2), %v309_v12, 0.0  ;;  %v311_v16 = vld [vmem:[%s787_s1 + $0x40] sm:$0xff] (!%p163_p2)  ;;  %v336_v17 = vsel (!%p163_p2), %vm323_vm6, 1, %v616_v3  ;;  %v314_v19 = vld [vmem:[%s787_s1 + $0x58] sm:$0xff] (!%p163_p2) }
   0xa   : > { %v335_v18 = vsel (!%p163_p2), %vm322_vm7, 1, %v616_v3  ;;  %vm325_vm8 = vcmp.gt.f32.partialorder (!%p163_p2), %v312_v15, 0.0  ;;  %vm324_vm9 = vcmp.gt.f32.partialorder (!%p163_p2), %v311_v16, 0.0  ;;  %v313_v20 = vld [vmem:[%s787_s1 + $0x50] sm:$0xff] (!%p163_p2)  ;;  %vm327_vm10 = vcmp.gt.f32.partialorder (!%p163_p2), %v314_v19, 0.0 }
   0xb   : > { %v338_v21 = vsel (!%p163_p2), %vm325_vm8, 1, %v616_v3  ;;  %v337_v22 = vsel (!%p163_p2), %vm324_vm9, 1, %v616_v3  ;;  %vm326_vm11 = vcmp.gt.f32.partialorder (!%p163_p2), %v313_v20, 0.0  ;;  %v315_v23 = vld [vmem:[%s787_s1 + $0x60] sm:$0xf] (!%p163_p2)  ;;  %v340_v24 = vsel (!%p163_p2), %vm327_vm10, 1, %v616_v3 }
   0xc   : > { %352 = vperm.xlu1 (!%p163_p2), %607, %v332_v9   ;;  %346 = vperm.xlu0 (!%p163_p2), %606, %v330_v10   ;;  %v339_v25 = vsel (!%p163_p2), %vm326_vm11, 1, %v616_v3  ;;  %vm328_vm12 = vcmp.gt.f32.partialorder (!%p163_p2), %v315_v23, 0.0  ;;  %v708_v31 = vld [vmem:[%s788_s2] ss:$0 sm:$0xff] (!%p163_p2)  ;;  %vm460_vm1 = vcmask (!%p163_p2), 519168  }
   0xd   : > { %v341_v26 = vsel %vm328_vm12, 1, %v616_v3  ;;  %s792_s16 = smov (!%p188_p3, %s530_s16), 1  ;;  %v717_v40 = vld [vmem:[%s789_s3] ss:$0 sm:$0xff] }
   0xe   : > { %s596_s19 = smul.u32 52, %s792_s16 }
  0x10   : > { %358 = vperm.xlu1 %607, %v334_v13   ;;  %355 = vperm.xlu0 %606, %v333_v14   ;;  %s701_s22 = scalar_lea.vmem %s786_s0, %s596_s19  ;;  %s741_s29 = scalar_lea.vmem %s790_s4, %s596_s19 }
  0x11   : > { %v591_v27 = vld [vmem:[%s701_s22 + $0x8] sm:$0xff]   ;;  %v568_v28 = vld [vmem:[%s701_s22] sm:$0xff]   ;;  %v592_v34 = vld [vmem:[%s701_s22 + $0x10] sm:$0xff]  }
  0x12   : > { %v573_v29 = vunpack.c.l.bf16 %v591_v27  ;;  %v569_v30 = vunpack.c.l.bf16 %v568_v28  ;;  %v574_v32 = vunpack.c.h.bf16 %v591_v27  ;;  %v570_v33 = vunpack.c.h.bf16 %v568_v28  ;;  %v593_v39 = vld [vmem:[%s701_s22 + $0x18] sm:$0xff]   ;;  %v594_v53 = vld [vmem:[%s701_s22 + $0x20] sm:$0xff]   ;;  %v595_v63 = vld [vmem:[%s701_s22 + $0x28] sm:$0xff]  }
  0x13   : > { %v578_v37 = vunpack.c.h.bf16 %v592_v34  ;;  %v577_v38 = vunpack.c.l.bf16 %v592_v34  ;;  %v582_v44 = vunpack.c.h.bf16 %v593_v39  ;;  %v581_v50 = vunpack.c.l.bf16 %v593_v39 }
  0x14   : > { %364 = vperm.xlu1 %607, %v336_v17   ;;  %361 = vperm.xlu0 %606, %v335_v18   ;;  %v233_v35 = vmul.f32 %v573_v29, %v708_v31  ;;  %v231_v36 = vmul.f32 %v569_v30, %v708_v31  ;;  %v234_v41 = vmul.f32 %v574_v32, %v708_v31  ;;  %v586_v60 = vunpack.c.h.bf16 %v594_v53  ;;  %v210_v18 = vld [vmem:[%s701_s22 + $0x30] sm:$0x3] }
  0x15   : > { %v232_v42 = vmul.f32 %v570_v33, %v708_v31  ;;  %v236_v46 = vmul.f32 %v578_v37, %v708_v31  ;;  %v235_v47 = vmul.f32 %v577_v38, %v708_v31  ;;  %v238_v52 = vmul.f32 %v582_v44, %v708_v31 }
  0x16   : > { %v253_v43 = vadd.f32 %v717_v40, %v233_v35  ;;  %v251_v45 = vadd.f32 %v717_v40, %v231_v36  ;;  %v254_v48 = vadd.f32 %v717_v40, %v234_v41  ;;  %v237_v59 = vmul.f32 %v581_v50, %v708_v31 }
  0x17   : > { %v252_v49 = vadd.f32 %v717_v40, %v232_v42  ;;  %v256_v55 = vadd.f32 %v717_v40, %v236_v46  ;;  %v255_v56 = vadd.f32 %v717_v40, %v235_v47  ;;  %v258_v62 = vadd.f32 %v717_v40, %v238_v52 }
  0x18   : > { %370 = vperm.xlu1 %607, %v338_v21   ;;  %367 = vperm.xlu0 %606, %v337_v22   ;;  %v279_v51 = vmul.f32 0.2, %v253_v43  ;;  %vm266_vm13 = vcmp.gt.f32.partialorder %v253_v43, 0.0  ;;  %v277_v54 = vmul.f32 0.2, %v251_v45  ;;  %vm264_vm14 = vcmp.gt.f32.partialorder %v251_v45, 0.0 }
  0x19   : > { %v280_v57 = vmul.f32 0.2, %v254_v48  ;;  %v278_v58 = vmul.f32 0.2, %v252_v49  ;;  %vm267_vm15 = vcmp.gt.f32.partialorder %v254_v48, 0.0  ;;  %vm265_vm0 = vcmp.gt.f32.partialorder %v252_v49, 0.0 }
  0x1a   : > { %v292_v61 = vsel %vm266_vm13, %v253_v43, %v279_v51  ;;  %v290_v0 = vsel %vm264_vm14, %v251_v45, %v277_v54  ;;  %vm269_vm2 = vcmp.gt.f32.partialorder %v256_v55, 0.0  ;;  %v282_v1 = vmul.f32 0.2, %v256_v55 }
  0x1b   : > { %v585_v2 = vunpack.c.l.bf16 %v594_v53  ;;  %v293_v5 = vsel %vm267_vm15, %v254_v48, %v280_v57  ;;  %v291_v6 = vsel %vm265_vm0, %v252_v49, %v278_v58  ;;  %vm268_vm3 = vcmp.gt.f32.partialorder %v255_v56, 0.0 }
  0x1c   : > { %376 = vperm.xlu1 %607, %v340_v24   ;;  %373 = vperm.xlu0 %606, %v339_v25   ;;  %v257_v7 = vadd.f32 %v717_v40, %v237_v59  ;;  %v240_v8 = vmul.f32 %v586_v60, %v708_v31  ;;  %v590_v9 = vunpack.c.h.bf16 %v595_v63  ;;  %v281_v12 = vmul.f32 0.2, %v255_v56 }
  0x1d   : > { %v589_v13 = vunpack.c.l.bf16 %v595_v63  ;;  %v295_v16 = vsel %vm269_vm2, %v256_v55, %v282_v1  ;;  %v239_v17 = vmul.f32 %v585_v2, %v708_v31  ;;  %vm271_vm6 = vcmp.gt.f32.partialorder %v258_v62, 0.0 }
  0x1e   : > { %v284_v21 = vmul.f32 0.2, %v258_v62  ;;  %vm270_vm7 = vcmp.gt.f32.partialorder %v257_v7, 0.0  ;;  %v283_v22 = vmul.f32 0.2, %v257_v7  ;;  %v260_v23 = vadd.f32 %v717_v40, %v240_v8 }
  0x1f   : > { %v242_v24 = vmul.f32 %v590_v9, %v708_v31  ;;  %v294_v27 = vsel %vm268_vm3, %v255_v56, %v281_v12  ;;  %v241_v28 = vmul.f32 %v589_v13, %v708_v31  ;;  %v259_v32 = vadd.f32 %v717_v40, %v239_v17 }
  0x20   : > { %379 = vperm.xlu0 %606, %v341_v26   ;;  %v223_v33 = vunpack.c.l.bf16 %v210_v18  ;;  %v297_v36 = vsel %vm271_vm6, %v258_v62, %v284_v21  ;;  %v296_v37 = vsel %vm270_vm7, %v257_v7, %v283_v22  ;;  %v286_v38 = vmul.f32 0.2, %v260_v23 }
  0x21   : > { %v262_v39 = vadd.f32 %v717_v40, %v242_v24  ;;  %vm273_vm12 = vcmp.gt.f32.partialorder %v260_v23, 0.0  ;;  %v261_v43 = vadd.f32 %v717_v40, %v241_v28  ;;  %v285_v46 = vmul.f32 0.2, %v259_v32 }
  0x22   : > { %v243_v47 = vmul.f32 %v708_v31, %v223_v33  ;;  %vm272_vm13 = vcmp.gt.f32.partialorder %v259_v32, 0.0  ;;  %v299_v50 = vsel %vm273_vm12, %v260_v23, %v286_v38 }
  0x23   : > { %vm275_vm0 = vcmp.gt.f32.partialorder %v262_v39, 0.0  ;;  %v288_v53 = vmul.f32 0.2, %v262_v39  ;;  %v287_v54 = vmul.f32 0.2, %v261_v43  ;;  %v298_v31 = vsel %vm272_vm13, %v259_v32, %v285_v46 }
  0x24   : > { %v263_v57 = vadd.f32 %v717_v40, %v243_v47  ;;  %vm274_vm2 = vcmp.gt.f32.partialorder %v261_v43, 0.0 }
  0x25   : > { %v301_v62 = vsel %vm275_vm0, %v262_v39, %v288_v53  ;;  %v300_v1 = vsel %vm274_vm2, %v261_v43, %v287_v54 }
  0x26   : > { %v289_v40 = vmul.f32 0.2, %v263_v57 }
  0x87   : > { %v350_v3 = vpop.permute.xlu1 %349  ;;  %v344_v4 = vpop.permute.xlu0 %343 }
  0x88   : > { %vm383_vm4 = vcmp.eq.s32.totalorder %v350_v3, 1  ;;  %vm381_vm5 = vcmp.eq.s32.totalorder %v344_v4, 1 }
  0x89   : > { %v396_v10 = vsel %vm383_vm4, %v292_v61, 0.0  ;;  %v394_v11 = vsel %vm381_vm5, %v290_v0, 0.0  ;;  %vm276_vm5 = vcmp.gt.f32.partialorder %v263_v57, 0.0 }
  0x8a   : > { %v556_v14 = vpack.c.bf16 %v396_v10, %v396_v10  ;;  %v554_v15 = vpack.c.bf16 %v394_v11, %v394_v11  ;;  %v302_v8 = vsel %vm276_vm5, %v263_v57, %v289_v40 }
  0x8b   : > { %v353_v19 = vpop.permute.xlu1 %352  ;;  %v347_v20 = vpop.permute.xlu0 %346 }
  0x8c   : > { %463 = vst.msk [vmem:[%s741_s29 + $0x8] sm:$0xf] %vm460_vm1, %v556_v14  ;;  %461 = vst.msk [vmem:[%s741_s29] sm:$0xf] %vm460_vm1, %v554_v15  ;;  %vm384_vm8 = vcmp.eq.s32.totalorder %v353_v19, 1  ;;  %vm382_vm9 = vcmp.eq.s32.totalorder %v347_v20, 1 }
  0x8d   : > { %v397_v25 = vsel %vm384_vm8, %v293_v5, 0.0  ;;  %v395_v26 = vsel %vm382_vm9, %v291_v6, 0.0  ;;  %vm473_vm9 = vcmask 517120  }
  0x8e   : > { %v557_v29 = vpack.c.bf16 %v397_v25, %v397_v25  ;;  %v555_v30 = vpack.c.bf16 %v395_v26, %v395_v26 }
  0x8f   : > { %v359_v34 = vpop.permute.xlu1 %358  ;;  %v356_v35 = vpop.permute.xlu0 %355 }
  0x90   : > { %464 = vst.msk [vmem:[%s741_s29 + $0xc] sm:$0xf] %vm460_vm1, %v557_v29  ;;  %462 = vst.msk [vmem:[%s741_s29 + $0x4] sm:$0xf] %vm460_vm1, %v555_v30  ;;  %vm386_vm10 = vcmp.eq.s32.totalorder %v359_v34, 1  ;;  %vm385_vm11 = vcmp.eq.s32.totalorder %v356_v35, 1 }
  0x91   : > { %v399_v41 = vsel %vm386_vm10, %v295_v16, 0.0  ;;  %v398_v42 = vsel %vm385_vm11, %v294_v27, 0.0 }
  0x92   : > { %v559_v44 = vpack.c.bf16 %v399_v41, %v399_v41  ;;  %v558_v45 = vpack.c.bf16 %v398_v42, %v398_v42 }
  0x93   : > { %v365_v48 = vpop.permute.xlu1 %364  ;;  %v362_v49 = vpop.permute.xlu0 %361 }
  0x94   : > { %466 = vst.msk [vmem:[%s741_s29 + $0x14] sm:$0xf] %vm460_vm1, %v559_v44  ;;  %465 = vst.msk [vmem:[%s741_s29 + $0x10] sm:$0xf] %vm460_vm1, %v558_v45  ;;  %vm388_vm14 = vcmp.eq.s32.totalorder %v365_v48, 1  ;;  %vm387_vm15 = vcmp.eq.s32.totalorder %v362_v49, 1 }
  0x95   : > { %v401_v51 = vsel %vm388_vm14, %v297_v36, 0.0  ;;  %v400_v52 = vsel %vm387_vm15, %v296_v37, 0.0 }
  0x96   : > { %v561_v55 = vpack.c.bf16 %v401_v51, %v401_v51  ;;  %v560_v56 = vpack.c.bf16 %v400_v52, %v400_v52 }
  0x97   : > { %v371_v58 = vpop.permute.xlu1 %370  ;;  %v368_v59 = vpop.permute.xlu0 %367 }
  0x98   : > { %468 = vst.msk [vmem:[%s741_s29 + $0x1c] sm:$0xf] %vm460_vm1, %v561_v55  ;;  %467 = vst.msk [vmem:[%s741_s29 + $0x18] sm:$0xf] %vm460_vm1, %v560_v56  ;;  %vm390_vm3 = vcmp.eq.s32.totalorder %v371_v58, 1  ;;  %vm389_vm4 = vcmp.eq.s32.totalorder %v368_v59, 1 }
  0x99   : > { %v403_v60 = vsel %vm390_vm3, %v299_v50, 0.0  ;;  %v402_v61 = vsel %vm389_vm4, %v298_v31, 0.0 }
  0x9a   : > { %v563_v63 = vpack.c.bf16 %v403_v60, %v403_v60  ;;  %v562_v0 = vpack.c.bf16 %v402_v61, %v402_v61 }
  0x9b   : > { %v377_v2 = vpop.permute.xlu1 %376  ;;  %v374_v3 = vpop.permute.xlu0 %373 }
  0x9c   : > { %470 = vst.msk [vmem:[%s741_s29 + $0x24] sm:$0xf] %vm460_vm1, %v563_v63  ;;  %469 = vst.msk [vmem:[%s741_s29 + $0x20] sm:$0xf] %vm460_vm1, %v562_v0  ;;  %vm392_vm6 = vcmp.eq.s32.totalorder %v377_v2, 1  ;;  %vm391_vm7 = vcmp.eq.s32.totalorder %v374_v3, 1 }
  0x9d   : > { %v405_v4 = vsel %vm392_vm6, %v301_v62, 0.0  ;;  %v404_v5 = vsel %vm391_vm7, %v300_v1, 0.0 }
  0x9e   : > { %v565_v6 = vpack.c.bf16 %v405_v4, %v405_v4  ;;  %v564_v7 = vpack.c.bf16 %v404_v5, %v404_v5 }
  0x9f   : > { %v380_v9 = vpop.permute.xlu0 %379 }
  0xa0   : > { %472 = vst.msk [vmem:[%s741_s29 + $0x2c] sm:$0xf] %vm460_vm1, %v565_v6  ;;  %471 = vst.msk [vmem:[%s741_s29 + $0x28] sm:$0xf] %vm460_vm1, %v564_v7  ;;  %vm393_vm8 = vcmp.eq.s32.totalorder %v380_v9, 1 }
  0xa1   : > { %v406_v10 = vsel %vm393_vm8, %v302_v8, 0.0 }
  0xa2   : > { %v566_v11 = vpack.c.bf16 %v406_v10, %v406_v10 }
  0xa4   : > { %474 = vst.msk [vmem:[%s741_s29 + $0x30] sm:$0x3] %vm473_vm9, %v566_v11 }
  0xa5 PF: > { %s14_s15 = sadd.s32 1, %s614_s15  }
  0xa6   : > { %p11_p4 = scmp.ge.s32.totalorder %s14_s15, 4  }
  0xa8   :  { %13 = sbr.rel (!%p11_p4) target bundleno = 1 (0x1), region = 66 }

// kernel: fc_discriminator.9
= control target key start
LH: loop header
LB: loop body
LE: loop exit
PB: predicated region body
PF: predicated region fallthrough
CT: control target
= control target key end

     0   :  { %s2926_s24 = smov 0   ;;  %s3538_s0 = inlined_call_operand.vmem [shape: bf16[2,100,4], index: 0, kind: input, shape index: {}]   ;;  %s3539_s1 = inlined_call_operand.vmem [shape: bf16[2,100,4], index: 1, kind: input, shape index: {}]   ;;  %s3540_s2 = inlined_call_operand.vmem [shape: bf16[2,100,4], index: 2, kind: input, shape index: {}]   ;;  %s3541_s3 = inlined_call_operand.vmem [shape: bf16[2,100,4], index: 3, kind: input, shape index: {}]   ;;  %s3542_s4 = inlined_call_operand.vmem [shape: bf16[36,64], index: 4, kind: input, shape index: {}]   ;;  %s3543_s5 = inlined_call_operand.vmem [shape: f32[100,1], index: 5, kind: input, shape index: {}]   ;;  %s3544_s6 = inlined_call_operand.vmem [shape: bf16[2,100,64], index: 6, kind: output, shape index: {0}]   ;;  %s3545_s7 = inlined_call_operand.vmem [shape: f32[2,8,128], index: 7, kind: output, shape index: {1}]  }
   0x1 LB: > { %s2291_s25 = sadd.s32 4294967295, %s2880_s24   ;;  %p2295_p0 = scmp.ge.s32.totalorder %s2880_s24, 1  ;;  %s2880_s24 = sphi %s2926_s24, %s18_s24  }
   0x2   : > { %p270_p1 = scmp.lt.s32.totalorder %s2880_s24, 3 }
   0x4   : > { %p271_p2 = pnand %p2295_p0, %p270_p1 }
   0x5   : > { %vm473_vm0 = vcmask (!%p271_p2), 1041408   ;;  %v1041_v0 = vld [vmem:[%s3542_s4 + $0x8] sm:$0x3] (!%p271_p2)  ;;  %v2882_v1 = vmov (!%p271_p2), 0.0   ;;  %p321_p3 = scmp.lt.s32.totalorder (!%p271_p2), %s2291_s25, 1  ;;  %vm2883_vm1 = vmmov (!%p271_p2), 0  }
   0x6   : > { %274 = sbr.rel (%p271_p2) target bundleno = 558 (0x22e), region = 44  ;;  %2554 = vmatprep.subr.bf16.mxu0 (!%p271_p2), %v2882_v1  ;;  %2466 = vmatprep.subr.bf16.mxu1 (!%p271_p2), %v2882_v1  ;;  %v2940_v2 = vsel (!%p271_p2), %vm473_vm0, %v1041_v0, 0  ;;  %v2831_v3 = vld [vmem:[%s3542_s4] ss:$0 sps:$4 sm:$0xcc] (!%p271_p2)   ;;  %vm457_vm3 = vcmask (!%p271_p2), 31744  }
   0x7   : > { %2555 = vmatpush3.bf16.msra.mxu0 (!%p271_p2), %v2940_v2  ;;  %2468 = vmatprep.mubr.msk.bf16.mxu1 (!%p271_p2), %vm2883_vm1, %v2882_v1  ;;  %v456_v4 = vrot.slane (!%p271_p2), %v2831_v3, 2  ;;  %v2836_v5 = vld [vmem:[%s3542_s4 + $0x8] ss:$0 sps:$4 sm:$0xcc] (!%p271_p2)   ;;  %v362_v7 = vld [vmem:[%s3542_s4] sm:$0x3] (!%p271_p2) }
   0x8   : > { %2556 = vmatprep.mubr.msk.bf16.mxu0 (!%p271_p2), %vm2883_vm1, %v2882_v1  ;;  %2576 = vmatprep.subr.bf16.mxu0 (!%p271_p2), %v2882_v1  ;;  %vm403_vm2 = vsmask.f32 (!%p271_p2), 6400  ;;  %v1239_v8 = vrot.slane (!%p271_p2), %v2836_v5, 2  ;;  %v643_v11 = vsel (!%p271_p2), %vm473_vm0, %v362_v7, 0  ;;  %vm723_vm4 = vcmask (!%p271_p2), 1045504  }
   0x9   : > { %v475_v6 = vsel (!%p271_p2), %vm473_vm0, %v456_v4, 0  ;;  %vm1381_vm5 = vsmask.f32 (!%p271_p2), 5376  ;;  %vm1739_vm6 = vcmask (!%p271_p2), 1044480   ;;  %vm1990_vm7 = vcmask (!%p271_p2), 519168  }
   0xa   : > { %2467 = vmatpush3.bf16.msra.mxu1 (!%p271_p2), %v475_v6  ;;  %v1256_v18 = vsel (!%p271_p2), %vm473_vm0, %v1239_v8, 0  ;;  %vm1992_vm8 = vcmask (!%p271_p2), 517120   ;;  %vm1993_vm9 = vsmask.f32 (!%p271_p2), 1280  ;;  %vm2140_vm11 = vcmask (!%p271_p2), 519169  }
   0xb   : > { %2488 = vmatprep.subr.bf16.mxu1 (!%p271_p2), %v2882_v1  ;;  %vm1994_vm10 = vmand (!%p271_p2), %vm1992_vm8, %vm1993_vm9  ;;  %vm1922_vm12 = vcmask (!%p271_p2), 523264   ;;  %vm2141_vm13 = vsmask.f32 (!%p271_p2), 7942  ;;  %vm2028_vm14 = vsmask.f32 (!%p271_p2), 5392 }
   0xc   : > { %vm3445_vm15 = vmand (!%p271_p2), %vm2140_vm11, %vm2141_vm13 }
   0xd   : > { %s3551_s25 = smov (!%p321_p3, %s2291_s25), 1 }
   0xe   : > { %s2958_s9 = smul.u32 52, %s3551_s25  ;;  %s2301_s18 = sshll.u32 %s3551_s25, 3 }
   0xf   : > { %s349_s21 = scalar_lea.vmem %s3545_s7, %s2301_s18 }
  0x10   : > { %s2967_s14 = scalar_lea.vmem %s3539_s1, %s2958_s9  ;;  %s2976_s17 = scalar_lea.vmem %s3541_s3, %s2958_s9 }
  0x11   : > { %v2832_v9 = vld [vmem:[%s2967_s14 + $0x4] sm:$0xfe]   ;;  %v2833_v10 = vld [vmem:[%s2967_s14 + $0xc] sm:$0xff]   ;;  %v2837_v27 = vld [vmem:[%s2967_s14 + $0x14] sm:$0xff]   ;;  %s2994_s20 = scalar_lea.vmem %s3540_s2, %s2958_s9  ;;  %s3012_s23 = scalar_lea.vmem %s3538_s0, %s2958_s9 }
  0x12   : > { %v405_v12 = vshrl.u32 %v2832_v9, 16  ;;  %v408_v13 = vshll.u32 %v2832_v9, 16  ;;  %v413_v14 = vshrl.u32 %v2833_v10, 16  ;;  %v416_v15 = vshll.u32 %v2833_v10, 16  ;;  %v2834_v16 = vld [vmem:[%s2976_s17 + $0x4] sm:$0xfe]   ;;  %s3214_s10 = scalar_lea.vmem %s3544_s6, %s2958_s9 }
  0x13   : > { %v2835_v17 = vld [vmem:[%s2976_s17 + $0xc] sm:$0xff]   ;;  %v1071_v23 = vshrl.u32 %v2834_v16, 16  ;;  %v1074_v24 = vshll.u32 %v2834_v16, 16  ;;  %v2838_v28 = vld [vmem:[%s2976_s17 + $0x14] sm:$0xff]   ;;  %v422_v36 = vshrl.u32 %v2837_v27, 16  ;;  %v425_v37 = vshll.u32 %v2837_v27, 16 }
  0x14   : > { %v407_v19 = vrot.slane %v405_v12, 1  ;;  %v410_v20 = vrot.slane %v408_v13, 2  ;;  %v415_v21 = vrot.slane %v413_v14, 1  ;;  %v418_v22 = vrot.slane %v416_v15, 2  ;;  %v2839_v39 = vld [vmem:[%s2967_s14 + $0x1c] sm:$0xff]   ;;  %v2841_v60 = vld [vmem:[%s2967_s14 + $0x24] sm:$0xff]  }
  0x15   : > { %v1079_v25 = vshrl.u32 %v2835_v17, 16  ;;  %v1082_v26 = vshll.u32 %v2835_v17, 16  ;;  %v1073_v31 = vrot.slane %v1071_v23, 1  ;;  %v1076_v32 = vrot.slane %v1074_v24, 2  ;;  %v2840_v43 = vld [vmem:[%s2976_s17 + $0x1c] sm:$0xff]   ;;  %v3034_v16 = vld [vmem:[%s3012_s23 + $0xc] sm:$0xff]  }
  0x16   : > { %v411_v29 = vor.u32 %v410_v20, %v407_v19  ;;  %v419_v30 = vor.u32 %v418_v22, %v415_v21  ;;  %v1088_v38 = vshrl.u32 %v2838_v28, 16  ;;  %v1091_v42 = vshll.u32 %v2838_v28, 16  ;;  %v836_v51 = vld [vmem:[%s2994_s20 + $0x4] sm:$0xe]  ;;  %v837_v56 = vld [vmem:[%s2994_s20 + $0x8] sm:$0xf] }
  0x17   : > { %v1081_v33 = vrot.slane %v1079_v25, 1  ;;  %v1084_v34 = vrot.slane %v1082_v26, 2  ;;  %v1077_v40 = vor.u32 %v1076_v32, %v1073_v31  ;;  %v424_v44 = vrot.slane %v422_v36, 1  ;;  %v1220_v10 = vld [vmem:[%s2994_s20 + $0x4] sm:$0xc]  ;;  %v3049_v22 = vld [vmem:[%s2994_s20 + $0x14] sm:$0xff]  }
  0x18   : > { %v420_v35 = vsel %vm403_vm2, %v411_v29, %v419_v30  ;;  %v427_v45 = vrot.slane %v425_v37, 2  ;;  %v1090_v46 = vrot.slane %v1088_v38, 1  ;;  %v431_v47 = vshrl.u32 %v2839_v39, 16  ;;  %v2845_v14 = vld [vmem:[%s2967_s14 + $0x2c] ss:$0 sps:$4 sm:$0x11]  }
  0x19   : > { %2469 = vmatmul.mubr.msk.bf16.vlgmr.msra.gmra.mrb[0].mxu1 %vm457_vm3, %v420_v35  ;;  %v1085_v41 = vor.u32 %v1084_v34, %v1081_v33  ;;  %v1093_v49 = vrot.slane %v1091_v42, 2  ;;  %v434_v50 = vshll.u32 %v2839_v39, 16  ;;  %v1097_v54 = vshrl.u32 %v2840_v43, 16  ;;  %v351_v15 = vld [vmem:[%s3012_s23 + $0x4] sm:$0xe]  ;;  %v3055_v27 = vld [vmem:[%s3012_s23 + $0x14] sm:$0xff]  }
  0x1a   : > { %2472 = vmatprep.mubr.msk.bf16.mxu1 %vm2883_vm1, %v2882_v1  ;;  %2489 = vmatpush3.bf16.msra.mxu1 %v643_v11  ;;  %v428_v52 = vor.u32 %v427_v45, %v424_v44  ;;  %v1100_v55 = vshll.u32 %v2840_v43, 16  ;;  %v433_v58 = vrot.slane %v431_v47, 1  ;;  %v3006_v61 = vcombine.low %v836_v51, %v837_v56  ;;  %v3026_v11 = vld [vmem:[%s2994_s20 + $0xc] sm:$0xff]   ;;  %v3058_v28 = vld [vmem:[%s3012_s23 + $0x1c] sm:$0xff]   ;;  %v3076_v43 = vld [vmem:[%s2994_s20 + $0x24] sm:$0xff]  }
  0x1b   : > { %v1086_v48 = vsel %vm403_vm2, %v1077_v40, %v1085_v41  ;;  %2510 = vmatprep.subr.bf16.mxu1 %v2882_v1  ;;  %v1094_v53 = vor.u32 %v1093_v49, %v1090_v46  ;;  %v436_v59 = vrot.slane %v434_v50, 2  ;;  %v1099_v63 = vrot.slane %v1097_v54, 1  ;;  %v1352_v19 = vld [vmem:[%s3542_s4 + $0xc] sm:$0x3]  ;;  %v3068_v37 = vld [vmem:[%s2994_s20 + $0x1c] sm:$0xff]   ;;  %v3082_v45 = vld [vmem:[%s3012_s23 + $0x24] sm:$0xff]  }
  0x1c   : > { %2557 = vmatmul.mubr.msk.bf16.vlgmr.msra.gmra.mrb[0].mxu0 %vm457_vm3, %v1086_v48  ;;  %v429_v57 = vsel %vm403_vm2, %v419_v30, %v428_v52  ;;  %v1102_v0 = vrot.slane %v1100_v55, 2  ;;  %v440_v4 = vshrl.u32 %v2841_v60, 16  ;;  %v443_v5 = vshll.u32 %v2841_v60, 16  ;;  %v3079_v44 = vld [vmem:[%s2994_s20 + $0x2c] ss:$0 sps:$4 sm:$0x11]  }
  0x1d   : > { %2577 = vmatpush3.bf16.msra.mxu0 %v1256_v18  ;;  %2560 = vmatprep.mubr.msk.bf16.mxu0 %vm2883_vm1, %v2882_v1  ;;  %v1095_v62 = vsel %vm403_vm2, %v1085_v41, %v1094_v53  ;;  %v437_v3 = vor.u32 %v436_v59, %v433_v58  ;;  %v2354_v13 = vcombine.low %v1220_v10, %v837_v56  ;;  %v3039_v18 = vld [vmem:[%s3012_s23 + $0x8] sm:$0xf]  ;;  %v1226_v21 = vrot.slane %v3026_v11, 2 }
  0x1e   : > { %2598 = vmatprep.subr.bf16.mxu0 %v2882_v1  ;;  %v3021_v6 = vor.u32 %v1102_v0, %v1099_v63  ;;  %v442_v8 = vrot.slane %v440_v4, 1  ;;  %v445_v9 = vrot.slane %v443_v5, 2  ;;  %v2314_v23 = vcombine.low %v351_v15, %v3039_v18  ;;  %v1341_v51 = vld [vmem:[%s3012_s23 + $0x8] sm:$0xc]  ;;  %v3106_v5 = vld [vmem:[%s3012_s23 + $0x10] sm:$0xff]  }
  0x1f   : > { %v438_v7 = vsel %vm403_vm2, %v428_v52, %v437_v3  ;;  %v1225_v20 = vrot.slane %v2354_v13, 2  ;;  %v449_v25 = vshll.u32 %v2845_v14, 16  ;;  %v587_v26 = vshrl.u32 %v3034_v16, 16  ;;  %v3090_v52 = vld [vmem:[%s3012_s23 + $0xc] sm:$0xf] }
  0x20   : > { %v1104_v12 = vsel %vm403_vm2, %v1094_v53, %v3021_v6  ;;  %v446_v17 = vor.u32 %v445_v9, %v442_v8  ;;  %v1451_v29 = vsel %vm473_vm0, %v1352_v19, 0  ;;  %v590_v30 = vshll.u32 %v3034_v16, 16 }
  0x21   : > { %2473 = vmatmul.mubr.msk.bf16.gmra.mrb[4].mxu1 %vm457_vm3, %v429_v57  ;;  %v1227_v31 = vsel %vm723_vm4, %v1225_v20, %v1226_v21  ;;  %v1228_v32 = vrot.slane %v3049_v22, 2  ;;  %v579_v33 = vshrl.u32 %v2314_v23, 16  ;;  %v582_v34 = vshll.u32 %v2314_v23, 16 }
  0x22   : > { %2476 = vmatprep.mubr.msk.bf16.mxu1 %vm2883_vm1, %v2882_v1  ;;  %v447_v24 = vsel %vm403_vm2, %v437_v3, %v446_v17  ;;  %v451_v35 = vrot.slane %v449_v25, 2  ;;  %v589_v36 = vrot.slane %v587_v26, 1  ;;  %v596_v38 = vshrl.u32 %v3055_v27, 16 }
  0x23   : > { %v599_v39 = vshll.u32 %v3055_v27, 16  ;;  %v605_v40 = vshrl.u32 %v3058_v28, 16  ;;  %v608_v41 = vshll.u32 %v3058_v28, 16  ;;  %v592_v42 = vrot.slane %v590_v30, 2  ;;  %v2869_v30 = vld [vmem:[%s2967_s14 + $0x28] sm:$0xff]  }
  0x24   : > { %2561 = vmatmul.mubr.msk.bf16.gmra.mrb[4].mxu0 %vm457_vm3, %v1095_v62  ;;  %v581_v46 = vrot.slane %v579_v33, 1  ;;  %v584_v47 = vrot.slane %v582_v34, 2  ;;  %v452_v48 = vsel %vm403_vm2, %v446_v17, %v451_v35  ;;  %v598_v49 = vrot.slane %v596_v38, 1  ;;  %v719_v62 = vld [vmem:[%s3542_s4 + $0x4] sm:$0x3] }
  0x25   : > { %2564 = vmatprep.mubr.msk.bf16.mxu0 %vm2883_vm1, %v2882_v1  ;;  %v601_v50 = vrot.slane %v599_v39, 2  ;;  %v607_v53 = vrot.slane %v605_v40, 1  ;;  %v610_v54 = vrot.slane %v608_v41, 2  ;;  %v1229_v55 = vsel %vm723_vm4, %v1226_v21, %v1228_v32  ;;  %v2870_v40 = vld [vmem:[%s2967_s14 + $0x30] ss:$0 sps:$4 sm:$0x33]  }
  0x26   : > { %v1230_v56 = vrot.slane %v3068_v37, 2  ;;  %v614_v57 = vshrl.u32 %v3082_v45, 16  ;;  %v617_v58 = vshll.u32 %v3082_v45, 16  ;;  %v585_v59 = vor.u32 %v584_v47, %v581_v46 }
  0x27   : > { %v593_v60 = vor.u32 %v592_v42, %v589_v36  ;;  %v1232_v63 = vrot.slane %v3076_v43, 2  ;;  %v2361_v0 = vcombine.low %v1341_v51, %v3090_v52  ;;  %v602_v3 = vor.u32 %v601_v50, %v598_v49 }
  0x28   : > { %v1234_v4 = vrot.slane %v3079_v44, 2  ;;  %v751_v8 = vsel %vm473_vm0, %v719_v62, 0  ;;  %v616_v9 = vrot.slane %v614_v57, 1  ;;  %v619_v10 = vrot.slane %v617_v58, 2 }
  0x29   : > { %2477 = vmatmul.mubr.msk.bf16.gmra.mrb[8].mxu1 %vm457_vm3, %v438_v7  ;;  %v3108_v7 = vor.u32 %v610_v54, %v607_v53  ;;  %v594_v13 = vsel %vm403_vm2, %v585_v59, %v593_v60  ;;  %v1231_v14 = vsel %vm723_vm4, %v1228_v32, %v1230_v56  ;;  %v3118_v15 = vsel %vm723_vm4, %v1230_v56, %v1232_v63 }
  0x2a   : > { %2480 = vmatprep.mubr.msk.bf16.mxu1 %vm2883_vm1, %v2882_v1  ;;  %v1383_v17 = vshrl.u32 %v2361_v0, 16  ;;  %v603_v19 = vsel %vm403_vm2, %v593_v60, %v602_v3  ;;  %v3122_v20 = vsel %vm723_vm4, %v1232_v63, %v1234_v4  ;;  %v1386_v21 = vshll.u32 %v2361_v0, 16 }
  0x2b   : > { %v1391_v23 = vshrl.u32 %v3106_v5, 16  ;;  %v877_v25 = vshrl.u32 %v3006_v61, 16  ;;  %v880_v26 = vshll.u32 %v3006_v61, 16  ;;  %v1394_v32 = vshll.u32 %v3106_v5, 16 }
  0x2c   : > { %2565 = vmatmul.mubr.msk.bf16.gmra.mrb[8].mxu0 %vm457_vm3, %v1104_v12  ;;  %v2868_v12 = vld [vmem:[%s2967_s14 + $0x20] sm:$0xff]   ;;  %v888_v33 = vshll.u32 %v3026_v11, 16  ;;  %v3138_v35 = vrot.slane %v1383_v17, 2  ;;  %v3143_v61 = vrot.slane %v1386_v21, 3  ;;  %v894_v47 = vshrl.u32 %v3049_v22, 16 }
  0x2d   : > { %2578 = vmatprep.mubr.msk.bf16.mxu0 %vm2883_vm1, %v2882_v1  ;;  %v1603_v34 = vshrl.u32 %v2868_v12, 16  ;;  %v879_v36 = vrot.slane %v877_v25, 1  ;;  %v882_v38 = vrot.slane %v880_v26, 2  ;;  %v3145_v41 = vrot.slane %v1391_v23, 2  ;;  %v2872_v23 = vld [vmem:[%s2976_s17 + $0x24] sm:$0xff]   ;;  %v3173_v25 = vld [vmem:[%s3012_s23 + $0x18] sm:$0xff]  }
  0x2e   : > { %v890_v42 = vrot.slane %v888_v33, 2  ;;  %v1612_v49 = vshrl.u32 %v2869_v30, 16  ;;  %v1615_v54 = vshll.u32 %v2869_v30, 16  ;;  %v903_v58 = vshrl.u32 %v3068_v37, 16 }
  0x2f   : > { %v883_v46 = vor.u32 %v882_v38, %v879_v36  ;;  %v1605_v51 = vrot.slane %v1603_v34, 2  ;;  %v3154_v59 = vrot.slane %v1394_v32, 3  ;;  %v906_v62 = vshll.u32 %v3068_v37, 16  ;;  %v2873_v34 = vld [vmem:[%s2976_s17 + $0x2c] ss:$0 sps:$4 sm:$0x11]  }
  0x30   : > { %v1614_v57 = vrot.slane %v1612_v49, 2  ;;  %v1617_v60 = vrot.slane %v1615_v54, 3  ;;  %v905_v0 = vrot.slane %v903_v58, 1  ;;  %v1624_v4 = vshll.u32 %v2870_v40, 16  ;;  %v3185_v36 = vld [vmem:[%s3012_s23 + $0x20] sm:$0xff]  }
  0x31   : > { %2481 = vmatmul.mubr.msk.bf16.gmra.mrb[12].mxu1 %vm457_vm3, %v447_v24  ;;  %v3127_v24 = vsel %vm403_vm2, %v602_v3, %v3108_v7  ;;  %v1621_v3 = vshrl.u32 %v2870_v40, 16  ;;  %v915_v21 = vshll.u32 %v3076_v43, 16  ;;  %v1743_v40 = vrot.slane %v3173_v25, 3 }
  0x32   : > { %2484 = vmatprep.mubr.msk.bf16.mxu1 %vm2883_vm1, %v2882_v1  ;;  %v1626_v37 = vrot.slane %v1624_v4, 3  ;;  %v1995_v4 = vld [vmem:[%s3214_s10 + $0x4] sm:$0x3] }
  0x33   : > { %v1623_v17 = vrot.slane %v1621_v3, 2  ;;  %v917_v33 = vrot.slane %v915_v21, 2  ;;  %v1996_v21 = vsel %vm1994_vm10, 0, %v1995_v4 }
  0x34   : > { %2579 = vmatmul.mubr.msk.bf16.vlgmr.msra.gmra.mrb[0].mxu0 %vm457_vm3, %v1227_v31  ;;  %v3133_v31 = vor.u32 %v619_v10, %v616_v9  ;;  %v1618_v10 = vor.u32 %v1617_v60, %v1614_v57  ;;  %1997 = vst [vmem:[%s3214_s10 + $0x4] sm:$0x3] %v1996_v21 }
  0x35   : > { %2599 = vmatpush3.bf16.msra.mxu0 %v1451_v29  ;;  %2582 = vmatprep.mubr.msk.bf16.mxu0 %vm2883_vm1, %v2882_v1  ;;  %v885_v29 = vshrl.u32 %v3026_v11, 16  ;;  %v1606_v11 = vshll.u32 %v2868_v12, 16  ;;  %v908_v12 = vrot.slane %v906_v62, 2  ;;  %v1627_v32 = vor.u32 %v1626_v37, %v1623_v17 }
  0x36   : > { %2620 = vmatprep.subr.bf16.mxu0 %v2882_v1 }
  0x37   : > { %v887_v39 = vrot.slane %v885_v29, 1  ;;  %v1608_v53 = vrot.slane %v1606_v11, 3  ;;  %v1106_v11 = vshrl.u32 %v2872_v23, 16 }
  0x39   : > { %2485 = vmatmul.mubr.msk.bf16.gmra.mrb[16].mxu1 %vm457_vm3, %v452_v48  ;;  %v897_v48 = vshll.u32 %v3049_v22, 16  ;;  %v891_v50 = vor.u32 %v890_v42, %v887_v39  ;;  %v3161_v9 = vor.u32 %v1608_v53, %v1605_v51  ;;  %v1108_v53 = vrot.slane %v1106_v11, 1 }
  0x3a   : > { %2490 = vmatprep.mubr.msk.bf16.mxu1 %vm2883_vm1, %v2882_v1  ;;  %v1412_v11 = vshll.u32 %v3185_v36, 16 }
  0x3b   : > { %v899_v56 = vrot.slane %v897_v48, 2  ;;  %v3157_v22 = vsel %vm403_vm2, %v883_v46, %v891_v50  ;;  %v3177_v26 = vsel %vm1381_vm5, %v3161_v9, %v1618_v10  ;;  %v3198_v46 = vld [vmem:[%s3012_s23 + $0x28] sm:$0xff]  }
  0x3c   : > { %2583 = vmatmul.mubr.msk.bf16.gmra.mrb[4].mxu0 %vm457_vm3, %v1229_v55  ;;  %v896_v55 = vrot.slane %v894_v47, 1  ;;  %v3201_v47 = vld [vmem:[%s3012_s23 + $0x30] ss:$0 sps:$4 sm:$0x33]   ;;  %v1747_v60 = vrot.slane %v3198_v46, 3 }
  0x3d   : > { %2586 = vmatprep.mubr.msk.bf16.mxu0 %vm2883_vm1, %v2882_v1  ;;  %v1749_v62 = vrot.slane %v3201_v47, 3 }
  0x3e   : > { %v900_v63 = vor.u32 %v899_v56, %v896_v55  ;;  %v1115_v55 = vshll.u32 %v2873_v34, 16  ;;  %v2857_v56 = vld [vmem:[%s3542_s4 + $0xc] ss:$0 sps:$4 sm:$0xcc]  }
  0x40   : > { %v1117_v3 = vrot.slane %v1115_v55, 2 }
  0x41   : > { %2491 = vmatmul.mubr.msk.bf16.vlgmr.msra.gmra.mrb[0].mxu1 %vm457_vm3, %v594_v13  ;;  %v912_v13 = vshrl.u32 %v3076_v43, 16  ;;  %v1741_v43 = vrot.slane %v3106_v5, 3  ;;  %v3195_v5 = vsel %vm1381_vm5, %v1618_v10, %v1627_v32  ;;  %v3242_v10 = vld [vmem:[%s3012_s23 + $0x2c] ss:$0 sps:$4 sm:$0x11]   ;;  %v621_v32 = vsel %vm403_vm2, %v3108_v7, %v3133_v31 }
  0x42   : > { %2494 = vmatprep.mubr.msk.bf16.mxu1 %vm2883_vm1, %v2882_v1  ;;  %2511 = vmatpush3.bf16.msra.mxu1 %v751_v8  ;;  %v1734_v8 = vld [vmem:[%s3012_s23 + $0x8] sm:$0x8] }
  0x43   : > { %2532 = vmatprep.subr.bf16.mxu1 %v2882_v1  ;;  %v914_v29 = vrot.slane %v912_v13, 1  ;;  %v2384_v30 = vcombine.low %v1734_v8, %v3090_v52  ;;  %v921_v52 = vshll.u32 %v3079_v44, 16  ;;  %v3207_v44 = vsel %vm1739_vm6, %v1741_v43, %v1743_v40  ;;  %v1854_v8 = vld [vmem:[%s3543_s5 + $0x1b] sm:$0xff] }
  0x44   : > { %2587 = vmatmul.mubr.msk.bf16.gmra.mrb[8].mxu0 %vm457_vm3, %v1231_v14  ;;  %v3166_v14 = vsel %vm403_vm2, %v891_v50, %v900_v63  ;;  %v1745_v50 = vrot.slane %v3185_v36, 3  ;;  %v3248_v13 = vsel %vm1739_vm6, %v1747_v60, %v1749_v62 }
  0x45   : > { %2590 = vmatprep.mubr.msk.bf16.mxu0 %vm2883_vm1, %v2882_v1  ;;  %v1740_v39 = vrot.slane %v2384_v30, 3  ;;  %v918_v42 = vor.u32 %v917_v33, %v914_v29  ;;  %v923_v49 = vrot.slane %v921_v52, 2  ;;  %v1400_v29 = vshrl.u32 %v3173_v25, 16  ;;  %v1858_v52 = vld [vmem:[%s3543_s5 + $0x3b] sm:$0xff] }
  0x46   : > { %v3226_v58 = vsel %vm1739_vm6, %v1743_v40, %v1745_v50  ;;  %v1403_v30 = vshll.u32 %v3173_v25, 16  ;;  %v1632_v33 = vrot.slane %v2857_v56, 2 }
  0x47   : > { %v3204_v48 = vsel %vm1739_vm6, %v1740_v39, %v1741_v43  ;;  %v3223_v57 = vsel %vm403_vm2, %v918_v42, %v923_v49  ;;  %v1857_v43 = vld [vmem:[%s3543_s5 + $0x33] sm:$0xff]  ;;  %v718_v39 = vld [vmem:[%s3012_s23 + $0x4] sm:$0xc] }
  0x48   : > { %v1405_v25 = vrot.slane %v1403_v30, 3  ;;  %v1649_v7 = vsel %vm473_vm0, %v1632_v33, 0  ;;  %v2866_v30 = vld [vmem:[%s2967_s14 + $0x10] sm:$0xff]   ;;  %v2865_v33 = vld [vmem:[%s2967_s14 + $0x8] sm:$0xfc]  }
  0x49   : > { %2495 = vmatmul.mubr.msk.bf16.gmra.mrb[4].mxu1 %vm457_vm3, %v603_v19  ;;  %v909_v19 = vor.u32 %v908_v12, %v905_v0  ;;  %v3245_v12 = vsel %vm1739_vm6, %v1745_v50, %v1747_v60  ;;  %v2325_v50 = vcombine.low %v718_v39, %v3039_v18  ;;  %v1861_v18 = vld [vmem:[%s3543_s5 + $0x53] sm:$0x3f]  ;;  %v725_v60 = vrot.slane %v3034_v16, 2 }
  0x4a   : > { %2498 = vmatprep.mubr.msk.bf16.mxu1 %vm2883_vm1, %v2882_v1 }
  0x4b   : > { %v3188_v38 = vsel %vm403_vm2, %v900_v63, %v909_v19  ;;  %v3217_v51 = vsel %vm403_vm2, %v909_v19, %v918_v42  ;;  %v1852_v63 = vld [vmem:[%s3543_s5 + $0xb] sm:$0xff]  ;;  %v1397_v19 = vor.u32 %v3154_v59, %v3145_v41  ;;  %v1402_v59 = vrot.slane %v1400_v29, 2 }
  0x4c   : > { %2591 = vmatmul.mubr.msk.bf16.gmra.mrb[12].mxu0 %vm457_vm3, %v3118_v15  ;;  %v1109_v15 = vshll.u32 %v2872_v23, 16  ;;  %v1853_v23 = vld [vmem:[%s3543_s5 + $0x13] sm:$0xff]  ;;  %v1409_v42 = vshrl.u32 %v3185_v36, 16  ;;  %v1860_v36 = vld [vmem:[%s3543_s5 + $0x4b] sm:$0xff]  ;;  %v724_v56 = vrot.slane %v2325_v50, 2 }
  0x4d   : > { %2594 = vmatprep.mubr.msk.bf16.mxu0 %vm2883_vm1, %v2882_v1  ;;  %v1406_v40 = vor.u32 %v1405_v25, %v1402_v59  ;;  %v1580_v59 = vshll.u32 %v2865_v33, 16  ;;  %v1588_v25 = vshll.u32 %v2866_v30, 16 }
  0x4e   : > { %v1111_v54 = vrot.slane %v1109_v15, 2  ;;  %v1859_v15 = vld [vmem:[%s3543_s5 + $0x43] sm:$0xff]  ;;  %v1411_v55 = vrot.slane %v1409_v42, 2  ;;  %v726_v4 = vsel %vm723_vm4, %v724_v56, %v725_v60  ;;  %v731_v42 = vrot.slane %v3082_v45, 2 }
  0x50   : > { %v1112_v0 = vor.u32 %v1111_v54, %v1108_v53  ;;  %v2862_v53 = vld [vmem:[%s3542_s4 + $0x4] ss:$0 sps:$4 sm:$0xcc]   ;;  %v1407_v54 = vsel %vm1381_vm5, %v1397_v19, %v1406_v40 }
  0x51   : > { %2499 = vmatmul.mubr.msk.bf16.gmra.mrb[8].mxu1 %vm457_vm3, %v3127_v24  ;;  %v2884_v24 = vmov 0   ;;  %v928_v62 = vrot.slane %v2862_v53, 2 }
  0x52   : > { %2502 = vmatprep.mubr.msk.bf16.mxu1 %vm2883_vm1, %v2882_v1  ;;  %2829 = vset.pattern.permute.xlu0 %v2884_v24  ;;  %1991 = vst.msk [vmem:[%s3214_s10] sm:$0xf] %vm1990_vm7, %v2884_v24  ;;  %v3254_v17 = vsel %vm403_vm2, %v3021_v6, %v1112_v0  ;;  %v3257_v37 = vsel %vm403_vm2, %v1112_v0, %v1117_v3  ;;  %v1418_v0 = vshrl.u32 %v3198_v46, 16  ;;  %v1421_v3 = vshll.u32 %v3198_v46, 16 }
  0x53   : > { %2168 = vst.msk [vmem:[%s3214_s10 + $0x30] sm:$0x3] %vm1992_vm8, %v2884_v24  ;;  %1864 = vperm.xlu0 %2829, %v1852_v63   ;;  %2830 = vset.pattern.permute.xlu1 %v2884_v24  ;;  %v1389_v6 = vor.u32 %v3143_v61, %v3138_v35  ;;  %v623_v35 = vshll.u32 %v3242_v10, 16  ;;  %v1856_v61 = vld [vmem:[%s3543_s5 + $0x2b] sm:$0xff] }
  0x54   : > { %2595 = vmatmul.mubr.msk.bf16.gmra.mrb[16].mxu0 %vm457_vm3, %v3122_v20  ;;  %1874 = vperm.xlu1 %2830, %v1854_v8   ;;  %v1855_v20 = vld [vmem:[%s3543_s5 + $0x23] sm:$0xff]  ;;  %v945_v8 = vsel %vm473_vm0, %v928_v62, 0  ;;  %v1420_v24 = vrot.slane %v1418_v0, 2  ;;  %v1423_v21 = vrot.slane %v1421_v3, 3 }
  0x55   : > { %2600 = vmatprep.mubr.msk.bf16.mxu0 %vm2883_vm1, %v2882_v1  ;;  %v1398_v41 = vsel %vm1381_vm5, %v1389_v6, %v1397_v19  ;;  %v625_v34 = vrot.slane %v623_v35, 2  ;;  %v1427_v6 = vshrl.u32 %v3201_v47, 16  ;;  %v1430_v19 = vshll.u32 %v3201_v47, 16 }
  0x56   : > { %v1424_v46 = vor.u32 %v1423_v21, %v1420_v24  ;;  %v729_v35 = vrot.slane %v3058_v28, 2  ;;  %v1590_v28 = vrot.slane %v1588_v25, 3 }
  0x57   : > { %1869 = vperm.xlu0 %2829, %v1853_v23   ;;  %v626_v49 = vsel %vm403_vm2, %v3133_v31, %v625_v34  ;;  %v1414_v31 = vrot.slane %v1412_v11, 3  ;;  %v727_v23 = vrot.slane %v3055_v27, 2  ;;  %vm2155_vm2 = vcmask 516096  }
  0x58   : > { %1879 = vperm.xlu1 %2830, %v1855_v20   ;;  %v1429_v20 = vrot.slane %v1427_v6, 2  ;;  %v732_v53 = vsel %vm723_vm4, %v729_v35, %v731_v42 }
  0x59   : > { %2503 = vmatmul.mubr.msk.bf16.gmra.mrb[12].mxu1 %vm457_vm3, %v621_v32  ;;  %v1415_v63 = vor.u32 %v1414_v31, %v1411_v55  ;;  %v728_v29 = vsel %vm723_vm4, %v725_v60, %v727_v23  ;;  %v1432_v32 = vrot.slane %v1430_v19, 3 }
  0x5a   : > { %2506 = vmatprep.mubr.msk.bf16.mxu1 %vm2883_vm1, %v2882_v1 }
  0x5b   : > { %1884 = vperm.xlu0 %2829, %v1856_v61   ;;  %v1416_v16 = vsel %vm1381_vm5, %v1406_v40, %v1415_v63  ;;  %v1425_v27 = vsel %vm1381_vm5, %v1415_v63, %v1424_v46  ;;  %v1585_v61 = vshrl.u32 %v2866_v30, 16  ;;  %v1433_v47 = vor.u32 %v1432_v32, %v1429_v20  ;;  %v2867_v40 = vld [vmem:[%s2967_s14 + $0x18] sm:$0xff]   ;;  %v2143_v20 = vld [vmem:[%s3214_s10 + $0x4] sm:$0xe]  ;;  %s2885_s14 = smov 64  }
  0x5c   : > { %2601 = vmatmul.mubr.msk.bf16.vlgmr.msra.gmra.mrb[0].mxu0 %vm457_vm3, %v1398_v41  ;;  %1889 = vperm.xlu1 %2830, %v1857_v43   ;;  %v1577_v41 = vshrl.u32 %v2865_v33, 16  ;;  %v730_v43 = vsel %vm723_vm4, %v727_v23, %v729_v35  ;;  %v1597_v50 = vshll.u32 %v2867_v40, 16 }
  0x5d   : > { %2621 = vmatpush3.bf16.msra.mxu0 %v1649_v7  ;;  %2604 = vmatprep.mubr.msk.bf16.mxu0 %vm2883_vm1, %v2882_v1  ;;  %v1587_v7 = vrot.slane %v1585_v61, 2  ;;  %v1434_v34 = vsel %vm1381_vm5, %v1424_v46, %v1433_v47 }
  0x5e   : > { %2642 = vmatprep.subr.bf16.mxu0 %v2882_v1  ;;  %v1579_v39 = vrot.slane %v1577_v41, 2  ;;  %v1599_v55 = vrot.slane %v1597_v50, 3 }
  0x5f   : > { %1894 = vperm.xlu0 %2829, %v1858_v52   ;;  %v1582_v52 = vrot.slane %v1580_v59, 3 }
  0x60   : > { %1899 = vperm.xlu1 %2830, %v1859_v15   ;;  %v1591_v15 = vor.u32 %v1590_v28, %v1587_v7 }
  0x61   : > { %2507 = vmatmul.mubr.msk.bf16.gmra.mrb[16].mxu1 %vm457_vm3, %v626_v49  ;;  %v1583_v11 = vor.u32 %v1582_v52, %v1579_v39  ;;  %v1594_v49 = vshrl.u32 %v2867_v40, 16 }
  0x62   : > { %2512 = vmatprep.mubr.msk.bf16.mxu1 %vm2883_vm1, %v2882_v1 }
  0x63   : > { %1904 = vperm.xlu0 %2829, %v1860_v36   ;;  %v1735_v36 = vld [vmem:[%s3542_s4 + $0x10] sm:$0x3]  ;;  %v1596_v45 = vrot.slane %v1594_v49, 2 }
  0x64   : > { %2605 = vmatmul.mubr.msk.bf16.gmra.mrb[4].mxu0 %vm457_vm3, %v1407_v54  ;;  %1909 = vperm.xlu1 %2830, %v1861_v18   ;;  %v1592_v54 = vsel %vm1381_vm5, %v1583_v11, %v1591_v15  ;;  %v1767_v31 = vsel %vm473_vm0, %v1735_v36, 0  ;;  %v733_v18 = vrot.slane %v3242_v10, 2  ;;  %vm3454_vm0 = vmor %vm1993_vm9, %vm2028_vm14 }
  0x65   : > { %2608 = vmatprep.mubr.msk.bf16.mxu0 %vm2883_vm1, %v2882_v1  ;;  %v1600_v56 = vor.u32 %v1599_v55, %v1596_v45 }
  0x66   : > { %v734_v60 = vsel %vm723_vm4, %v731_v42, %v733_v18 }
  0x67   : > { %v1601_v62 = vsel %vm1381_vm5, %v1591_v15, %v1600_v56  ;;  %v1610_v10 = vsel %vm1381_vm5, %v1600_v56, %v3161_v9  ;;  %vm2162_vm5 = vsmask.f32 7938 }
  0x68   : > { %vm2163_vm6 = vmand %vm1990_vm7, %vm2162_vm5 }
  0x69   : > { %2513 = vmatmul.mubr.msk.bf16.vlgmr.msra.gmra.mrb[0].mxu1 %vm457_vm3, %v726_v4 }
  0x6a   : > { %2516 = vmatprep.mubr.msk.bf16.mxu1 %vm2883_vm1, %v2882_v1  ;;  %2533 = vmatpush3.bf16.msra.mxu1 %v945_v8 }
  0x6b   : > { %2664 = vmatprep.subr.bf16.mxu1 %v2882_v1 }
  0x6c   : > { %2609 = vmatmul.mubr.msk.bf16.gmra.mrb[8].mxu0 %vm457_vm3, %v1416_v16 }
  0x6d   : > { %2612 = vmatprep.mubr.msk.bf16.mxu0 %vm2883_vm1, %v2882_v1 }
  0x71   : > { %2517 = vmatmul.mubr.msk.bf16.gmra.mrb[4].mxu1 %vm457_vm3, %v728_v29 }
  0x72   : > { %2520 = vmatprep.mubr.msk.bf16.mxu1 %vm2883_vm1, %v2882_v1 }
  0x74   : > { %2613 = vmatmul.mubr.msk.bf16.gmra.mrb[12].mxu0 %vm457_vm3, %v1425_v27 }
  0x75   : > { %2616 = vmatprep.mubr.msk.bf16.mxu0 %vm2883_vm1, %v2882_v1 }
  0x79   : > { %2521 = vmatmul.mubr.msk.bf16.gmra.mrb[8].mxu1 %vm457_vm3, %v730_v43 }
  0x7a   : > { %2524 = vmatprep.mubr.msk.bf16.mxu1 %vm2883_vm1, %v2882_v1 }
  0x7c   : > { %2617 = vmatmul.mubr.msk.bf16.gmra.mrb[16].mxu0 %vm457_vm3, %v1434_v34 }
  0x7d   : > { %2622 = vmatprep.mubr.msk.bf16.mxu0 %vm2883_vm1, %v2882_v1 }
  0x81   : > { %2525 = vmatmul.mubr.msk.bf16.gmra.mrb[12].mxu1 %vm457_vm3, %v732_v53 }
  0x82   : > { %2528 = vmatprep.mubr.msk.bf16.mxu1 %vm2883_vm1, %v2882_v1 }
  0x84   : > { %2623 = vmatmul.mubr.msk.bf16.vlgmr.msra.gmra.mrb[0].mxu0 %vm457_vm3, %v1592_v54 }
  0x85   : > { %2643 = vmatpush3.bf16.msra.mxu0 %v1767_v31  ;;  %2626 = vmatprep.mubr.msk.bf16.mxu0 %vm2883_vm1, %v2882_v1 }
  0x89   : > { %2529 = vmatmul.mubr.msk.bf16.gmra.mrb[16].mxu1 %vm457_vm3, %v734_v60 }
  0x8a   : > { %2534 = vmatprep.mubr.msk.bf16.mxu1 %vm2883_vm1, %v2882_v1 }
  0x8c   : > { %2627 = vmatmul.mubr.msk.bf16.gmra.mrb[4].mxu0 %vm457_vm3, %v1601_v62 }
  0x8d   : > { %2630 = vmatprep.mubr.msk.bf16.mxu0 %vm2883_vm1, %v2882_v1 }
  0x91   : > { %2535 = vmatmul.mubr.msk.bf16.vlgmr.msra.gmra.mrb[0].mxu1 %vm457_vm3, %v3157_v22 }
  0x92   : > { %2538 = vmatprep.mubr.msk.bf16.mxu1 %vm2883_vm1, %v2882_v1  ;;  %2665 = vmatpush3.bf16.msra.mxu1 %v2940_v2 }
  0x94   : > { %2631 = vmatmul.mubr.msk.bf16.gmra.mrb[8].mxu0 %vm457_vm3, %v1610_v10 }
  0x95   : > { %2634 = vmatprep.mubr.msk.bf16.mxu0 %vm2883_vm1, %v2882_v1 }
  0x99   : > { %2539 = vmatmul.mubr.msk.bf16.gmra.mrb[4].mxu1 %vm457_vm3, %v3166_v14 }
  0x9a   : > { %2542 = vmatprep.mubr.msk.bf16.mxu1 %vm2883_vm1, %v2882_v1 }
  0x9c   : > { %2635 = vmatmul.mubr.msk.bf16.gmra.mrb[12].mxu0 %vm457_vm3, %v3177_v26 }
  0x9d   : > { %2638 = vmatprep.mubr.msk.bf16.mxu0 %vm2883_vm1, %v2882_v1 }
  0xa1   : > { %2543 = vmatmul.mubr.msk.bf16.gmra.mrb[8].mxu1 %vm457_vm3, %v3188_v38 }
  0xa2   : > { %2546 = vmatprep.mubr.msk.bf16.mxu1 %vm2883_vm1, %v2882_v1 }
  0xa4   : > { %2639 = vmatmul.mubr.msk.bf16.gmra.mrb[16].mxu0 %vm457_vm3, %v3195_v5 }
  0xa5   : > { %2644 = vmatprep.mubr.msk.bf16.mxu0 %vm2883_vm1, %v2882_v1 }
  0xa9   : > { %2547 = vmatmul.mubr.msk.bf16.gmra.mrb[12].mxu1 %vm457_vm3, %v3217_v51 }
  0xaa   : > { %2550 = vmatprep.mubr.msk.bf16.mxu1 %vm2883_vm1, %v2882_v1 }
  0xac   : > { %2645 = vmatmul.mubr.msk.bf16.vlgmr.msra.gmra.mrb[0].mxu0 %vm457_vm3, %v3204_v48 }
  0xad   : > { %2648 = vmatprep.mubr.msk.bf16.mxu0 %vm2883_vm1, %v2882_v1 }
  0xb1   : > { %2551 = vmatmul.mubr.msk.bf16.gmra.mrb[16].mxu1 %vm457_vm3, %v3223_v57 }
  0xb2   : > { %2568 = vmatprep.mubr.msk.bf16.mxu1 %vm2883_vm1, %v2882_v1 }
  0xb4   : > { %2649 = vmatmul.mubr.msk.bf16.gmra.mrb[4].mxu0 %vm457_vm3, %v3207_v44 }
  0xb5   : > { %2652 = vmatprep.mubr.msk.bf16.mxu0 %vm2883_vm1, %v2882_v1 }
  0xb9   : > { %2569 = vmatmul.mubr.msk.bf16.vlgmr.msra.gmra.mrb[12].mxu1 %vm457_vm3, %v3254_v17 }
  0xba   : > { %2572 = vmatprep.mubr.msk.bf16.mxu1 %vm2883_vm1, %v2882_v1 }
  0xbc   : > { %2653 = vmatmul.mubr.msk.bf16.gmra.mrb[8].mxu0 %vm457_vm3, %v3226_v58 }
  0xbd   : > { %2656 = vmatprep.mubr.msk.bf16.mxu0 %vm2883_vm1, %v2882_v1 }
  0xc1   : > { %2573 = vmatmul.mubr.msk.bf16.gmra.mrb[16].mxu1 %vm457_vm3, %v3257_v37 }
  0xc4   : > { %2657 = vmatmul.mubr.msk.bf16.gmra.mrb[12].mxu0 %vm457_vm3, %v3245_v12 }
  0xc5   : > { %2660 = vmatprep.mubr.msk.bf16.mxu0 %vm2883_vm1, %v2882_v1  ;;  %vm1940_vm1 = vcmask 521216  }
  0xcc   : > { %2661 = vmatmul.mubr.msk.bf16.gmra.mrb[16].mxu0 %vm457_vm3, %v3248_v13  ;;  %vm2156_vm3 = vsmask.f32 256 }
  0xcd   : > { %vm2157_vm4 = vmand %vm2155_vm2, %vm2156_vm3 }
  0xd2   : > { %v1865_v12 = vpop.permute.xlu0 %1864 }
  0xd3   : > { %v1875_v32 = vpop.permute.xlu1 %1874 }
  0xd6   : > { %v1870_v8 = vpop.permute.xlu0 %1869 }
  0xd7   : > { %v1880_v31 = vpop.permute.xlu1 %1879 }
  0xdb   : > { %v1890_v27 = vpop.permute.xlu1 %1889 }
 0x164   : > { %v981_v2 = vpop.f32.mrb[0].mxu1 }
 0x165   : > { %v2536_v22 = vpop.f32.mrb[1].mxu1 }
 0x166   : > { %v984_v9 = vpop.f32.mrb[2].mxu1 }
 0x167   : > { %v2537_v14 = vpop.f32.mrb[3].mxu1 }
 0x16c   : > { %v989_v26 = vpop.f32.mrb[4].mxu1 }
 0x16d   : > { %v2540_v38 = vpop.f32.mrb[5].mxu1 }
 0x16e   : > { %v992_v5 = vpop.f32.mrb[6].mxu1 }
 0x16f   : > { %v2541_v48 = vpop.f32.mrb[7].mxu1 }
 0x174   : > { %v3441_v44 = vpop.f32.mrb[8].mxu1 }
 0x175   : > { %v2544_v51 = vpop.f32.mrb[9].mxu1 }
 0x176   : > { %v3443_v57 = vpop.f32.mrb[10].mxu1 }
 0x177   : > { %v2545_v58 = vpop.f32.mrb[11].mxu1 }
 0x17f   : > { %v1803_v17 = vpop.f32.mrb[0].mxu0 }
 0x180   : > { %v2666_v1 = vadd.f32 %v1803_v17, %v981_v2  ;;  %v2646_v37 = vpop.f32.mrb[1].mxu0 }
 0x181   : > { %v1806_v63 = vpop.f32.mrb[2].mxu0 }
 0x182   : > { %v1912_v13 = vmul.f32 %v2666_v1, %v1865_v12  ;;  %v2402_v0 = vpack.c.bf16 %v2666_v1, %v2666_v1  ;;  %v2667_v3 = vadd.f32 %v1806_v63, %v984_v9  ;;  %v2647_v4 = vpop.f32.mrb[3].mxu0 }
 0x184   : > { %v2031_v16 = vshrl.u32 %v2402_v0, 16  ;;  %v2034_v24 = vshll.u32 %v2402_v0, 16  ;;  %v2403_v21 = vpack.c.bf16 %v2667_v3, %v2667_v3  ;;  %v1949_v23 = vmul.f32 %v1912_v13, %v1912_v13 }
 0x185   : > { %v1913_v46 = vmul.f32 %v2667_v3, %v1870_v8  ;;  %v1923_v33 = vsel %vm1922_vm12, %v1912_v13, 0.0 }
 0x186   : > { %v2033_v6 = vrot.slane %v2031_v16, 6  ;;  %v2036_v19 = vrot.slane %v2034_v24, 7  ;;  %v2040_v29 = vshrl.u32 %v2403_v21, 16  ;;  %v2043_v30 = vshll.u32 %v2403_v21, 16 }
 0x187   : > { %v1924_v35 = vsel %vm1922_vm12, %v1913_v46, 0.0  ;;  %v1950_v61 = vmul.f32 %v1913_v46, %v1913_v46  ;;  %v1811_v47 = vpop.f32.mrb[4].mxu0  ;;  %v1959_v39 = vsel %vm1922_vm12, %v1949_v23, 0.0  ;;  %v1885_v46 = vpop.permute.xlu0 %1884 }
 0x188   : > { %v2037_v41 = vor.u32 %v2036_v19, %v2033_v6  ;;  %v2042_v59 = vrot.slane %v2040_v29, 6  ;;  %v2045_v25 = vrot.slane %v2043_v30, 7  ;;  %v1925_v43 = vadd.f32 %v1924_v35, %v1923_v33  ;;  %v2650_v7 = vpop.f32.mrb[5].mxu0 }
 0x189   : > { %v1960_v52 = vsel %vm1922_vm12, %v1950_v61, 0.0  ;;  %v2668_v28 = vadd.f32 %v1811_v47, %v989_v26  ;;  %v1814_v40 = vpop.f32.mrb[6].mxu0 }
 0x18a   : > { %v2038_v42 = vrot.slane %v2037_v41, 4  ;;  %v2144_v11 = vsel %vm3445_vm15, %v2037_v41, %v2143_v20  ;;  %v2046_v15 = vor.u32 %v2045_v25, %v2042_v59  ;;  %v1961_v49 = vadd.f32 %v1960_v52, %v1959_v39  ;;  %v2651_v50 = vpop.f32.mrb[7].mxu0 }
 0x18b   : > { %2145 = vst [vmem:[%s3214_s10 + $0x4] sm:$0xe] %v2144_v11  ;;  %v1914_v53 = vmul.f32 %v2668_v28, %v1875_v32  ;;  %v2404_v36 = vpack.c.bf16 %v2668_v28, %v2668_v28  ;;  %v2669_v54 = vadd.f32 %v1814_v40, %v992_v5 }
 0x18c   : > { %v2047_v45 = vsel %vm3454_vm0, %v2038_v42, %v2046_v15  ;;  %v3465_v55 = vpop.f32.mrb[12].mxu1  ;;  %v2048_v26 = vrot.slane %v2046_v15, 4 }
 0x18d   : > { %2146 = vst.msk [vmem:[%s3214_s10 + $0x8] sm:$0xf] %vm1990_vm7, %v2047_v45  ;;  %v1926_v18 = vsel %vm1922_vm12, %v1914_v53, 0.0  ;;  %v1951_v56 = vmul.f32 %v1914_v53, %v1914_v53  ;;  %v2050_v60 = vshrl.u32 %v2404_v36, 16  ;;  %v2053_v62 = vshll.u32 %v2404_v36, 16  ;;  %v2570_v10 = vpop.f32.mrb[13].mxu1 }
 0x18e   : > { %v1927_v2 = vadd.f32 %v1926_v18, %v1925_v43  ;;  %v1915_v22 = vmul.f32 %v2669_v54, %v1880_v31  ;;  %v2405_v9 = vpack.c.bf16 %v2669_v54, %v2669_v54  ;;  %v1198_v14 = vpop.f32.mrb[14].mxu1 }
 0x18f   : > { %v1962_v38 = vsel %vm1922_vm12, %v1951_v56, 0.0  ;;  %v2052_v5 = vrot.slane %v2050_v60, 6  ;;  %v2055_v48 = vrot.slane %v2053_v62, 7  ;;  %v1819_v51 = vpop.f32.mrb[8].mxu0  ;;  %v2571_v58 = vpop.f32.mrb[15].mxu1 }
 0x190   : > { %v1963_v12 = vadd.f32 %v1962_v38, %v1961_v49  ;;  %v1928_v17 = vsel %vm1922_vm12, %v1915_v22, 0.0  ;;  %v1952_v1 = vmul.f32 %v1915_v22, %v1915_v22  ;;  %v2060_v37 = vshrl.u32 %v2405_v9, 16  ;;  %v2654_v63 = vpop.f32.mrb[9].mxu0  ;;  %v1895_v22 = vpop.permute.xlu0 %1894 }
 0x191   : > { %v2056_v13 = vor.u32 %v2055_v48, %v2052_v5  ;;  %v1929_v0 = vadd.f32 %v1928_v17, %v1927_v2  ;;  %v2063_v3 = vshll.u32 %v2405_v9, 16  ;;  %v2670_v4 = vadd.f32 %v1819_v51, %v3441_v44  ;;  %v1822_v8 = vpop.f32.mrb[10].mxu0  ;;  %v1900_v5 = vpop.permute.xlu1 %1899 }
 0x192   : > { %v1964_v16 = vsel %vm1922_vm12, %v1952_v1, 0.0  ;;  %v2062_v24 = vrot.slane %v2060_v37, 6  ;;  %v2671_v21 = vadd.f32 %v1822_v8, %v3443_v57  ;;  %v2655_v23 = vpop.f32.mrb[11].mxu0 }
 0x193   : > { %v2057_v6 = vsel %vm3454_vm0, %v2048_v26, %v2056_v13  ;;  %v2058_v19 = vrot.slane %v2056_v13, 4  ;;  %v1965_v29 = vadd.f32 %v1964_v16, %v1963_v12  ;;  %v2065_v30 = vrot.slane %v2063_v3, 7 }
 0x194   : > { %2147 = vst.msk [vmem:[%s3214_s10 + $0xc] sm:$0xf] %vm1990_vm7, %v2057_v6  ;;  %v1916_v20 = vmul.f32 %v2670_v4, %v1885_v46  ;;  %v2406_v32 = vpack.c.bf16 %v2670_v4, %v2670_v4  ;;  %v1917_v44 = vmul.f32 %v2671_v21, %v1890_v27  ;;  %v3479_v33 = vpop.f32.mrb[16].mxu1  ;;  %v2407_v61 = vpack.c.bf16 %v2671_v21, %v2671_v21 }
 0x195   : > { %v2066_v35 = vor.u32 %v2065_v30, %v2062_v24  ;;  %v2574_v57 = vpop.f32.mrb[17].mxu1 }
 0x196   : > { %v1930_v47 = vsel %vm1922_vm12, %v1916_v20, 0.0  ;;  %v1953_v41 = vmul.f32 %v1916_v20, %v1916_v20  ;;  %v2070_v59 = vshrl.u32 %v2406_v32, 16  ;;  %v2073_v25 = vshll.u32 %v2406_v32, 16  ;;  %v1206_v43 = vpop.f32.mrb[18].mxu1 }
 0x197   : > { %v2067_v7 = vsel %vm3454_vm0, %v2058_v19, %v2066_v35  ;;  %v2068_v39 = vrot.slane %v2066_v35, 4  ;;  %v1931_v52 = vadd.f32 %v1930_v47, %v1929_v0  ;;  %v1932_v28 = vsel %vm1922_vm12, %v1917_v44, 0.0  ;;  %v1827_v40 = vpop.f32.mrb[12].mxu0  ;;  %v2575_v42 = vpop.f32.mrb[19].mxu1 }
 0x198   : > { %2148 = vst.msk [vmem:[%s3214_s10 + $0x10] sm:$0xf] %vm1990_vm7, %v2067_v7  ;;  %v1966_v11 = vsel %vm1922_vm12, %v1953_v41, 0.0  ;;  %v2072_v15 = vrot.slane %v2070_v59, 6  ;;  %v2075_v49 = vrot.slane %v2073_v25, 7  ;;  %v1954_v50 = vmul.f32 %v1917_v44, %v1917_v44  ;;  %v2658_v53 = vpop.f32.mrb[13].mxu0  ;;  %v1905_v47 = vpop.permute.xlu0 %1904 }
 0x199   : > { %v1967_v36 = vadd.f32 %v1966_v11, %v1965_v29  ;;  %v1933_v54 = vadd.f32 %v1932_v28, %v1931_v52  ;;  %v2080_v45 = vshrl.u32 %v2407_v61, 16  ;;  %v2083_v31 = vshll.u32 %v2407_v61, 16  ;;  %v1830_v18 = vpop.f32.mrb[14].mxu0  ;;  %v1910_v7 = vpop.permute.xlu1 %1909 }
 0x19a   : > { %v2076_v56 = vor.u32 %v2075_v49, %v2072_v15  ;;  %v1968_v60 = vsel %vm1922_vm12, %v1954_v50, 0.0  ;;  %v2672_v62 = vadd.f32 %v1827_v40, %v3465_v55  ;;  %v2673_v10 = vadd.f32 %v1830_v18, %v1198_v14  ;;  %v2659_v2 = vpop.f32.mrb[15].mxu0 }
 0x19b   : > { %v1969_v9 = vadd.f32 %v1968_v60, %v1967_v36  ;;  %v2082_v26 = vrot.slane %v2080_v45, 6  ;;  %v2085_v38 = vrot.slane %v2083_v31, 7 }
 0x19c   : > { %v2077_v48 = vsel %vm3454_vm0, %v2068_v39, %v2076_v56  ;;  %v2078_v51 = vrot.slane %v2076_v56, 4  ;;  %v1918_v58 = vmul.f32 %v2672_v62, %v1895_v22  ;;  %v2408_v12 = vpack.c.bf16 %v2672_v62, %v2672_v62 }
 0x19d   : > { %2149 = vst.msk [vmem:[%s3214_s10 + $0x14] sm:$0xf] %vm1990_vm7, %v2077_v48  ;;  %v2086_v17 = vor.u32 %v2085_v38, %v2082_v26  ;;  %v1919_v1 = vmul.f32 %v2673_v10, %v1900_v5  ;;  %v2409_v37 = vpack.c.bf16 %v2673_v10, %v2673_v10 }
 0x19e   : > { %v1934_v55 = vsel %vm1922_vm12, %v1918_v58, 0.0  ;;  %v1955_v14 = vmul.f32 %v1918_v58, %v1918_v58  ;;  %v2090_v63 = vshrl.u32 %v2408_v12, 16  ;;  %v2093_v13 = vshll.u32 %v2408_v12, 16  ;;  %v2158_v12 = vld [vmem:[%s3214_s10 + $0x2c] sm:$0x1] }
 0x19f   : > { %v2087_v0 = vsel %vm3454_vm0, %v2078_v51, %v2086_v17  ;;  %v2088_v3 = vrot.slane %v2086_v17, 4  ;;  %v1935_v4 = vadd.f32 %v1934_v55, %v1933_v54  ;;  %v1936_v8 = vsel %vm1922_vm12, %v1919_v1, 0.0  ;;  %v1835_v16 = vpop.f32.mrb[16].mxu0 }
 0x1a0   : > { %2150 = vst.msk [vmem:[%s3214_s10 + $0x18] sm:$0xf] %vm1990_vm7, %v2087_v0  ;;  %v1970_v24 = vsel %vm1922_vm12, %v1955_v14, 0.0  ;;  %v2092_v21 = vrot.slane %v2090_v63, 6  ;;  %v2095_v23 = vrot.slane %v2093_v13, 7  ;;  %v1956_v46 = vmul.f32 %v1919_v1, %v1919_v1  ;;  %v2662_v6 = vpop.f32.mrb[17].mxu0 }
 0x1a1   : > { %v1971_v19 = vadd.f32 %v1970_v24, %v1969_v9  ;;  %v1937_v29 = vadd.f32 %v1936_v8, %v1935_v4  ;;  %v2100_v30 = vshrl.u32 %v2409_v37, 16  ;;  %v2103_v27 = vshll.u32 %v2409_v37, 16  ;;  %v1838_v20 = vpop.f32.mrb[18].mxu0 }
 0x1a2   : > { %v2096_v32 = vor.u32 %v2095_v23, %v2092_v21  ;;  %v1972_v44 = vsel %vm1922_vm12, %v1956_v46, 0.0  ;;  %v2674_v35 = vadd.f32 %v1835_v16, %v3479_v33  ;;  %v2675_v61 = vadd.f32 %v1838_v20, %v1206_v43  ;;  %v2663_v57 = vpop.f32.mrb[19].mxu0 }
 0x1a3   : > { %v1973_v41 = vadd.f32 %v1972_v44, %v1971_v19  ;;  %v2102_v59 = vrot.slane %v2100_v30, 6  ;;  %v2105_v25 = vrot.slane %v2103_v27, 7 }
 0x1a4   : > { %v2097_v39 = vsel %vm3454_vm0, %v2088_v3, %v2096_v32  ;;  %v2098_v52 = vrot.slane %v2096_v32, 4  ;;  %v1920_v28 = vmul.f32 %v2674_v35, %v1905_v47  ;;  %v2410_v40 = vpack.c.bf16 %v2674_v35, %v2674_v35 }
 0x1a5   : > { %2151 = vst.msk [vmem:[%s3214_s10 + $0x1c] sm:$0xf] %vm1990_vm7, %v2097_v39  ;;  %v2106_v42 = vor.u32 %v2105_v25, %v2102_v59  ;;  %v1921_v11 = vmul.f32 %v2675_v61, %v1910_v7  ;;  %v2411_v33 = vpack.c.bf16 %v2675_v61, %v2675_v61 }
 0x1a6   : > { %v1938_v43 = vsel %vm1922_vm12, %v1920_v28, 0.0  ;;  %v1957_v15 = vmul.f32 %v1920_v28, %v1920_v28  ;;  %v2110_v49 = vshrl.u32 %v2410_v40, 16  ;;  %v2113_v50 = vshll.u32 %v2410_v40, 16 }
 0x1a7   : > { %v2107_v53 = vsel %vm3454_vm0, %v2098_v52, %v2106_v42  ;;  %v1939_v36 = vadd.f32 %v1938_v43, %v1937_v29  ;;  %v1941_v54 = vsel %vm1940_vm1, %v1921_v11, 0.0  ;;  %v1958_v56 = vmul.f32 %v1921_v11, %v1921_v11 }
 0x1a8   : > { %2152 = vst.msk [vmem:[%s3214_s10 + $0x20] sm:$0xf] %vm1990_vm7, %v2107_v53  ;;  %v1974_v45 = vsel %vm1922_vm12, %v1957_v15, 0.0  ;;  %v2112_v31 = vrot.slane %v2110_v49, 6  ;;  %v2115_v18 = vrot.slane %v2113_v50, 7  ;;  %v2120_v10 = vshrl.u32 %v2411_v33, 16 }
 0x1a9   : > { %v1975_v60 = vadd.f32 %v1974_v45, %v1973_v41  ;;  %v1942_v62 = vadd.f32 %v1941_v54, %v1939_v36  ;;  %v2123_v2 = vshll.u32 %v2411_v33, 16  ;;  %v2108_v22 = vrot.slane %v2106_v42, 4 }
 0x1aa   : > { %v2116_v9 = vor.u32 %v2115_v18, %v2112_v31  ;;  %v1976_v26 = vsel %vm1940_vm1, %v1958_v56, 0.0  ;;  %v2122_v5 = vrot.slane %v2120_v10, 6 }
 0x1ab   : > { %v1977_v38 = vadd.f32 %v1976_v26, %v1975_v60  ;;  %v2125_v48 = vrot.slane %v2123_v2, 7  ;;  %v1943_v34 = vrot.slane %v1942_v62, 4 }
 0x1ac   : > { %v2117_v51 = vsel %vm3454_vm0, %v2108_v22, %v2116_v9  ;;  %v2118_v58 = vrot.slane %v2116_v9, 4  ;;  %v2128_v37 = vrot.slane %v2122_v5, 4 }
 0x1ad   : > { %2153 = vst.msk [vmem:[%s3214_s10 + $0x24] sm:$0xf] %vm1990_vm7, %v2117_v51  ;;  %v1978_v17 = vrot.slane %v1977_v38, 4  ;;  %v2126_v1 = vor.u32 %v2125_v48, %v2122_v5  ;;  %v1944_v24 = vadd.f32 %v1943_v34, %v1942_v62 }
 0x1ae   : > { %v2159_v14 = vsel %vm2157_vm4, %v2128_v37, %v2158_v12 }
 0x1af   : > { %v2127_v55 = vsel %vm3454_vm0, %v2118_v58, %v2126_v1  ;;  %v1979_v63 = vadd.f32 %v1978_v17, %v1977_v38  ;;  %2160 = vst [vmem:[%s3214_s10 + $0x2c] sm:$0x1] %v2159_v14  ;;  %v1945_v21 = vrot.slane %v1944_v24, 2 }
 0x1b0   : > { %2154 = vst.msk [vmem:[%s3214_s10 + $0x28] sm:$0xf] %vm1990_vm7, %v2127_v55 }
 0x1b1   : > { %v1980_v13 = vrot.slane %v1979_v63, 2  ;;  %v1946_v23 = vadd.f32 %v1945_v21, %v1944_v24 }
 0x1b3   : > { %v1981_v0 = vadd.f32 %v1980_v13, %v1979_v63  ;;  %v1947_v46 = vrot.slane %v1946_v23, 1 }
 0x1b5   : > { %v1982_v3 = vrot.slane %v1981_v0, 1  ;;  %v1948_v6 = vadd.f32 %v1947_v46, %v1946_v23 }
 0x1b6   : > { %v2164_v4 = vld [vmem:[%s3214_s10 + $0x2c] sm:$0xf] }
 0x1b7   : > { %v1983_v8 = vadd.f32 %v1982_v3, %v1981_v0  ;;  %v2165_v16 = vsel %vm2163_vm6, 0, %v2164_v4 }
 0x1b8   : > { %2166 = vst [vmem:[%s3214_s10 + $0x2c] sm:$0xf] %v2165_v16 }
 0x1b9   : > { %1985 = vrot.lane.b32.xlu0 %v1983_v8, %s2885_s14 }
 0x22b   : > { %v1986_v19 = vpop.permute.xlu0 %1985 }
 0x22c   : > { %v1988_v29 = vsel %vm1922_vm12, %v1948_v6, %v1986_v19 }
 0x22d   : > { %1989 = vst [vmem:[%s349_s21] sm:$0x1] %v1988_v29 }
 0x22e PF: > { %s18_s24 = sadd.s32 1, %s2880_s24  }
 0x22f   : > { %p15_p4 = scmp.ge.s32.totalorder %s18_s24, 4  }
 0x231   :  { %17 = sbr.rel (!%p15_p4) target bundleno = 1 (0x1), region = 95 }

// kernel: fc_discriminator.11
= control target key start
LH: loop header
LB: loop body
LE: loop exit
PB: predicated region body
PF: predicated region fallthrough
CT: control target
= control target key end

     0   :  { %s2869_s15 = smov 0   ;;  %s3550_s0 = inlined_call_operand.vmem [shape: bf16[2,100,64], index: 0, kind: input, shape index: {}]   ;;  %s3551_s1 = inlined_call_operand.vmem [shape: bf16[576,64], index: 1, kind: input, shape index: {}]   ;;  %s3552_s2 = inlined_call_operand.vmem [shape: f32[100,1], index: 2, kind: input, shape index: {}]   ;;  %s3553_s3 = inlined_call_operand.vmem [shape: bf16[2,100,64], index: 3, kind: output, shape index: {0}]   ;;  %s3554_s4 = inlined_call_operand.vmem [shape: f32[2,8,128], index: 4, kind: output, shape index: {1}]  }
   0x1 LB: > { %s2125_s16 = sadd.s32 4294967295, %s2838_s15   ;;  %p2129_p0 = scmp.ge.s32.totalorder %s2838_s15, 1  ;;  %s2838_s15 = sphi %s2869_s15, %s15_s15  }
   0x2   : > { %p165_p1 = scmp.lt.s32.totalorder %s2838_s15, 3 }
   0x4   : > { %p166_p2 = pnand %p2129_p0, %p165_p1 }
   0x5   : > { %v2769_v0 = vld [vmem:[%s3551_s1 + $0x20] sm:$0xff] (!%p166_p2)   ;;  %v2840_v1 = vmov (!%p166_p2), 0.0   ;;  %v2771_v3 = vld [vmem:[%s3551_s1 + $0x28] sm:$0xff] (!%p166_p2)   ;;  %vm2841_vm0 = vmmov (!%p166_p2), 0   ;;  %p195_p3 = scmp.lt.s32.totalorder (!%p166_p2), %s2125_s16, 1  ;;  %v2773_v5 = vld [vmem:[%s3551_s1 + $0x30] sm:$0xff] (!%p166_p2)  }
   0x6   : > { %169 = sbr.rel (%p166_p2) target bundleno = 556 (0x22c), region = 32  ;;  %2344 = vmatprep.subr.bf16.mxu1 (!%p166_p2), %v2840_v1  ;;  %2456 = vmatprep.subr.bf16.mxu0 (!%p166_p2), %v2840_v1  ;;  %v2885_v2 = vld [vmem:[%s3551_s1 + $0x80] sm:$0xff] (!%p166_p2)   ;;  %v2897_v4 = vld [vmem:[%s3551_s1 + $0x88] sm:$0xff] (!%p166_p2)   ;;  %v2913_v6 = vld [vmem:[%s3551_s1 + $0x90] sm:$0xff] (!%p166_p2)   ;;  %vm262_vm1 = vsmask.f32 (!%p166_p2), 7424 }
   0x7   : > { %2345 = vmatpush3.bf16.msra.mxu1 (!%p166_p2), %v2769_v0  ;;  %2352 = vmatprep.mubr.msk.bf16.mxu1 (!%p166_p2), %vm2841_vm0, %v2840_v1  ;;  %v2775_v7 = vld [vmem:[%s3551_s1 + $0x38] sm:$0xff] (!%p166_p2)   ;;  %vm891_vm2 = vsmask.f32 (!%p166_p2), 6400  ;;  %vm326_vm3 = vcmask (!%p166_p2), 523264   ;;  %v2781_v25 = vld [vmem:[%s3551_s1] sm:$0xff] (!%p166_p2)   ;;  %v2787_v43 = vld [vmem:[%s3551_s1 + $0x8] sm:$0xff] (!%p166_p2)  }
   0x8   : > { %2457 = vmatpush3.bf16.msra.mxu0 (!%p166_p2), %v2885_v2  ;;  %2346 = vmatprep.subr.bf16.mxu1 (!%p166_p2), %v2840_v1  ;;  %v2929_v8 = vld [vmem:[%s3551_s1 + $0x98] sm:$0xff] (!%p166_p2)   ;;  %v2782_v38 = vld [vmem:[%s3551_s1 + $0xa0] sm:$0xff] (!%p166_p2)   ;;  %v2783_v45 = vld [vmem:[%s3551_s1 + $0xa8] sm:$0xff] (!%p166_p2)   ;;  %vm1075_vm4 = vcmask (!%p166_p2), 1045504   ;;  %vm538_vm5 = vcmask (!%p166_p2), 1046528   ;;  %vm1589_vm6 = vcmask (!%p166_p2), 1044480  }
   0x9   : > { %2458 = vmatprep.subr.bf16.mxu0 (!%p166_p2), %v2840_v1  ;;  %2464 = vmatprep.mubr.msk.bf16.mxu0 (!%p166_p2), %vm2841_vm0, %v2840_v1  ;;  %v2791_v55 = vld [vmem:[%s3551_s1 + $0x10] sm:$0xff] (!%p166_p2)   ;;  %v2788_v0 = vld [vmem:[%s3551_s1 + $0xb8] sm:$0xff] (!%p166_p2)   ;;  %vm1860_vm7 = vcmask (!%p166_p2), 519168   ;;  %vm1862_vm8 = vcmask (!%p166_p2), 517120   ;;  %vm1863_vm9 = vsmask.f32 (!%p166_p2), 1280 }
   0xa   : > { %v2786_v60 = vld [vmem:[%s3551_s1 + $0xb0] sm:$0xff] (!%p166_p2)   ;;  %vm1864_vm10 = vmand (!%p166_p2), %vm1862_vm8, %vm1863_vm9  ;;  %vm1401_vm11 = vsmask.f32 (!%p166_p2), 5376  ;;  %vm2010_vm12 = vcmask (!%p166_p2), 519169   ;;  %vm2011_vm13 = vsmask.f32 (!%p166_p2), 7942 }
   0xb   : > { %2347 = vmatpush3.bf16.msra.mxu1 (!%p166_p2), %v2771_v3  ;;  %v2794_v3 = vld [vmem:[%s3551_s1 + $0x18] sm:$0xff] (!%p166_p2)   ;;  %vm1898_vm14 = vsmask.f32 (!%p166_p2), 5392  ;;  %vm3466_vm15 = vmand (!%p166_p2), %vm2010_vm12, %vm2011_vm13 }
   0xc   : > { %2459 = vmatpush3.bf16.msra.mxu0 (!%p166_p2), %v2897_v4  ;;  %2348 = vmatprep.subr.bf16.mxu1 (!%p166_p2), %v2840_v1 }
   0xd   : > { %s3560_s16 = smov (!%p195_p3, %s2125_s16), 1  ;;  %2460 = vmatprep.subr.bf16.mxu0 %v2840_v1 }
   0xe   : > { %s2754_s27 = smul.u32 52, %s3560_s16  ;;  %s2132_s26 = sshll.u32 %s3560_s16, 3 }
   0xf   : > { %2349 = vmatpush3.bf16.msra.mxu1 %v2773_v5  ;;  %s208_s29 = scalar_lea.vmem %s3554_s4, %s2132_s26 }
  0x10   : > { %s2924_s8 = scalar_lea.vmem %s3550_s0, %s2754_s27  ;;  %2461 = vmatpush3.bf16.msra.mxu0 %v2913_v6  ;;  %2350 = vmatprep.subr.bf16.mxu1 %v2840_v1  ;;  %s3207_s25 = scalar_lea.vmem %s3553_s3, %s2754_s27 }
  0x11   : > { %v210_v9 = vld [vmem:[%s2924_s8] sm:$0xf]  ;;  %v2933_v10 = vld [vmem:[%s2924_s8 + $0x4] sm:$0xf]  ;;  %v2939_v12 = vld [vmem:[%s2924_s8 + $0x8] sm:$0xff]   ;;  %2462 = vmatprep.subr.bf16.mxu0 %v2840_v1 }
  0x12   : > { %v2936_v11 = vcombine.low %v210_v9, %v2933_v10  ;;  %v844_v13 = vld [vmem:[%s2924_s8 + $0x4] sm:$0xe]  ;;  %v2945_v14 = vld [vmem:[%s2924_s8 + $0x8] sm:$0xf]  ;;  %v271_v17 = vshll.u32 %v2939_v12, 16  ;;  %v2953_v19 = vld [vmem:[%s2924_s8 + $0xc] sm:$0xff]  }
  0x13   : > { %v2181_v18 = vcombine.low %v844_v13, %v2945_v14  ;;  %v275_v20 = vshrl.u32 %v2939_v12, 16  ;;  %2351 = vmatpush3.bf16.msra.mxu1 %v2775_v7  ;;  %v901_v26 = vshrl.u32 %v2953_v19, 16  ;;  %v904_v27 = vshll.u32 %v2953_v19, 16  ;;  %v2965_v33 = vld [vmem:[%s2924_s8 + $0x10] sm:$0xff]   ;;  %v2990_v49 = vld [vmem:[%s2924_s8 + $0x18] sm:$0xff]  }
  0x14   : > { %v264_v15 = vshrl.u32 %v2936_v11, 16  ;;  %v266_v16 = vshll.u32 %v2936_v11, 16  ;;  %v273_v22 = vrot.slane %v271_v17, 1  ;;  %2463 = vmatpush3.bf16.msra.mxu0 %v2929_v8  ;;  %2372 = vmatprep.subr.bf16.mxu1 %v2840_v1  ;;  %v2968_v34 = vld [vmem:[%s2924_s8 + $0x14] sm:$0xff]   ;;  %v279_v39 = vshll.u32 %v2965_v33, 16 }
  0x15   : > { %v893_v23 = vshrl.u32 %v2181_v18, 16  ;;  %v896_v24 = vshll.u32 %v2181_v18, 16  ;;  %2484 = vmatprep.subr.bf16.mxu0 %v2840_v1  ;;  %v903_v31 = vrot.slane %v901_v26, 1  ;;  %v906_v32 = vrot.slane %v904_v27, 2  ;;  %v1063_v51 = vld [vmem:[%s2924_s8 + $0x4] sm:$0xc] }
  0x16   : > { %v268_v21 = vrot.slane %v266_v16, 1  ;;  %v910_v40 = vshrl.u32 %v2968_v34, 16  ;;  %v913_v41 = vshll.u32 %v2968_v34, 16  ;;  %v277_v42 = vor.u32 %v275_v20, %v273_v22  ;;  %v3005_v56 = vld [vmem:[%s2924_s8 + $0x20] sm:$0xf]  ;;  %v2796_v26 = vld [vmem:[%s3551_s1 + $0xc8] sm:$0xff]  }
  0x17   : > { %v895_v29 = vrot.slane %v893_v23, 1  ;;  %v898_v30 = vrot.slane %v896_v24, 2  ;;  %v907_v37 = vor.u32 %v906_v32, %v903_v31  ;;  %v281_v46 = vrot.slane %v279_v39, 1  ;;  %v228_v57 = vld [vmem:[%s2924_s8 + $0x24] sm:$0xf] }
  0x18   : > { %v269_v28 = vor.u32 %v268_v21, %v264_v15  ;;  %v912_v47 = vrot.slane %v910_v40, 1  ;;  %v915_v48 = vrot.slane %v913_v41, 2  ;;  %v283_v53 = vshrl.u32 %v2965_v33, 16 }
  0x19   : > { %v899_v36 = vor.u32 %v898_v30, %v895_v29  ;;  %v282_v52 = vsel %vm262_vm1, %v277_v42, %v281_v46  ;;  %v287_v54 = vshll.u32 %v2990_v49, 16  ;;  %v2196_v58 = vcombine.low %v1063_v51, %v2945_v14  ;;  %v3071_v29 = vld [vmem:[%s2924_s8 + $0x1c] sm:$0xff]  }
  0x1a   : > { %v274_v35 = vsel %vm262_vm1, %v269_v28, %v273_v22  ;;  %v2994_v50 = vor.u32 %v915_v48, %v912_v47  ;;  %v285_v61 = vor.u32 %v283_v53, %v281_v46  ;;  %v3020_v63 = vcombine.low %v3005_v56, %v228_v57  ;;  %v3074_v30 = vld [vmem:[%s2924_s8 + $0x20] sm:$0xff]   ;;  %v1210_v57 = vld [vmem:[%s2924_s8 + $0xc] sm:$0xf] }
  0x1b   : > { %2353 = vmatmul.mubr.msk.bf16.vlgmr.msra.gmra.mrb[0].mxu1 %vm326_vm3, %v274_v35  ;;  %v908_v44 = vsel %vm891_vm2, %v899_v36, %v907_v37  ;;  %v289_v62 = vrot.slane %v287_v54, 1  ;;  %v1076_v5 = vrot.slane %v2196_v58, 2  ;;  %v1077_v7 = vrot.slane %v2953_v19, 2  ;;  %v2793_v19 = vld [vmem:[%s3551_s1 + $0xc0] sm:$0xff]  }
  0x1c   : > { %2373 = vmatpush3.bf16.msra.mxu1 %v2781_v25  ;;  %2356 = vmatprep.mubr.msk.bf16.mxu1 %vm2841_vm0, %v2840_v1  ;;  %v917_v59 = vsel %vm891_vm2, %v907_v37, %v2994_v50  ;;  %v540_v9 = vrot.slane %v2939_v12, 1  ;;  %v542_v13 = vrot.slane %v2965_v33, 1  ;;  %v291_v15 = vshrl.u32 %v2990_v49, 16  ;;  %v526_v35 = vld [vmem:[%s2924_s8] sm:$0xe]  ;;  %v3088_v37 = vld [vmem:[%s2924_s8 + $0x28] sm:$0xff]  }
  0x1d   : > { %2374 = vmatprep.subr.bf16.mxu1 %v2840_v1  ;;  %2465 = vmatmul.mubr.msk.bf16.vlgmr.msra.gmra.mrb[0].mxu0 %vm326_vm3, %v908_v44  ;;  %v290_v14 = vsel %vm262_vm1, %v285_v61, %v289_v62  ;;  %v295_v16 = vshll.u32 %v3020_v63, 16  ;;  %v1078_v18 = vsel %vm1075_vm4, %v1076_v5, %v1077_v7  ;;  %v544_v22 = vrot.slane %v2990_v49, 1  ;;  %v3112_v48 = vld [vmem:[%s2924_s8 + $0x24] sm:$0xff]   ;;  %v2805_v5 = vld [vmem:[%s3551_s1 + $0x50] sm:$0xff]  }
  0x1e   : > { %2485 = vmatpush3.bf16.msra.mxu0 %v2782_v38  ;;  %2468 = vmatprep.mubr.msk.bf16.mxu0 %vm2841_vm0, %v2840_v1  ;;  %v3040_v17 = vsel %vm538_vm5, %v540_v9, %v542_v13  ;;  %v293_v20 = vor.u32 %v291_v15, %v289_v62  ;;  %v546_v23 = vrot.slane %v3020_v63, 1  ;;  %v1079_v25 = vrot.slane %v2968_v34, 2  ;;  %v2799_v34 = vld [vmem:[%s3551_s1 + $0xd0] sm:$0xff]   ;;  %v2798_v54 = vld [vmem:[%s3551_s1 + $0x40] sm:$0xff]  }
  0x1f   : > { %2486 = vmatprep.subr.bf16.mxu0 %v2840_v1  ;;  %v297_v21 = vrot.slane %v295_v16, 1  ;;  %v3055_v24 = vsel %vm538_vm5, %v542_v13, %v544_v22  ;;  %v299_v32 = vshrl.u32 %v3020_v63, 16  ;;  %v2157_v36 = vcombine.low %v526_v35, %v2933_v10  ;;  %v2802_v10 = vld [vmem:[%s3551_s1 + $0xd8] sm:$0xff]   ;;  %v3144_v62 = vld [vmem:[%s2924_s8 + $0x10] sm:$0xff]   ;;  %v3164_v15 = vld [vmem:[%s2924_s8 + $0x24] sm:$0xff]  }
  0x20   : > { %2375 = vmatpush3.bf16.msra.mxu1 %v2787_v43  ;;  %v3066_v27 = vsel %vm538_vm5, %v544_v22, %v546_v23  ;;  %v1080_v31 = vsel %vm1075_vm4, %v1077_v7, %v1079_v25  ;;  %v1081_v38 = vrot.slane %v3071_v29, 2  ;;  %v1261_v39 = vrot.slane %v3074_v30, 2  ;;  %v2816_v43 = vld [vmem:[%s2924_s8 + $0x30] ss:$0 sps:$4 sm:$0x11]  }
  0x21   : > { %2376 = vmatprep.subr.bf16.mxu1 %v2840_v1  ;;  %v298_v28 = vsel %vm262_vm1, %v293_v20, %v297_v21  ;;  %v539_v40 = vrot.slane %v2157_v36, 1  ;;  %v1263_v41 = vrot.slane %v3088_v37, 2  ;;  %v301_v42 = vor.u32 %v299_v32, %v297_v21  ;;  %v1577_v7 = vld [vmem:[%s2924_s8 + $0x8] sm:$0x8]  ;;  %v2808_v36 = vld [vmem:[%s3551_s1 + $0x58] sm:$0xff]  }
  0x22   : > { %2487 = vmatpush3.bf16.msra.mxu0 %v2783_v45  ;;  %v1265_v46 = vrot.slane %v2816_v43, 2  ;;  %v1082_v47 = vsel %vm1075_vm4, %v1079_v25, %v1081_v38  ;;  %v1083_v53 = vrot.slane %v3112_v48, 2  ;;  %v2231_v13 = vcombine.low %v1577_v7, %v1210_v57  ;;  %v2807_v7 = vld [vmem:[%s3551_s1 + $0xe0] sm:$0xff]  }
  0x23   : > { %2357 = vmatmul.mubr.msk.bf16.gmra.mrb[4].mxu1 %vm326_vm3, %v282_v52  ;;  %2488 = vmatprep.subr.bf16.mxu0 %v2840_v1  ;;  %v3102_v44 = vsel %vm538_vm5, %v539_v40, %v540_v9  ;;  %v3107_v45 = vsel %vm1075_vm4, %v1261_v39, %v1263_v41  ;;  %v3121_v52 = vld [vmem:[%s2924_s8 + $0x2c] ss:$0 sps:$4 sm:$0x11]   ;;  %v922_v20 = vshll.u32 %v3071_v29, 16  ;;  %v720_v25 = vrot.slane %v3164_v15, 1 }
  0x24   : > { %2360 = vmatprep.mubr.msk.bf16.mxu1 %vm2841_vm0, %v2840_v1  ;;  %2377 = vmatpush3.bf16.msra.mxu1 %v2791_v55  ;;  %v3115_v51 = vsel %vm1075_vm4, %v1263_v41, %v1265_v46  ;;  %v1209_v55 = vld [vmem:[%s2924_s8 + $0x8] sm:$0xc]  ;;  %v1084_v58 = vsel %vm1075_vm4, %v1081_v38, %v1083_v53  ;;  %v1590_v22 = vrot.slane %v2231_v13, 3  ;;  %v1257_v35 = vrot.slane %v3144_v62, 2 }
  0x25   : > { %2469 = vmatmul.mubr.msk.bf16.gmra.mrb[4].mxu0 %vm326_vm3, %v917_v59  ;;  %2378 = vmatprep.subr.bf16.mxu1 %v2840_v1  ;;  %v1085_v59 = vrot.slane %v3121_v52, 2  ;;  %v3141_v61 = vcombine.low %v1209_v55, %v1210_v57  ;;  %v928_v40 = vshrl.u32 %v3112_v48, 16  ;;  %v1723_v46 = vld [vmem:[%s3552_s2 + $0xb] sm:$0xff]  ;;  %v2842_v57 = vmov 0  }
  0x26   : > { %2489 = vmatpush3.bf16.msra.mxu0 %v2786_v60  ;;  %2492 = vmatprep.mubr.msk.bf16.mxu0 %vm2841_vm0, %v2840_v1  ;;  %v2801_v60 = vld [vmem:[%s3551_s1 + $0x48] sm:$0xff]   ;;  %1861 = vst.msk [vmem:[%s3207_s25] sm:$0xf] %vm1860_vm7, %v2842_v57  ;;  %vm1810_vm1 = vcmask 521216  }
  0x27   : > { %2490 = vmatprep.subr.bf16.mxu0 %v2840_v1  ;;  %v1256_v9 = vrot.slane %v3141_v61, 2  ;;  %2767 = vset.pattern.permute.xlu0 %v2842_v57  ;;  %2038 = vst.msk [vmem:[%s3207_s25 + $0x30] sm:$0x3] %vm1862_vm8, %v2842_v57 }
  0x28   : > { %2379 = vmatpush3.bf16.msra.mxu1 %v2794_v3  ;;  %v1086_v3 = vsel %vm1075_vm4, %v1083_v53, %v1085_v59  ;;  %v937_v53 = vshll.u32 %v3121_v52, 16  ;;  %v1725_v52 = vld [vmem:[%s3552_s2 + $0x1b] sm:$0xff]  ;;  %1735 = vperm.xlu0 %2767, %v1723_v46   ;;  %v1414_v46 = vshll.u32 %v3144_v62, 16 }
  0x29   : > { %2400 = vmatprep.subr.bf16.mxu1 %v2840_v1  ;;  %2768 = vset.pattern.permute.xlu1 %v2842_v57 }
  0x2a   : > { %2491 = vmatpush3.bf16.msra.mxu0 %v2788_v0  ;;  %v3152_v0 = vld [vmem:[%s2924_s8 + $0x1c] sm:$0xff]   ;;  %v939_v59 = vrot.slane %v937_v53, 2  ;;  %1745 = vperm.xlu1 %2768, %v1725_v52   ;;  %v1416_v57 = vrot.slane %v1414_v46, 3 }
  0x2b   : > { %2361 = vmatmul.mubr.msk.bf16.gmra.mrb[8].mxu1 %vm326_vm3, %v290_v14  ;;  %2512 = vmatprep.subr.bf16.mxu0 %v2840_v1  ;;  %v1591_v14 = vrot.slane %v3144_v62, 3  ;;  %v718_v21 = vrot.slane %v3152_v0, 1 }
  0x2c   : > { %2364 = vmatprep.mubr.msk.bf16.mxu1 %vm2841_vm0, %v2840_v1 }
  0x2d   : > { %2493 = vmatmul.mubr.msk.bf16.vlgmr.msra.gmra.mrb[0].mxu0 %vm326_vm3, %v1078_v18  ;;  %v1595_v18 = vrot.slane %v3074_v30, 3  ;;  %v3199_v38 = vsel %vm538_vm5, %v718_v21, %v720_v25 }
  0x2e   : > { %2496 = vmatprep.mubr.msk.bf16.mxu0 %vm2841_vm0, %v2840_v1  ;;  %2513 = vmatpush3.bf16.msra.mxu0 %v2793_v19  ;;  %v919_v19 = vshrl.u32 %v3071_v29, 16  ;;  %v1597_v29 = vrot.slane %v3088_v37, 3 }
  0x2f   : > { %2514 = vmatprep.subr.bf16.mxu0 %v2840_v1 }
  0x30   : > { %v921_v32 = vrot.slane %v919_v19, 1  ;;  %v1728_v19 = vld [vmem:[%s3552_s2 + $0x33] sm:$0xff] }
  0x32   : > { %2515 = vmatpush3.bf16.msra.mxu0 %v2796_v26 }
  0x33   : > { %2365 = vmatmul.mubr.msk.bf16.gmra.mrb[12].mxu1 %vm326_vm3, %v298_v28  ;;  %2516 = vmatprep.subr.bf16.mxu0 %v2840_v1  ;;  %v3179_v28 = vld [vmem:[%s2924_s8 + $0x30] ss:$0 sps:$4 sm:$0x33]  }
  0x34   : > { %2368 = vmatprep.mubr.msk.bf16.mxu1 %vm2841_vm0, %v2840_v1  ;;  %v1599_v43 = vrot.slane %v3179_v28, 3  ;;  %v1447_v63 = vshrl.u32 %v3179_v28, 16 }
  0x35   : > { %2497 = vmatmul.mubr.msk.bf16.gmra.mrb[4].mxu0 %vm326_vm3, %v1080_v31 }
  0x36   : > { %2500 = vmatprep.mubr.msk.bf16.mxu0 %vm2841_vm0, %v2840_v1  ;;  %2517 = vmatpush3.bf16.msra.mxu0 %v2799_v34  ;;  %v924_v34 = vrot.slane %v922_v20, 2  ;;  %v3227_v55 = vsel %vm1589_vm6, %v1597_v29, %v1599_v43  ;;  %v1729_v20 = vld [vmem:[%s3552_s2 + $0x3b] sm:$0xff]  ;;  %v1411_v43 = vshrl.u32 %v3144_v62, 16 }
  0x37   : > { %2518 = vmatprep.subr.bf16.mxu0 %v2840_v1 }
  0x38   : > { %v925_v41 = vor.u32 %v924_v34, %v921_v32  ;;  %v2815_v32 = vld [vmem:[%s3551_s1 + $0xf0] sm:$0xff]   ;;  %v1730_v34 = vld [vmem:[%s3552_s2 + $0x43] sm:$0xff] }
  0x3a   : > { %2519 = vmatpush3.bf16.msra.mxu0 %v2802_v10  ;;  %v931_v10 = vshll.u32 %v3112_v48, 16 }
  0x3b   : > { %2369 = vmatmul.mubr.msk.bf16.gmra.mrb[16].mxu1 %vm326_vm3, %v301_v42  ;;  %2540 = vmatprep.subr.bf16.mxu0 %v2840_v1  ;;  %v3211_v42 = vsel %vm1589_vm6, %v1595_v18, %v1597_v29  ;;  %v219_v29 = vld [vmem:[%s2924_s8 + $0x24] sm:$0x7] }
  0x3c   : > { %2380 = vmatprep.mubr.msk.bf16.mxu1 %vm2841_vm0, %v2840_v1  ;;  %v933_v48 = vrot.slane %v931_v10, 2  ;;  %v1403_v10 = vshrl.u32 %v3141_v61, 16 }
  0x3d   : > { %2501 = vmatmul.mubr.msk.bf16.gmra.mrb[8].mxu0 %vm326_vm3, %v1082_v47  ;;  %v930_v47 = vrot.slane %v928_v40, 1  ;;  %v1732_v40 = vld [vmem:[%s3552_s2 + $0x53] sm:$0x3f] }
  0x3e   : > { %2504 = vmatprep.mubr.msk.bf16.mxu0 %vm2841_vm0, %v2840_v1 }
  0x43   : > { %2381 = vmatmul.mubr.msk.bf16.vlgmr.msra.gmra.mrb[0].mxu1 %vm326_vm3, %v2936_v11  ;;  %v3148_v11 = vld [vmem:[%s2924_s8 + $0x18] sm:$0xff]  }
  0x44   : > { %2401 = vmatpush3.bf16.msra.mxu1 %v2798_v54  ;;  %2384 = vmatprep.mubr.msk.bf16.mxu1 %vm2841_vm0, %v2840_v1  ;;  %v1593_v16 = vrot.slane %v3148_v11, 3  ;;  %v3224_v54 = vsel %vm891_vm2, %v2994_v50, %v925_v41  ;;  %v934_v50 = vor.u32 %v933_v48, %v930_v47  ;;  %v2819_v47 = vld [vmem:[%s3551_s1 + $0x70] sm:$0xff]   ;;  %v1413_v48 = vrot.slane %v1411_v43, 2 }
  0x45   : > { %2402 = vmatprep.subr.bf16.mxu1 %v2840_v1  ;;  %2505 = vmatmul.mubr.msk.bf16.gmra.mrb[12].mxu0 %vm326_vm3, %v1084_v58  ;;  %v1865_v58 = vld [vmem:[%s3207_s25 + $0x4] sm:$0x3]  ;;  %v1423_v52 = vshll.u32 %v3148_v11, 16 }
  0x46   : > { %2508 = vmatprep.mubr.msk.bf16.mxu0 %vm2841_vm0, %v2840_v1  ;;  %v3174_v26 = vsel %vm1589_vm6, %v1591_v14, %v1593_v16  ;;  %v3182_v31 = vsel %vm1589_vm6, %v1593_v16, %v1595_v18  ;;  %v3248_v13 = vsel %vm891_vm2, %v925_v41, %v934_v50  ;;  %v1726_v16 = vld [vmem:[%s3552_s2 + $0x23] sm:$0xff]  ;;  %v1417_v62 = vor.u32 %v1416_v57, %v1413_v48 }
  0x47   : > { %1750 = vperm.xlu1 %2768, %v1726_v16   ;;  %v2811_v18 = vld [vmem:[%s3551_s1 + $0xe8] sm:$0xff]  }
  0x48   : > { %2403 = vmatpush3.bf16.msra.mxu1 %v2801_v60  ;;  %v1724_v60 = vld [vmem:[%s3552_s2 + $0x13] sm:$0xff] }
  0x49   : > { %2404 = vmatprep.subr.bf16.mxu1 %v2840_v1  ;;  %1740 = vperm.xlu0 %2767, %v1724_v60   ;;  %v2820_v60 = vld [vmem:[%s3551_s1 + $0x100] sm:$0xff]  }
  0x4b   : > { %2385 = vmatmul.mubr.msk.bf16.gmra.mrb[4].mxu1 %vm326_vm3, %v2939_v12  ;;  %v3192_v12 = vsel %vm1589_vm6, %v1590_v22, %v1591_v14  ;;  %v3251_v14 = vsel %vm891_vm2, %v934_v50, %v939_v59  ;;  %1760 = vperm.xlu1 %2768, %v1728_v19   ;;  %v2828_v19 = vld [vmem:[%s3551_s1 + $0x118] sm:$0xff]   ;;  %vm2025_vm2 = vcmask 516096   ;;  %vm2032_vm6 = vsmask.f32 7938 }
  0x4c   : > { %2388 = vmatprep.mubr.msk.bf16.mxu1 %vm2841_vm0, %v2840_v1  ;;  %2405 = vmatpush3.bf16.msra.mxu1 %v2805_v5  ;;  %v1258_v5 = vsel %vm1075_vm4, %v1256_v9, %v1257_v35  ;;  %v1259_v9 = vrot.slane %v3148_v11, 2  ;;  %vm2033_vm8 = vmand %vm1860_vm7, %vm2032_vm6 }
  0x4d   : > { %2406 = vmatprep.subr.bf16.mxu1 %v2840_v1  ;;  %2509 = vmatmul.mubr.msk.bf16.gmra.mrb[16].mxu0 %vm326_vm3, %v1086_v3  ;;  %v1866_v3 = vsel %vm1864_vm10, 0, %v1865_v58  ;;  %v1420_v58 = vshrl.u32 %v3148_v11, 16 }
  0x4e   : > { %2520 = vmatprep.mubr.msk.bf16.mxu0 %vm2841_vm0, %v2840_v1  ;;  %1867 = vst [vmem:[%s3207_s25 + $0x4] sm:$0x3] %v1866_v3  ;;  %v1260_v22 = vsel %vm1075_vm4, %v1257_v35, %v1259_v9  ;;  %v2147_v35 = vcombine.low %v3005_v56, %v219_v29  ;;  %v1262_v41 = vsel %vm1075_vm4, %v1259_v9, %v1261_v39  ;;  %v2814_v56 = vld [vmem:[%s3551_s1 + $0x60] sm:$0xff]   ;;  %v2817_v39 = vld [vmem:[%s3551_s1 + $0x68] sm:$0xff]   ;;  %v1432_v3 = vshll.u32 %v3074_v30, 16 }
  0x4f   : > { %1770 = vperm.xlu1 %2768, %v1730_v34   ;;  %v1422_v50 = vrot.slane %v1420_v58, 2  ;;  %v1438_v9 = vshrl.u32 %v3088_v37, 16  ;;  %vm2026_vm4 = vsmask.f32 256 }
  0x50   : > { %2407 = vmatpush3.bf16.msra.mxu1 %v2808_v36  ;;  %v2818_v36 = vld [vmem:[%s3551_s1 + $0xf8] sm:$0xff]  }
  0x51   : > { %2428 = vmatprep.subr.bf16.mxu1 %v2840_v1  ;;  %v1440_v34 = vrot.slane %v1438_v9, 2 }
  0x53   : > { %2389 = vmatmul.mubr.msk.bf16.gmra.mrb[8].mxu1 %vm326_vm3, %v2965_v33  ;;  %v1727_v33 = vld [vmem:[%s3552_s2 + $0x2b] sm:$0xff]  ;;  %1780 = vperm.xlu1 %2768, %v1732_v40   ;;  %v2826_v40 = vld [vmem:[%s2924_s8 + $0x14] sm:$0xff]  }
  0x54   : > { %2392 = vmatprep.mubr.msk.bf16.mxu1 %vm2841_vm0, %v2840_v1  ;;  %1755 = vperm.xlu0 %2767, %v1727_v33   ;;  %v1434_v33 = vrot.slane %v1432_v3, 3 }
  0x55   : > { %2521 = vmatmul.mubr.msk.bf16.vlgmr.msra.gmra.mrb[0].mxu0 %vm326_vm3, %v1258_v5  ;;  %v2822_v5 = vld [vmem:[%s3551_s1 + $0x108] sm:$0xff]  }
  0x56   : > { %2524 = vmatprep.mubr.msk.bf16.mxu0 %vm2841_vm0, %v2840_v1  ;;  %2541 = vmatpush3.bf16.msra.mxu0 %v2807_v7 }
  0x57   : > { %2542 = vmatprep.subr.bf16.mxu0 %v2840_v1 }
  0x58   : > { %1765 = vperm.xlu0 %2767, %v1729_v20   ;;  %v2823_v20 = vld [vmem:[%s2924_s8 + $0x4] sm:$0xfe]  }
  0x5a   : > { %2543 = vmatpush3.bf16.msra.mxu0 %v2811_v18  ;;  %v1441_v18 = vshll.u32 %v3088_v37, 16  ;;  %v713_v37 = vrot.slane %v2823_v20, 1 }
  0x5b   : > { %2393 = vmatmul.mubr.msk.bf16.gmra.mrb[12].mxu1 %vm326_vm3, %v2990_v49  ;;  %2544 = vmatprep.subr.bf16.mxu0 %v2840_v1  ;;  %v1731_v49 = vld [vmem:[%s3552_s2 + $0x4b] sm:$0xff] }
  0x5c   : > { %2396 = vmatprep.mubr.msk.bf16.mxu1 %vm2841_vm0, %v2840_v1  ;;  %1775 = vperm.xlu0 %2767, %v1731_v49   ;;  %v1443_v29 = vrot.slane %v1441_v18, 3 }
  0x5d   : > { %2525 = vmatmul.mubr.msk.bf16.gmra.mrb[4].mxu0 %vm326_vm3, %v1260_v22  ;;  %v2824_v22 = vld [vmem:[%s2924_s8 + $0xc] sm:$0xff]   ;;  %s2843_s8 = smov 64  }
  0x5e   : > { %2528 = vmatprep.mubr.msk.bf16.mxu0 %vm2841_vm0, %v2840_v1  ;;  %2545 = vmatpush3.bf16.msra.mxu0 %v2815_v32  ;;  %v714_v49 = vrot.slane %v2824_v22, 1 }
  0x5f   : > { %2546 = vmatprep.subr.bf16.mxu0 %v2840_v1 }
  0x62   : > { %2547 = vmatpush3.bf16.msra.mxu0 %v2818_v36  ;;  %v715_v36 = vsel %vm538_vm5, %v713_v37, %v714_v49 }
  0x63   : > { %2397 = vmatmul.mubr.msk.bf16.gmra.mrb[16].mxu1 %vm326_vm3, %v2147_v35  ;;  %2568 = vmatprep.subr.bf16.mxu0 %v2840_v1  ;;  %v1444_v35 = vor.u32 %v1443_v29, %v1440_v34 }
  0x64   : > { %2408 = vmatprep.mubr.msk.bf16.mxu1 %vm2841_vm0, %v2840_v1 }
  0x65   : > { %2529 = vmatmul.mubr.msk.bf16.gmra.mrb[8].mxu0 %vm326_vm3, %v1262_v41 }
  0x66   : > { %2532 = vmatprep.mubr.msk.bf16.mxu0 %vm2841_vm0, %v2840_v1 }
  0x6b   : > { %2409 = vmatmul.mubr.msk.bf16.vlgmr.msra.gmra.mrb[0].mxu1 %vm326_vm3, %v3102_v44  ;;  %v1406_v44 = vshll.u32 %v3141_v61, 16  ;;  %v2821_v61 = vld [vmem:[%s3551_s1 + $0x78] sm:$0xff]  }
  0x6c   : > { %2429 = vmatpush3.bf16.msra.mxu1 %v2814_v56  ;;  %2412 = vmatprep.mubr.msk.bf16.mxu1 %vm2841_vm0, %v2840_v1  ;;  %v1449_v56 = vrot.slane %v1447_v63, 2 }
  0x6d   : > { %2430 = vmatprep.subr.bf16.mxu1 %v2840_v1  ;;  %2533 = vmatmul.mubr.msk.bf16.gmra.mrb[12].mxu0 %vm326_vm3, %v3107_v45  ;;  %v1405_v45 = vrot.slane %v1403_v10, 2  ;;  %v1408_v53 = vrot.slane %v1406_v44, 3  ;;  %v716_v10 = vrot.slane %v2826_v40, 1 }
  0x6e   : > { %2536 = vmatprep.mubr.msk.bf16.mxu0 %vm2841_vm0, %v2840_v1 }
  0x6f   : > { %v717_v44 = vsel %vm538_vm5, %v714_v49, %v716_v10 }
  0x70   : > { %2431 = vmatpush3.bf16.msra.mxu1 %v2817_v39 }
  0x71   : > { %2432 = vmatprep.subr.bf16.mxu1 %v2840_v1 }
  0x73   : > { %2413 = vmatmul.mubr.msk.bf16.gmra.mrb[4].mxu1 %vm326_vm3, %v3040_v17  ;;  %v1409_v17 = vor.u32 %v1408_v53, %v1405_v45 }
  0x74   : > { %2416 = vmatprep.mubr.msk.bf16.mxu1 %vm2841_vm0, %v2840_v1  ;;  %2433 = vmatpush3.bf16.msra.mxu1 %v2819_v47 }
  0x75   : > { %2434 = vmatprep.subr.bf16.mxu1 %v2840_v1  ;;  %2537 = vmatmul.mubr.msk.bf16.gmra.mrb[16].mxu0 %vm326_vm3, %v3115_v51  ;;  %v1418_v59 = vsel %vm1401_vm11, %v1409_v17, %v1417_v62  ;;  %v1425_v51 = vrot.slane %v1423_v52, 3 }
  0x76   : > { %2548 = vmatprep.mubr.msk.bf16.mxu0 %vm2841_vm0, %v2840_v1 }
  0x77   : > { %v1426_v11 = vor.u32 %v1425_v51, %v1422_v50  ;;  %v2013_v50 = vld [vmem:[%s3207_s25 + $0x4] sm:$0xe] }
  0x78   : > { %2435 = vmatpush3.bf16.msra.mxu1 %v2821_v61 }
  0x79   : > { %2596 = vmatprep.subr.bf16.mxu1 %v2840_v1  ;;  %v1427_v7 = vsel %vm1401_vm11, %v1417_v62, %v1426_v11 }
  0x7b   : > { %2417 = vmatmul.mubr.msk.bf16.gmra.mrb[8].mxu1 %vm326_vm3, %v3055_v24  ;;  %v1429_v24 = vshrl.u32 %v3074_v30, 16  ;;  %v2825_v30 = vld [vmem:[%s3551_s1 + $0x110] sm:$0xff]  }
  0x7c   : > { %2420 = vmatprep.mubr.msk.bf16.mxu1 %vm2841_vm0, %v2840_v1 }
  0x7d   : > { %2549 = vmatmul.mubr.msk.bf16.vlgmr.msra.gmra.mrb[0].mxu0 %vm326_vm3, %v1418_v59  ;;  %v1431_v16 = vrot.slane %v1429_v24, 2 }
  0x7e   : > { %2552 = vmatprep.mubr.msk.bf16.mxu0 %vm2841_vm0, %v2840_v1  ;;  %2569 = vmatpush3.bf16.msra.mxu0 %v2820_v60 }
  0x7f   : > { %2570 = vmatprep.subr.bf16.mxu0 %v2840_v1 }
  0x82   : > { %2571 = vmatpush3.bf16.msra.mxu0 %v2822_v5 }
  0x83   : > { %2421 = vmatmul.mubr.msk.bf16.gmra.mrb[12].mxu1 %vm326_vm3, %v3066_v27  ;;  %2572 = vmatprep.subr.bf16.mxu0 %v2840_v1  ;;  %v1435_v27 = vor.u32 %v1434_v33, %v1431_v16 }
  0x84   : > { %2424 = vmatprep.mubr.msk.bf16.mxu1 %vm2841_vm0, %v2840_v1 }
  0x85   : > { %2553 = vmatmul.mubr.msk.bf16.gmra.mrb[4].mxu0 %vm326_vm3, %v1427_v7  ;;  %v1436_v32 = vsel %vm1401_vm11, %v1426_v11, %v1435_v27  ;;  %v1445_v41 = vsel %vm1401_vm11, %v1435_v27, %v1444_v35 }
  0x86   : > { %2556 = vmatprep.mubr.msk.bf16.mxu0 %vm2841_vm0, %v2840_v1  ;;  %2573 = vmatpush3.bf16.msra.mxu0 %v2825_v30 }
  0x87   : > { %2574 = vmatprep.subr.bf16.mxu0 %v2840_v1 }
  0x8a   : > { %2575 = vmatpush3.bf16.msra.mxu0 %v2828_v19 }
  0x8b   : > { %2425 = vmatmul.mubr.msk.bf16.gmra.mrb[16].mxu1 %vm326_vm3, %v546_v23  ;;  %v1450_v23 = vshll.u32 %v3179_v28, 16 }
  0x8c   : > { %2436 = vmatprep.mubr.msk.bf16.mxu1 %vm2841_vm0, %v2840_v1 }
  0x8d   : > { %2557 = vmatmul.mubr.msk.bf16.gmra.mrb[8].mxu0 %vm326_vm3, %v1436_v32  ;;  %v1452_v39 = vrot.slane %v1450_v23, 3 }
  0x8e   : > { %2560 = vmatprep.mubr.msk.bf16.mxu0 %vm2841_vm0, %v2840_v1 }
  0x8f   : > { %v1453_v28 = vor.u32 %v1452_v39, %v1449_v56 }
  0x93   : > { %2437 = vmatmul.mubr.msk.bf16.vlgmr.msra.gmra.mrb[0].mxu1 %vm326_vm3, %v715_v36 }
  0x94   : > { %2600 = vmatpush3.bf16.msra.mxu1 %v2885_v2  ;;  %2440 = vmatprep.mubr.msk.bf16.mxu1 %vm2841_vm0, %v2840_v1  ;;  %v1454_v2 = vsel %vm1401_vm11, %v1444_v35, %v1453_v28 }
  0x95   : > { %2597 = vmatprep.subr.bf16.mxu1 %v2840_v1  ;;  %2561 = vmatmul.mubr.msk.bf16.gmra.mrb[12].mxu0 %vm326_vm3, %v1445_v41 }
  0x96   : > { %2564 = vmatprep.mubr.msk.bf16.mxu0 %vm2841_vm0, %v2840_v1 }
  0x98   : > { %2601 = vmatpush3.bf16.msra.mxu1 %v2897_v4  ;;  %v719_v4 = vsel %vm538_vm5, %v716_v10, %v718_v21  ;;  %vm2027_vm5 = vmand %vm2025_vm2, %vm2026_vm4 }
  0x99   : > { %2598 = vmatprep.subr.bf16.mxu1 %v2840_v1 }
  0x9b   : > { %2441 = vmatmul.mubr.msk.bf16.gmra.mrb[4].mxu1 %vm326_vm3, %v717_v44 }
  0x9c   : > { %2444 = vmatprep.mubr.msk.bf16.mxu1 %vm2841_vm0, %v2840_v1  ;;  %2602 = vmatpush3.bf16.msra.mxu1 %v2913_v6 }
  0x9d   : > { %2599 = vmatprep.subr.bf16.mxu1 %v2840_v1  ;;  %2565 = vmatmul.mubr.msk.bf16.gmra.mrb[16].mxu0 %vm326_vm3, %v1454_v2 }
  0x9e   : > { %2576 = vmatprep.mubr.msk.bf16.mxu0 %vm2841_vm0, %v2840_v1 }
  0xa0   : > { %2603 = vmatpush3.bf16.msra.mxu1 %v2929_v8 }
  0xa3   : > { %2445 = vmatmul.mubr.msk.bf16.gmra.mrb[8].mxu1 %vm326_vm3, %v719_v4 }
  0xa4   : > { %2448 = vmatprep.mubr.msk.bf16.mxu1 %vm2841_vm0, %v2840_v1 }
  0xa5   : > { %2577 = vmatmul.mubr.msk.bf16.vlgmr.msra.gmra.mrb[0].mxu0 %vm326_vm3, %v3192_v12 }
  0xa6   : > { %2580 = vmatprep.mubr.msk.bf16.mxu0 %vm2841_vm0, %v2840_v1 }
  0xa7   : > { %v1736_v12 = vpop.permute.xlu0 %1735 }
  0xa9   : > { %v1746_v61 = vpop.permute.xlu1 %1745 }
  0xab   : > { %2449 = vmatmul.mubr.msk.bf16.gmra.mrb[12].mxu1 %vm326_vm3, %v3199_v38 }
  0xac   : > { %2452 = vmatprep.mubr.msk.bf16.mxu1 %vm2841_vm0, %v2840_v1 }
  0xad   : > { %2581 = vmatmul.mubr.msk.bf16.gmra.mrb[4].mxu0 %vm326_vm3, %v3174_v26 }
  0xae   : > { %2584 = vmatprep.mubr.msk.bf16.mxu0 %vm2841_vm0, %v2840_v1 }
  0xb3   : > { %2453 = vmatmul.mubr.msk.bf16.gmra.mrb[16].mxu1 %vm326_vm3, %v720_v25 }
  0xb4   : > { %2472 = vmatprep.mubr.msk.bf16.mxu1 %vm2841_vm0, %v2840_v1 }
  0xb5   : > { %2585 = vmatmul.mubr.msk.bf16.gmra.mrb[8].mxu0 %vm326_vm3, %v3182_v31 }
  0xb6   : > { %2588 = vmatprep.mubr.msk.bf16.mxu0 %vm2841_vm0, %v2840_v1 }
  0xbb   : > { %2473 = vmatmul.mubr.msk.bf16.vlgmr.msra.gmra.mrb[8].mxu1 %vm326_vm3, %v3224_v54 }
  0xbc   : > { %2476 = vmatprep.mubr.msk.bf16.mxu1 %vm2841_vm0, %v2840_v1 }
  0xbd   : > { %2589 = vmatmul.mubr.msk.bf16.gmra.mrb[12].mxu0 %vm326_vm3, %v3211_v42 }
  0xbe   : > { %2592 = vmatprep.mubr.msk.bf16.mxu0 %vm2841_vm0, %v2840_v1 }
  0xc3   : > { %2477 = vmatmul.mubr.msk.bf16.gmra.mrb[12].mxu1 %vm326_vm3, %v3248_v13 }
  0xc4   : > { %2480 = vmatprep.mubr.msk.bf16.mxu1 %vm2841_vm0, %v2840_v1  ;;  %vm3475_vm0 = vmor %vm1863_vm9, %vm1898_vm14 }
  0xc5   : > { %2593 = vmatmul.mubr.msk.bf16.gmra.mrb[16].mxu0 %vm326_vm3, %v3227_v55 }
  0xc6   : > { %v1751_v63 = vpop.permute.xlu1 %1750 }
  0xc8   : > { %v1741_v47 = vpop.permute.xlu0 %1740 }
  0xcb   : > { %2481 = vmatmul.mubr.msk.bf16.gmra.mrb[16].mxu1 %vm326_vm3, %v3251_v14 }
 0x166   : > { %v795_v6 = vpop.f32.mrb[0].mxu1 }
 0x167   : > { %v2438_v8 = vpop.f32.mrb[1].mxu1 }
 0x168   : > { %v798_v0 = vpop.f32.mrb[2].mxu1 }
 0x169   : > { %v2439_v15 = vpop.f32.mrb[3].mxu1 }
 0x16e   : > { %v803_v21 = vpop.f32.mrb[4].mxu1 }
 0x16f   : > { %v2442_v25 = vpop.f32.mrb[5].mxu1 }
 0x170   : > { %v806_v26 = vpop.f32.mrb[6].mxu1 }
 0x171   : > { %v2443_v31 = vpop.f32.mrb[7].mxu1 }
 0x178   : > { %v1674_v38 = vpop.f32.mrb[0].mxu0 }
 0x179   : > { %v2604_v42 = vadd.f32 %v1674_v38, %v795_v6  ;;  %v2578_v54 = vpop.f32.mrb[1].mxu0 }
 0x17a   : > { %v1677_v13 = vpop.f32.mrb[2].mxu0 }
 0x17b   : > { %v1783_v1 = vmul.f32 %v2604_v42, %v1736_v12  ;;  %v2253_v43 = vpack.c.bf16 %v2604_v42, %v2604_v42  ;;  %v2605_v46 = vadd.f32 %v1677_v13, %v798_v0  ;;  %v2579_v55 = vpop.f32.mrb[3].mxu0 }
 0x17d   : > { %v1901_v14 = vshrl.u32 %v2253_v43, 16  ;;  %v1904_v45 = vshll.u32 %v2253_v43, 16  ;;  %v2254_v53 = vpack.c.bf16 %v2605_v46, %v2605_v46  ;;  %v1819_v48 = vmul.f32 %v1783_v1, %v1783_v1 }
 0x17e   : > { %v1784_v57 = vmul.f32 %v2605_v46, %v1741_v47  ;;  %v1793_v51 = vsel %vm326_vm3, %v1783_v1, 0.0 }
 0x17f   : > { %v1903_v17 = vrot.slane %v1901_v14, 6  ;;  %v1906_v62 = vrot.slane %v1904_v45, 7  ;;  %v1910_v58 = vshrl.u32 %v2254_v53, 16  ;;  %v1913_v52 = vshll.u32 %v2254_v53, 16 }
 0x180   : > { %v1794_v60 = vsel %vm326_vm3, %v1784_v57, 0.0  ;;  %v1820_v11 = vmul.f32 %v1784_v57, %v1784_v57  ;;  %v1682_v24 = vpop.f32.mrb[4].mxu0  ;;  %v1829_v27 = vsel %vm326_vm3, %v1819_v48, 0.0 }
 0x181   : > { %v1907_v3 = vor.u32 %v1906_v62, %v1903_v17  ;;  %v1912_v5 = vrot.slane %v1910_v58, 6  ;;  %v1915_v7 = vrot.slane %v1913_v52, 7  ;;  %v1795_v16 = vadd.f32 %v1794_v60, %v1793_v51  ;;  %v2582_v33 = vpop.f32.mrb[5].mxu0  ;;  %v1761_v60 = vpop.permute.xlu1 %1760 }
 0x182   : > { %v1830_v9 = vsel %vm326_vm3, %v1820_v11, 0.0  ;;  %v2606_v18 = vadd.f32 %v1682_v24, %v803_v21  ;;  %v1685_v19 = vpop.f32.mrb[6].mxu0 }
 0x183   : > { %v1908_v20 = vrot.slane %v1907_v3, 4  ;;  %v2014_v22 = vsel %vm3466_vm15, %v1907_v3, %v2013_v50  ;;  %v1916_v32 = vor.u32 %v1915_v7, %v1912_v5  ;;  %v1831_v34 = vadd.f32 %v1830_v9, %v1829_v27  ;;  %v2583_v29 = vpop.f32.mrb[7].mxu0 }
 0x184   : > { %2015 = vst [vmem:[%s3207_s25 + $0x4] sm:$0xe] %v2014_v22  ;;  %v1785_v37 = vmul.f32 %v2606_v18, %v1746_v61  ;;  %v2255_v49 = vpack.c.bf16 %v2606_v18, %v2606_v18  ;;  %v2607_v35 = vadd.f32 %v1685_v19, %v806_v26  ;;  %v1756_v61 = vpop.permute.xlu0 %1755 }
 0x185   : > { %v1917_v23 = vsel %vm3475_vm0, %v1908_v20, %v1916_v32  ;;  %v1918_v26 = vrot.slane %v1916_v32, 4 }
 0x186   : > { %2016 = vst.msk [vmem:[%s3207_s25 + $0x8] sm:$0xf] %vm1860_vm7, %v1917_v23  ;;  %v1796_v36 = vsel %vm326_vm3, %v1785_v37, 0.0  ;;  %v1821_v40 = vmul.f32 %v1785_v37, %v1785_v37  ;;  %v1920_v41 = vshrl.u32 %v2255_v49, 16  ;;  %v1923_v56 = vshll.u32 %v2255_v49, 16 }
 0x187   : > { %v2256_v39 = vpack.c.bf16 %v2607_v35, %v2607_v35  ;;  %v1786_v10 = vmul.f32 %v2607_v35, %v1751_v63  ;;  %v1797_v28 = vadd.f32 %v1796_v36, %v1795_v16 }
 0x188   : > { %v1832_v44 = vsel %vm326_vm3, %v1821_v40, 0.0  ;;  %v1922_v2 = vrot.slane %v1920_v41, 6  ;;  %v1925_v4 = vrot.slane %v1923_v56, 7  ;;  %v1690_v6 = vpop.f32.mrb[8].mxu0  ;;  %v1766_v41 = vpop.permute.xlu0 %1765 }
 0x189   : > { %v1930_v8 = vshrl.u32 %v2256_v39, 16  ;;  %v1933_v0 = vshll.u32 %v2256_v39, 16  ;;  %v1798_v15 = vsel %vm326_vm3, %v1786_v10, 0.0  ;;  %v1822_v21 = vmul.f32 %v1786_v10, %v1786_v10  ;;  %v2586_v25 = vpop.f32.mrb[9].mxu0 }
 0x18a   : > { %v1926_v31 = vor.u32 %v1925_v4, %v1922_v2  ;;  %v1799_v12 = vadd.f32 %v1798_v15, %v1797_v28  ;;  %v1833_v38 = vadd.f32 %v1832_v44, %v1831_v34  ;;  %v1693_v42 = vpop.f32.mrb[10].mxu0 }
 0x18b   : > { %v1932_v54 = vrot.slane %v1930_v8, 6  ;;  %v1935_v13 = vrot.slane %v1933_v0, 7  ;;  %v1834_v1 = vsel %vm326_vm3, %v1822_v21, 0.0  ;;  %v2587_v43 = vpop.f32.mrb[11].mxu0 }
 0x18c   : > { %v1927_v46 = vsel %vm3475_vm0, %v1918_v26, %v1926_v31  ;;  %v1928_v55 = vrot.slane %v1926_v31, 4  ;;  %v1835_v47 = vadd.f32 %v1834_v1, %v1833_v38 }
 0x18d   : > { %2017 = vst.msk [vmem:[%s3207_s25 + $0xc] sm:$0xf] %vm1860_vm7, %v1927_v46  ;;  %v1936_v14 = vor.u32 %v1935_v13, %v1932_v54 }
 0x18e   : > { %v1030_v45 = vpop.f32.mrb[8].mxu1 }
 0x18f   : > { %v2608_v53 = vadd.f32 %v1690_v6, %v1030_v45  ;;  %v2474_v48 = vpop.f32.mrb[9].mxu1  ;;  %v1937_v57 = vsel %vm3475_vm0, %v1928_v55, %v1936_v14  ;;  %v1938_v18 = vrot.slane %v1936_v14, 4 }
 0x190   : > { %v1033_v17 = vpop.f32.mrb[10].mxu1  ;;  %2018 = vst.msk [vmem:[%s3207_s25 + $0x10] sm:$0xf] %vm1860_vm7, %v1937_v57  ;;  %v1698_v52 = vpop.f32.mrb[12].mxu0 }
 0x191   : > { %v1787_v62 = vmul.f32 %v2608_v53, %v1756_v61  ;;  %v2257_v58 = vpack.c.bf16 %v2608_v53, %v2608_v53  ;;  %v2609_v59 = vadd.f32 %v1693_v42, %v1033_v17  ;;  %v2475_v50 = vpop.f32.mrb[11].mxu1  ;;  %v2590_v51 = vpop.f32.mrb[13].mxu0 }
 0x192   : > { %v1701_v7 = vpop.f32.mrb[14].mxu0 }
 0x193   : > { %v1800_v11 = vsel %vm326_vm3, %v1787_v62, 0.0  ;;  %v1823_v24 = vmul.f32 %v1787_v62, %v1787_v62  ;;  %v1940_v3 = vshrl.u32 %v2257_v58, 16  ;;  %v1943_v5 = vshll.u32 %v2257_v58, 16  ;;  %v2591_v9 = vpop.f32.mrb[15].mxu0 }
 0x194   : > { %v1801_v16 = vadd.f32 %v1800_v11, %v1799_v12  ;;  %v1788_v33 = vmul.f32 %v2609_v59, %v1761_v60  ;;  %v2258_v27 = vpack.c.bf16 %v2609_v59, %v2609_v59  ;;  %v1771_v12 = vpop.permute.xlu1 %1770  ;;  %v1776_v59 = vpop.permute.xlu0 %1775 }
 0x195   : > { %v1836_v19 = vsel %vm326_vm3, %v1823_v24, 0.0  ;;  %v1942_v20 = vrot.slane %v1940_v3, 6  ;;  %v1945_v22 = vrot.slane %v1943_v5, 7 }
 0x196   : > { %v1837_v32 = vadd.f32 %v1836_v19, %v1835_v47  ;;  %v1802_v34 = vsel %vm326_vm3, %v1788_v33, 0.0  ;;  %v1824_v29 = vmul.f32 %v1788_v33, %v1788_v33  ;;  %v1950_v37 = vshrl.u32 %v2258_v27, 16  ;;  %v1038_v49 = vpop.f32.mrb[12].mxu1 }
 0x197   : > { %v1946_v35 = vor.u32 %v1945_v22, %v1942_v20  ;;  %v1803_v63 = vadd.f32 %v1802_v34, %v1801_v16  ;;  %v1953_v23 = vshll.u32 %v2258_v27, 16  ;;  %v2610_v36 = vadd.f32 %v1698_v52, %v1038_v49  ;;  %v2478_v40 = vpop.f32.mrb[13].mxu1 }
 0x198   : > { %v1838_v56 = vsel %vm326_vm3, %v1824_v29, 0.0  ;;  %v1952_v39 = vrot.slane %v1950_v37, 6  ;;  %v1041_v10 = vpop.f32.mrb[14].mxu1  ;;  %v1706_v6 = vpop.f32.mrb[16].mxu0 }
 0x199   : > { %v1947_v28 = vsel %vm3475_vm0, %v1938_v18, %v1946_v35  ;;  %v1948_v44 = vrot.slane %v1946_v35, 4  ;;  %v1839_v2 = vadd.f32 %v1838_v56, %v1837_v32  ;;  %v1955_v4 = vrot.slane %v1953_v23, 7  ;;  %v2479_v8 = vpop.f32.mrb[15].mxu1  ;;  %v2594_v21 = vpop.f32.mrb[17].mxu0 }
 0x19a   : > { %2019 = vst.msk [vmem:[%s3207_s25 + $0x14] sm:$0xf] %vm1860_vm7, %v1947_v28  ;;  %v1789_v0 = vmul.f32 %v2610_v36, %v1766_v41  ;;  %v2259_v15 = vpack.c.bf16 %v2610_v36, %v2610_v36  ;;  %v2611_v25 = vadd.f32 %v1701_v7, %v1041_v10  ;;  %v1709_v31 = vpop.f32.mrb[18].mxu0  ;;  %v1781_v20 = vpop.permute.xlu1 %1780 }
 0x19b   : > { %v1956_v26 = vor.u32 %v1955_v4, %v1952_v39  ;;  %v2595_v1 = vpop.f32.mrb[19].mxu0 }
 0x19c   : > { %v1804_v38 = vsel %vm326_vm3, %v1789_v0, 0.0  ;;  %v1825_v42 = vmul.f32 %v1789_v0, %v1789_v0  ;;  %v1960_v54 = vshrl.u32 %v2259_v15, 16  ;;  %v1963_v13 = vshll.u32 %v2259_v15, 16 }
 0x19d   : > { %v1957_v43 = vsel %vm3475_vm0, %v1948_v44, %v1956_v26  ;;  %v1958_v46 = vrot.slane %v1956_v26, 4  ;;  %v1805_v55 = vadd.f32 %v1804_v38, %v1803_v63  ;;  %v1790_v47 = vmul.f32 %v2611_v25, %v1771_v12  ;;  %v2028_v12 = vld [vmem:[%s3207_s25 + $0x2c] sm:$0x1] }
 0x19e   : > { %2020 = vst.msk [vmem:[%s3207_s25 + $0x18] sm:$0xf] %vm1860_vm7, %v1957_v43  ;;  %v1840_v14 = vsel %vm326_vm3, %v1825_v42, 0.0  ;;  %v1962_v45 = vrot.slane %v1960_v54, 6  ;;  %v1965_v53 = vrot.slane %v1963_v13, 7  ;;  %v2260_v48 = vpack.c.bf16 %v2611_v25, %v2611_v25  ;;  %v1046_v57 = vpop.f32.mrb[16].mxu1 }
 0x19f   : > { %v1841_v61 = vadd.f32 %v1840_v14, %v1839_v2  ;;  %v1806_v17 = vsel %vm326_vm3, %v1790_v47, 0.0  ;;  %v1826_v62 = vmul.f32 %v1790_v47, %v1790_v47  ;;  %v2612_v58 = vadd.f32 %v1706_v6, %v1046_v57  ;;  %v2482_v52 = vpop.f32.mrb[17].mxu1 }
 0x1a0   : > { %v1966_v50 = vor.u32 %v1965_v53, %v1962_v45  ;;  %v1807_v51 = vadd.f32 %v1806_v17, %v1805_v55  ;;  %v1970_v60 = vshrl.u32 %v2260_v48, 16  ;;  %v1973_v11 = vshll.u32 %v2260_v48, 16  ;;  %v1049_v24 = vpop.f32.mrb[18].mxu1 }
 0x1a1   : > { %v1842_v3 = vsel %vm326_vm3, %v1826_v62, 0.0  ;;  %v1791_v5 = vmul.f32 %v2612_v58, %v1776_v59  ;;  %v2261_v7 = vpack.c.bf16 %v2612_v58, %v2612_v58  ;;  %v2613_v16 = vadd.f32 %v1709_v31, %v1049_v24  ;;  %v2483_v33 = vpop.f32.mrb[19].mxu1 }
 0x1a2   : > { %v1967_v27 = vsel %vm3475_vm0, %v1958_v46, %v1966_v50  ;;  %v1968_v9 = vrot.slane %v1966_v50, 4  ;;  %v1843_v18 = vadd.f32 %v1842_v3, %v1841_v61  ;;  %v1972_v19 = vrot.slane %v1970_v60, 6 }
 0x1a3   : > { %2021 = vst.msk [vmem:[%s3207_s25 + $0x1c] sm:$0xf] %vm1860_vm7, %v1967_v27  ;;  %v1975_v22 = vrot.slane %v1973_v11, 7  ;;  %v1808_v32 = vsel %vm326_vm3, %v1791_v5, 0.0  ;;  %v1827_v34 = vmul.f32 %v1791_v5, %v1791_v5  ;;  %v1980_v29 = vshrl.u32 %v2261_v7, 16 }
 0x1a4   : > { %v1809_v37 = vadd.f32 %v1808_v32, %v1807_v51  ;;  %v1983_v49 = vshll.u32 %v2261_v7, 16  ;;  %v1792_v35 = vmul.f32 %v2613_v16, %v1781_v20  ;;  %v2262_v63 = vpack.c.bf16 %v2613_v16, %v2613_v16 }
 0x1a5   : > { %v1976_v23 = vor.u32 %v1975_v22, %v1972_v19  ;;  %v1844_v36 = vsel %vm326_vm3, %v1827_v34, 0.0  ;;  %v1982_v40 = vrot.slane %v1980_v29, 6 }
 0x1a6   : > { %v1845_v41 = vadd.f32 %v1844_v36, %v1843_v18  ;;  %v1985_v56 = vrot.slane %v1983_v49, 7  ;;  %v1811_v39 = vsel %vm1810_vm1, %v1792_v35, 0.0  ;;  %v1828_v10 = vmul.f32 %v1792_v35, %v1792_v35 }
 0x1a7   : > { %v1977_v28 = vsel %vm3475_vm0, %v1968_v9, %v1976_v23  ;;  %v1812_v44 = vadd.f32 %v1811_v39, %v1809_v37  ;;  %v1990_v2 = vshrl.u32 %v2262_v63, 16  ;;  %v1978_v4 = vrot.slane %v1976_v23, 4 }
 0x1a8   : > { %2022 = vst.msk [vmem:[%s3207_s25 + $0x20] sm:$0xf] %vm1860_vm7, %v1977_v28  ;;  %v1986_v6 = vor.u32 %v1985_v56, %v1982_v40  ;;  %v1846_v8 = vsel %vm1810_vm1, %v1828_v10, 0.0  ;;  %v1993_v0 = vshll.u32 %v2262_v63, 16 }
 0x1a9   : > { %v1847_v15 = vadd.f32 %v1846_v8, %v1845_v41  ;;  %v1992_v21 = vrot.slane %v1990_v2, 6  ;;  %v1813_v48 = vrot.slane %v1812_v44, 4 }
 0x1aa   : > { %v1987_v25 = vsel %vm3475_vm0, %v1978_v4, %v1986_v6  ;;  %v1988_v26 = vrot.slane %v1986_v6, 4  ;;  %v1995_v31 = vrot.slane %v1993_v0, 7 }
 0x1ab   : > { %2023 = vst.msk [vmem:[%s3207_s25 + $0x24] sm:$0xf] %vm1860_vm7, %v1987_v25  ;;  %v1848_v38 = vrot.slane %v1847_v15, 4  ;;  %v1998_v42 = vrot.slane %v1992_v21, 4  ;;  %v1814_v57 = vadd.f32 %v1813_v48, %v1812_v44 }
 0x1ac   : > { %v1996_v54 = vor.u32 %v1995_v31, %v1992_v21 }
 0x1ad   : > { %v2029_v13 = vsel %vm2027_vm5, %v1998_v42, %v2028_v12  ;;  %v1849_v1 = vadd.f32 %v1848_v38, %v1847_v15  ;;  %v1815_v30 = vrot.slane %v1814_v57, 2 }
 0x1ae   : > { %v1997_v43 = vsel %vm3475_vm0, %v1988_v26, %v1996_v54  ;;  %2030 = vst [vmem:[%s3207_s25 + $0x2c] sm:$0x1] %v2029_v13 }
 0x1af   : > { %2024 = vst.msk [vmem:[%s3207_s25 + $0x28] sm:$0xf] %vm1860_vm7, %v1997_v43  ;;  %v1850_v46 = vrot.slane %v1849_v1, 2  ;;  %v1816_v61 = vadd.f32 %v1815_v30, %v1814_v57 }
 0x1b1   : > { %v1851_v55 = vadd.f32 %v1850_v46, %v1849_v1  ;;  %v1817_v17 = vrot.slane %v1816_v61, 1 }
 0x1b3   : > { %v1852_v47 = vrot.slane %v1851_v55, 1  ;;  %v1818_v62 = vadd.f32 %v1817_v17, %v1816_v61 }
 0x1b5   : > { %v2034_v14 = vld [vmem:[%s3207_s25 + $0x2c] sm:$0xf]  ;;  %v1853_v45 = vadd.f32 %v1852_v47, %v1851_v55 }
 0x1b6   : > { %v2035_v53 = vsel %vm2033_vm8, 0, %v2034_v14 }
 0x1b7   : > { %2036 = vst [vmem:[%s3207_s25 + $0x2c] sm:$0xf] %v2035_v53  ;;  %1855 = vrot.lane.b32.xlu0 %v1853_v45, %s2843_s8 }
 0x229   : > { %v1856_v58 = vpop.permute.xlu0 %1855 }
 0x22a   : > { %v1858_v52 = vsel %vm326_vm3, %v1818_v62, %v1856_v58 }
 0x22b   : > { %1859 = vst [vmem:[%s208_s29] sm:$0x1] %v1858_v52 }
 0x22c PF: > { %s15_s15 = sadd.s32 1, %s2838_s15  }
 0x22d   : > { %p12_p4 = scmp.ge.s32.totalorder %s15_s15, 4  }
 0x22f   :  { %14 = sbr.rel (!%p12_p4) target bundleno = 1 (0x1), region = 74 }

// kernel: fc_discriminator.14
= control target key start
LH: loop header
LB: loop body
LE: loop exit
PB: predicated region body
PF: predicated region fallthrough
CT: control target
= control target key end

     0   :  { %s446_s15 = smov 0   ;;  %s495_s0 = inlined_call_operand.vmem [shape: bf16[2,36,64], index: 0, kind: input, shape index: {}]   ;;  %s496_s1 = inlined_call_operand.vmem [shape: f32[36,1], index: 1, kind: input, shape index: {}]   ;;  %s497_s2 = inlined_call_operand.vmem [shape: f32[1,64], index: 2, kind: input, shape index: {}]   ;;  %s498_s3 = inlined_call_operand.vmem [shape: f32[1,64], index: 3, kind: input, shape index: {}]   ;;  %s499_s4 = inlined_call_operand.vmem [shape: bf16[2,36,64], index: 4, kind: output, shape index: {}]  }
   0x1 LB: > { %s370_s16 = sadd.s32 4294967295, %s418_s15   ;;  %p374_p0 = scmp.ge.s32.totalorder %s418_s15, 1  ;;  %s418_s15 = sphi %s446_s15, %s14_s15  }
   0x2   : > { %p162_p1 = scmp.lt.s32.totalorder %s418_s15, 3 }
   0x4   : > { %p163_p2 = pnand %p374_p0, %p162_p1 }
   0x5   : > { %v249_v0 = vld [vmem:[%s496_s1 + $0x10] sm:$0xff] (!%p163_p2)  ;;  %v247_v1 = vld [vmem:[%s496_s1] sm:$0xff] (!%p163_p2)  ;;  %v250_v2 = vld [vmem:[%s496_s1 + $0x18] sm:$0xff] (!%p163_p2)  ;;  %v420_v3 = vmov (!%p163_p2), 0   ;;  %p188_p3 = scmp.lt.s32.totalorder (!%p163_p2), %s370_s16, 1  ;;  %vm308_vm11 = vcmask (!%p163_p2), 519168  }
   0x6   : > { %166 = sbr.rel (%p163_p2) target bundleno = 149 (0x95), region = 36  ;;  %411 = vset.pattern.permute.xlu1 (!%p163_p2), %v420_v3  ;;  %410 = vset.pattern.permute.xlu0 (!%p163_p2), %v420_v3  ;;  %vm254_vm0 = vcmp.gt.f32.partialorder (!%p163_p2), %v249_v0, 0.0  ;;  %vm252_vm1 = vcmp.gt.f32.partialorder (!%p163_p2), %v247_v1, 0.0  ;;  %vm255_vm2 = vcmp.gt.f32.partialorder (!%p163_p2), %v250_v2, 0.0  ;;  %v248_v4 = vld [vmem:[%s496_s1 + $0x8] sm:$0xff] (!%p163_p2) }
   0x7   : > { %v259_v5 = vsel (!%p163_p2), %vm254_vm0, 1, %v420_v3  ;;  %v257_v6 = vsel (!%p163_p2), %vm252_vm1, 1, %v420_v3  ;;  %vm253_vm3 = vcmp.gt.f32.partialorder (!%p163_p2), %v248_v4, 0.0  ;;  %v251_v7 = vld [vmem:[%s496_s1 + $0x20] sm:$0xf] (!%p163_p2)  ;;  %v260_v8 = vsel (!%p163_p2), %vm255_vm2, 1, %v420_v3 }
   0x8   : > { %269 = vperm.xlu1 (!%p163_p2), %411, %v259_v5   ;;  %263 = vperm.xlu0 (!%p163_p2), %410, %v257_v6   ;;  %v258_v9 = vsel (!%p163_p2), %vm253_vm3, 1, %v420_v3  ;;  %vm256_vm4 = vcmp.gt.f32.partialorder (!%p163_p2), %v251_v7, 0.0  ;;  %v377_v15 = vld [vmem:[%s497_s2] ss:$0 sm:$0xff] (!%p163_p2)  ;;  %vm313_vm0 = vcmask (!%p163_p2), 517120  }
   0x9   : > { %v261_v10 = vsel (!%p163_p2), %vm256_vm4, 1, %v420_v3  ;;  %v378_v21 = vld [vmem:[%s498_s3] ss:$0 sm:$0xff] (!%p163_p2) }
   0xc   : > { %272 = vperm.xlu1 (!%p163_p2), %411, %v260_v8   ;;  %266 = vperm.xlu0 (!%p163_p2), %410, %v258_v9  }
   0xd   : > { %s501_s16 = smov (!%p188_p3, %s370_s16), 1 }
   0xe   : > { %s400_s27 = smul.u32 20, %s501_s16 }
  0x10   : > { %275 = vperm.xlu0 %410, %v261_v10   ;;  %s192_s30 = scalar_lea.vmem %s495_s0, %s400_s27  ;;  %s197_s11 = scalar_lea.vmem %s499_s4, %s400_s27 }
  0x11   : > { %v399_v11 = vld [vmem:[%s192_s30 + $0x8] sm:$0xff]   ;;  %v392_v12 = vld [vmem:[%s192_s30] sm:$0xff]   ;;  %v202_v20 = vld [vmem:[%s192_s30 + $0x10] sm:$0x3] }
  0x12   : > { %v397_v13 = vunpack.c.l.bf16 %v399_v11  ;;  %v393_v14 = vunpack.c.l.bf16 %v392_v12  ;;  %v398_v18 = vunpack.c.h.bf16 %v399_v11  ;;  %v394_v19 = vunpack.c.h.bf16 %v392_v12 }
  0x13   : > { %v207_v22 = vunpack.c.l.bf16 %v202_v20 }
  0x14   : > { %v217_v16 = vmul.f32 %v397_v13, %v377_v15  ;;  %v215_v17 = vmul.f32 %v393_v14, %v377_v15  ;;  %v218_v25 = vmul.f32 %v398_v18, %v377_v15  ;;  %v216_v26 = vmul.f32 %v394_v19, %v377_v15 }
  0x15   : > { %v219_v27 = vmul.f32 %v377_v15, %v207_v22 }
  0x16   : > { %v229_v23 = vadd.f32 %v378_v21, %v217_v16  ;;  %v227_v24 = vadd.f32 %v378_v21, %v215_v17  ;;  %v230_v30 = vadd.f32 %v378_v21, %v218_v25  ;;  %v228_v31 = vadd.f32 %v378_v21, %v216_v26 }
  0x17   : > { %v231_v32 = vadd.f32 %v378_v21, %v219_v27 }
  0x18   : > { %v239_v28 = vmul.f32 0.2, %v229_v23  ;;  %v237_v29 = vmul.f32 0.2, %v227_v24  ;;  %vm234_vm5 = vcmp.gt.f32.partialorder %v229_v23, 0.0  ;;  %vm232_vm6 = vcmp.gt.f32.partialorder %v227_v24, 0.0 }
  0x19   : > { %v240_v35 = vmul.f32 0.2, %v230_v30  ;;  %v238_v36 = vmul.f32 0.2, %v228_v31  ;;  %vm235_vm7 = vcmp.gt.f32.partialorder %v230_v30, 0.0  ;;  %vm233_vm8 = vcmp.gt.f32.partialorder %v228_v31, 0.0 }
  0x1a   : > { %v244_v33 = vsel %vm234_vm5, %v229_v23, %v239_v28  ;;  %v242_v34 = vsel %vm232_vm6, %v227_v24, %v237_v29  ;;  %v241_v41 = vmul.f32 0.2, %v231_v32  ;;  %vm236_vm12 = vcmp.gt.f32.partialorder %v231_v32, 0.0 }
  0x1b   : > { %v245_v44 = vsel %vm235_vm7, %v230_v30, %v240_v35  ;;  %v243_v45 = vsel %vm233_vm8, %v228_v31, %v238_v36 }
  0x1c   : > { %v246_v52 = vsel %vm236_vm12, %v231_v32, %v241_v41 }
  0x87   : > { %v270_v37 = vpop.permute.xlu1 %269  ;;  %v264_v38 = vpop.permute.xlu0 %263 }
  0x88   : > { %vm279_vm9 = vcmp.eq.s32.totalorder %v270_v37, 1  ;;  %vm277_vm10 = vcmp.eq.s32.totalorder %v264_v38, 1 }
  0x89   : > { %v284_v39 = vsel %vm279_vm9, %v244_v33, 0.0  ;;  %v282_v40 = vsel %vm277_vm10, %v242_v34, 0.0 }
  0x8a   : > { %v388_v42 = vpack.c.bf16 %v284_v39, %v284_v39  ;;  %v386_v43 = vpack.c.bf16 %v282_v40, %v282_v40 }
  0x8b   : > { %v273_v46 = vpop.permute.xlu1 %272  ;;  %v267_v47 = vpop.permute.xlu0 %266 }
  0x8c   : > { %311 = vst.msk [vmem:[%s197_s11 + $0x8] sm:$0xf] %vm308_vm11, %v388_v42  ;;  %309 = vst.msk [vmem:[%s197_s11] sm:$0xf] %vm308_vm11, %v386_v43  ;;  %vm280_vm13 = vcmp.eq.s32.totalorder %v273_v46, 1  ;;  %vm278_vm14 = vcmp.eq.s32.totalorder %v267_v47, 1 }
  0x8d   : > { %v285_v48 = vsel %vm280_vm13, %v245_v44, 0.0  ;;  %v283_v49 = vsel %vm278_vm14, %v243_v45, 0.0 }
  0x8e   : > { %v389_v50 = vpack.c.bf16 %v285_v48, %v285_v48  ;;  %v387_v51 = vpack.c.bf16 %v283_v49, %v283_v49 }
  0x8f   : > { %v276_v53 = vpop.permute.xlu0 %275 }
  0x90   : > { %312 = vst.msk [vmem:[%s197_s11 + $0xc] sm:$0xf] %vm308_vm11, %v389_v50  ;;  %310 = vst.msk [vmem:[%s197_s11 + $0x4] sm:$0xf] %vm308_vm11, %v387_v51  ;;  %vm281_vm15 = vcmp.eq.s32.totalorder %v276_v53, 1 }
  0x91   : > { %v286_v54 = vsel %vm281_vm15, %v246_v52, 0.0 }
  0x92   : > { %v390_v55 = vpack.c.bf16 %v286_v54, %v286_v54 }
  0x94   : > { %314 = vst.msk [vmem:[%s197_s11 + $0x10] sm:$0x3] %vm313_vm0, %v390_v55 }
  0x95 PF: > { %s14_s15 = sadd.s32 1, %s418_s15  }
  0x96   : > { %p11_p4 = scmp.ge.s32.totalorder %s14_s15, 4  }
  0x98   :  { %13 = sbr.rel (!%p11_p4) target bundleno = 1 (0x1), region = 66 }

// kernel: fc_discriminator.13
= control target key start
LH: loop header
LB: loop body
LE: loop exit
PB: predicated region body
PF: predicated region fallthrough
CT: control target
= control target key end

     0   :  { %s1995_s24 = smov 0   ;;  %s2261_s0 = inlined_call_operand.vmem [shape: bf16[2,36,64], index: 0, kind: input, shape index: {}]   ;;  %s2262_s1 = inlined_call_operand.vmem [shape: bf16[2,36,64], index: 1, kind: input, shape index: {}]   ;;  %s2263_s2 = inlined_call_operand.vmem [shape: bf16[2,36,64], index: 2, kind: input, shape index: {}]   ;;  %s2264_s3 = inlined_call_operand.vmem [shape: bf16[2,36,64], index: 3, kind: input, shape index: {}]   ;;  %s2265_s4 = inlined_call_operand.vmem [shape: bf16[576,64], index: 4, kind: input, shape index: {}]   ;;  %s2266_s5 = inlined_call_operand.vmem [shape: f32[36,1], index: 5, kind: input, shape index: {}]   ;;  %s2267_s6 = inlined_call_operand.vmem [shape: bf16[2,36,64], index: 6, kind: output, shape index: {0}]   ;;  %s2268_s7 = inlined_call_operand.vmem [shape: f32[2,8,128], index: 7, kind: output, shape index: {1}]  }
   0x1 LB: > { %s1596_s25 = sadd.s32 4294967295, %s1951_s24   ;;  %p1600_p0 = scmp.ge.s32.totalorder %s1951_s24, 1  ;;  %s1951_s24 = sphi %s1995_s24, %s18_s24  }
   0x2   : > { %p270_p1 = scmp.lt.s32.totalorder %s1951_s24, 3 }
   0x4   : > { %p271_p2 = pnand %p1600_p0, %p270_p1 }
   0x5   : > { %v1892_v0 = vld [vmem:[%s2265_s4 + $0x20] sm:$0xff] (!%p271_p2)   ;;  %p321_p3 = scmp.lt.s32.totalorder (!%p271_p2), %s1596_s25, 1  ;;  %v1894_v2 = vld [vmem:[%s2265_s4 + $0x28] sm:$0xff] (!%p271_p2)   ;;  %v1896_v4 = vld [vmem:[%s2265_s4 + $0x30] sm:$0xff] (!%p271_p2)   ;;  %vm1472_vm0 = vcmask (!%p271_p2), 517120   ;;  %v1953_v7 = vmov (!%p271_p2), 0  }
   0x6   : > { %274 = sbr.rel (%p271_p2) target bundleno = 448 (0x1c0), region = 44  ;;  %v1893_v1 = vld [vmem:[%s2265_s4 + $0x80] sm:$0xff] (!%p271_p2)   ;;  %1740 = vmatprep.subr.bf16.mxu1 (!%p271_p2), %v1892_v0  ;;  %v1895_v3 = vld [vmem:[%s2265_s4 + $0x88] sm:$0xff] (!%p271_p2)   ;;  %v1897_v5 = vld [vmem:[%s2265_s4 + $0x90] sm:$0xff] (!%p271_p2)   ;;  %1890 = vset.pattern.permute.xlu0 (!%p271_p2), %v1953_v7  ;;  %vm427_vm1 = vcmask (!%p271_p2), 523264   ;;  %vm1262_vm4 = vcmask (!%p271_p2), 1044480  }
   0x7   : > { %1788 = vmatprep.subr.bf16.mxu0 (!%p271_p2), %v1893_v1  ;;  %1741 = vmatpush3.bf16.msra.mxu1 (!%p271_p2), %v1892_v0  ;;  %v1898_v6 = vld [vmem:[%s2265_s4 + $0x38] sm:$0xff] (!%p271_p2)   ;;  %vm385_vm2 = vsmask.f32 (!%p271_p2), 4352  ;;  %v1902_v15 = vld [vmem:[%s2265_s4] sm:$0xff] (!%p271_p2)   ;;  %v1906_v29 = vld [vmem:[%s2265_s4 + $0x8] sm:$0xff] (!%p271_p2)   ;;  %vm1400_vm5 = vcmask (!%p271_p2), 519168  }
   0x8   : > { %1789 = vmatpush3.bf16.msra.mxu0 (!%p271_p2), %v1893_v1  ;;  %1742 = vmatprep.subr.bf16.mxu1 (!%p271_p2), %v1894_v2  ;;  %v1899_v8 = vld [vmem:[%s2265_s4 + $0x98] sm:$0xff] (!%p271_p2)   ;;  %v1905_v16 = vld [vmem:[%s2265_s4 + $0xa0] sm:$0xff] (!%p271_p2)   ;;  %v1908_v37 = vld [vmem:[%s2265_s4 + $0x10] sm:$0xff] (!%p271_p2)   ;;  %vm1031_vm3 = vsmask.f32 (!%p271_p2), 5376  ;;  %vm1371_vm8 = vcmask (!%p271_p2), 521216  }
   0x9   : > { %1790 = vmatprep.subr.bf16.mxu0 (!%p271_p2), %v1895_v3  ;;  %1891 = vset.pattern.permute.xlu1 (!%p271_p2), %v1953_v7  ;;  %v1907_v39 = vld [vmem:[%s2265_s4 + $0xa8] sm:$0xff] (!%p271_p2)   ;;  %v1910_v45 = vld [vmem:[%s2265_s4 + $0x18] sm:$0xff] (!%p271_p2)   ;;  %v1909_v52 = vld [vmem:[%s2265_s4 + $0xb0] sm:$0xff] (!%p271_p2)   ;;  %vm1401_vm6 = vsmask.f32 (!%p271_p2), 3328  ;;  %vm1451_vm9 = vcmask (!%p271_p2), 519171  }
   0xa   : > { %v1911_v61 = vld [vmem:[%s2265_s4 + $0xb8] sm:$0xff] (!%p271_p2)   ;;  %v1914_v0 = vld [vmem:[%s2265_s4 + $0x40] sm:$0xff] (!%p271_p2)   ;;  %vm1402_vm7 = vmand (!%p271_p2), %vm1400_vm5, %vm1401_vm6  ;;  %vm1452_vm10 = vsmask.f32 (!%p271_p2), 7950  ;;  %vm1460_vm11 = vcmask (!%p271_p2), 518144   ;;  %s1954_s21 = smov (!%p271_p2), 64  }
   0xb   : > { %1743 = vmatpush3.bf16.msra.mxu1 (!%p271_p2), %v1894_v2  ;;  %vm1461_vm12 = vsmask.f32 (!%p271_p2), 2304  ;;  %vm1416_vm13 = vsmask.f32 (!%p271_p2), 7440  ;;  %vm2214_vm14 = vmand (!%p271_p2), %vm1451_vm9, %vm1452_vm10 }
   0xc   : > { %1791 = vmatpush3.bf16.msra.mxu0 (!%p271_p2), %v1895_v3  ;;  %1744 = vmatprep.subr.bf16.mxu1 (!%p271_p2), %v1896_v4  ;;  %vm2223_vm15 = vmand (!%p271_p2), %vm1460_vm11, %vm1461_vm12 }
   0xd   : > { %s2276_s25 = smov (!%p321_p3, %s1596_s25), 1  ;;  %1792 = vmatprep.subr.bf16.mxu0 %v1897_v5 }
   0xe   : > { %s2021_s13 = smul.u32 20, %s2276_s25  ;;  %s1606_s22 = sshll.u32 %s2276_s25, 3 }
   0xf   : > { %1745 = vmatpush3.bf16.msra.mxu1 %v1896_v4 }
  0x10   : > { %s2033_s20 = scalar_lea.vmem %s2262_s1, %s2021_s13  ;;  %s2042_s27 = scalar_lea.vmem %s2267_s6, %s2021_s13  ;;  %1793 = vmatpush3.bf16.msra.mxu0 %v1897_v5  ;;  %1746 = vmatprep.subr.bf16.mxu1 %v1898_v6 }
  0x11   : > { %v1900_v9 = vld [vmem:[%s2033_s20] sm:$0xf8]   ;;  %v1901_v10 = vld [vmem:[%s2033_s20 + $0x8] sm:$0x7f]   ;;  %1473 = vst.msk [vmem:[%s2042_s27 + $0x10] sm:$0x3] %vm1472_vm0, %v1953_v7  ;;  %s340_s9 = scalar_lea.vmem %s2264_s3, %s2021_s13  ;;  %1794 = vmatprep.subr.bf16.mxu0 %v1899_v8  ;;  %s2067_s17 = scalar_lea.vmem %s2261_s0, %s2021_s13  ;;  %vm2235_vm0 = vmor %vm1401_vm6, %vm1416_vm13 }
  0x12   : > { %v387_v11 = vshrl.u32 %v1900_v9, 16  ;;  %v390_v12 = vshll.u32 %v1900_v9, 16  ;;  %v395_v13 = vshrl.u32 %v1901_v10, 16  ;;  %v398_v14 = vshll.u32 %v1901_v10, 16  ;;  %v1903_v21 = vld [vmem:[%s340_s9] sm:$0xf8]   ;;  %s2082_s28 = scalar_lea.vmem %s2263_s2, %s2021_s13 }
  0x13   : > { %v1904_v22 = vld [vmem:[%s340_s9 + $0x8] sm:$0x7f]   ;;  %1747 = vmatpush3.bf16.msra.mxu1 %v1898_v6  ;;  %v821_v25 = vshrl.u32 %v1903_v21, 16  ;;  %v824_v26 = vshll.u32 %v1903_v21, 16  ;;  %v351_v40 = vld [vmem:[%s2067_s17] sm:$0x8] }
  0x14   : > { %v389_v17 = vrot.slane %v387_v11, 3  ;;  %v392_v18 = vrot.slane %v390_v12, 4  ;;  %v397_v19 = vrot.slane %v395_v13, 3  ;;  %v400_v20 = vrot.slane %v398_v14, 4  ;;  %1795 = vmatpush3.bf16.msra.mxu0 %v1899_v8  ;;  %1752 = vmatprep.subr.bf16.mxu1 %v1902_v15  ;;  %v352_v41 = vld [vmem:[%s2067_s17 + $0x4] sm:$0xf] }
  0x15   : > { %v829_v27 = vshrl.u32 %v1904_v22, 16  ;;  %v832_v28 = vshll.u32 %v1904_v22, 16  ;;  %1800 = vmatprep.subr.bf16.mxu0 %v1905_v16  ;;  %v823_v31 = vrot.slane %v821_v25, 3  ;;  %v826_v32 = vrot.slane %v824_v26, 4  ;;  %v353_v42 = vld [vmem:[%s2067_s17 + $0x8] sm:$0xf] }
  0x16   : > { %v393_v23 = vor.u32 %v392_v18, %v389_v17  ;;  %v401_v24 = vor.u32 %v400_v20, %v397_v19  ;;  %v2087_v43 = vld [vmem:[%s2067_s17 + $0xc] sm:$0x7]  ;;  %v1615_v44 = vcombine.low %v351_v40, %v352_v41  ;;  %v678_v47 = vld [vmem:[%s2082_s28] sm:$0x8]  ;;  %v679_v50 = vld [vmem:[%s2082_s28 + $0x4] sm:$0xf]  ;;  %v1623_v3 = vcombine.low %v352_v41, %v353_v42 }
  0x17   : > { %v831_v33 = vrot.slane %v829_v27, 3  ;;  %v834_v34 = vrot.slane %v832_v28, 4  ;;  %v827_v35 = vor.u32 %v826_v32, %v823_v31  ;;  %v1616_v46 = vcombine.low %v353_v42, %v2087_v43  ;;  %v680_v51 = vld [vmem:[%s2082_s28 + $0x8] sm:$0xf]  ;;  %v681_v1 = vld [vmem:[%s2082_s28 + $0xc] sm:$0x7]  ;;  %s349_s28 = scalar_lea.vmem %s2268_s7, %s1606_s22 }
  0x18   : > { %v402_v30 = vsel %vm385_vm2, %v393_v23, %v401_v24  ;;  %v493_v48 = vshrl.u32 %v1615_v44, 16  ;;  %v496_v49 = vshll.u32 %v1615_v44, 16  ;;  %v1647_v55 = vcombine.low %v679_v50, %v680_v51  ;;  %v1920_v7 = vld [vmem:[%s2265_s4 + $0x48] sm:$0xff]   ;;  %v1919_v8 = vld [vmem:[%s2265_s4 + $0xc0] sm:$0xff]   ;;  %v1922_v9 = vld [vmem:[%s2265_s4 + $0x50] sm:$0xff]  }
  0x19   : > { %1748 = vmatprep.mubr.msk.bf16.mxu1 %vm427_vm1, %v402_v30  ;;  %v835_v36 = vor.u32 %v834_v34, %v831_v33  ;;  %v501_v53 = vshrl.u32 %v1616_v46, 16  ;;  %v504_v54 = vshll.u32 %v1616_v46, 16  ;;  %v1631_v60 = vcombine.low %v678_v47, %v679_v50  ;;  %v1009_v10 = vld [vmem:[%s2067_s17 + $0x4] sm:$0xc]  ;;  %v2122_v11 = vld [vmem:[%s2067_s17 + $0x8] sm:$0xf] }
  0x1a   : > { %1749 = vmatmul.mubr.msk.bf16.vlgmr.msra.gmra.mrb[0].mxu1 %vm427_vm1, %v401_v24  ;;  %v495_v56 = vrot.slane %v493_v48, 3  ;;  %v498_v57 = vrot.slane %v496_v49, 4  ;;  %v1632_v6 = vcombine.low %v680_v51, %v681_v1  ;;  %v1648_v12 = vcombine.low %v681_v1, %v681_v1  ;;  %v1921_v13 = vld [vmem:[%s2265_s4 + $0xc8] sm:$0xff]   ;;  %v1924_v24 = vld [vmem:[%s2265_s4 + $0x58] sm:$0xff]   ;;  %v1923_v31 = vld [vmem:[%s2265_s4 + $0xd0] sm:$0xff]  }
  0x1b   : > { %1753 = vmatpush3.bf16.msra.mxu1 %v1902_v15  ;;  %v836_v38 = vsel %vm385_vm2, %v827_v35, %v835_v36  ;;  %v503_v58 = vrot.slane %v501_v53, 3  ;;  %v506_v59 = vrot.slane %v504_v54, 4  ;;  %v701_v4 = vshrl.u32 %v1631_v60, 16  ;;  %v2130_v15 = vld [vmem:[%s2067_s17 + $0xc] sm:$0x3f]   ;;  %v1925_v34 = vld [vmem:[%s2265_s4 + $0xd8] sm:$0xff]  }
  0x1c   : > { %1754 = vmatprep.subr.bf16.mxu1 %v1906_v29  ;;  %1796 = vmatprep.mubr.msk.bf16.mxu0 %vm427_vm1, %v836_v38  ;;  %v499_v62 = vor.u32 %v498_v57, %v495_v56  ;;  %v704_v5 = vshll.u32 %v1631_v60, 16  ;;  %v1655_v14 = vcombine.low %v1009_v10, %v2122_v11  ;;  %v709_v18 = vshrl.u32 %v1632_v6, 16  ;;  %v1939_v41 = vld [vmem:[%s2033_s20 + $0xc] sm:$0x3f]   ;;  %v1930_v49 = vld [vmem:[%s2265_s4 + $0xe0] sm:$0xff]  }
  0x1d   : > { %1797 = vmatmul.mubr.msk.bf16.vlgmr.msra.gmra.mrb[0].mxu0 %vm427_vm1, %v835_v36  ;;  %v507_v63 = vor.u32 %v506_v59, %v503_v58  ;;  %v712_v19 = vshll.u32 %v1632_v6, 16  ;;  %v1041_v22 = vshrl.u32 %v2130_v15, 16  ;;  %v1044_v23 = vshll.u32 %v2130_v15, 16  ;;  %v1927_v36 = vld [vmem:[%s2265_s4 + $0x60] sm:$0xff]   ;;  %v1932_v42 = vld [vmem:[%s2265_s4 + $0x68] sm:$0xff]  }
  0x1e   : > { %1801 = vmatpush3.bf16.msra.mxu0 %v1905_v16  ;;  %1808 = vmatprep.mubr.msk.bf16.mxu0 %vm427_vm1, %v1647_v55  ;;  %v703_v16 = vrot.slane %v701_v4, 3  ;;  %v706_v17 = vrot.slane %v704_v5, 4  ;;  %v1033_v20 = vshrl.u32 %v1655_v14, 16  ;;  %v1036_v21 = vshll.u32 %v1655_v14, 16  ;;  %v1347_v54 = vld [vmem:[%s2266_s5 + $0x7] sm:$0xff]  ;;  %v1934_v55 = vld [vmem:[%s2265_s4 + $0x70] sm:$0xff]  }
  0x1f   : > { %1755 = vmatpush3.bf16.msra.mxu1 %v1906_v29  ;;  %1802 = vmatprep.subr.bf16.mxu0 %v1907_v39  ;;  %v508_v2 = vsel %vm385_vm2, %v499_v62, %v507_v63  ;;  %v1043_v27 = vrot.slane %v1041_v22, 2  ;;  %v1046_v28 = vrot.slane %v1044_v23, 3  ;;  %v711_v29 = vrot.slane %v709_v18, 3  ;;  %v1349_v57 = vld [vmem:[%s2266_s5 + $0x17] sm:$0x3f]  ;;  %v1933_v58 = vld [vmem:[%s2265_s4 + $0xe8] sm:$0xff]  }
  0x20   : > { %1756 = vmatprep.subr.bf16.mxu1 %v1908_v37  ;;  %1760 = vmatprep.mubr.msk.bf16.mxu1 %vm427_vm1, %v508_v2  ;;  %v1035_v25 = vrot.slane %v1033_v20, 2  ;;  %v1038_v26 = vrot.slane %v1036_v21, 3  ;;  %v714_v30 = vrot.slane %v712_v19, 4  ;;  %v1624_v40 = vcombine.low %v2087_v43, %v2087_v43  ;;  %v1348_v60 = vld [vmem:[%s2266_s5 + $0xf] sm:$0xff]  ;;  %v1940_v2 = vld [vmem:[%s2265_s4 + $0x100] sm:$0xff]  }
  0x21   : > { %v1047_v33 = vor.u32 %v1046_v28, %v1043_v27  ;;  %v1161_v47 = vshrl.u32 %v1939_v41, 16  ;;  %v1164_v48 = vshll.u32 %v1939_v41, 16  ;;  %1352 = vperm.xlu0 %1890, %v1347_v54   ;;  %1362 = vperm.xlu1 %1891, %v1349_v57   ;;  %v1935_v62 = vld [vmem:[%s2265_s4 + $0xf0] sm:$0xff]   ;;  %v1264_v4 = vrot.slane %v2130_v15, 3  ;;  %v1941_v5 = vld [vmem:[%s2265_s4 + $0x108] sm:$0xff]  }
  0x22   : > { %1803 = vmatpush3.bf16.msra.mxu0 %v1907_v39  ;;  %v1039_v32 = vor.u32 %v1038_v26, %v1035_v25  ;;  %v715_v38 = vor.u32 %v714_v30, %v711_v29  ;;  %v1938_v39 = vld [vmem:[%s2033_s20 + $0x4] sm:$0xfc]  }
  0x23   : > { %1757 = vmatpush3.bf16.msra.mxu1 %v1908_v37  ;;  %1804 = vmatprep.subr.bf16.mxu0 %v1909_v52  ;;  %v707_v37 = vor.u32 %v706_v17, %v703_v16  ;;  %v1153_v44 = vshrl.u32 %v1938_v39, 16  ;;  %v1163_v51 = vrot.slane %v1161_v47, 2 }
  0x24   : > { %1758 = vmatprep.subr.bf16.mxu1 %v1910_v45  ;;  %v1048_v35 = vsel %vm1031_vm3, %v1039_v32, %v1047_v33 }
  0x25   : > { %v716_v46 = vsel %vm385_vm2, %v707_v37, %v715_v38  ;;  %v1155_v43 = vrot.slane %v1153_v44, 2  ;;  %1357 = vperm.xlu0 %1890, %v1348_v60   ;;  %vm1466_vm2 = vcmask 519170  }
  0x26   : > { %1805 = vmatpush3.bf16.msra.mxu0 %v1909_v52  ;;  %v1166_v52 = vrot.slane %v1164_v48, 3 }
  0x27   : > { %1759 = vmatpush3.bf16.msra.mxu1 %v1910_v45  ;;  %1806 = vmatprep.subr.bf16.mxu0 %v1911_v61  ;;  %v1156_v45 = vshll.u32 %v1938_v39, 16 }
  0x28   : > { %1764 = vmatprep.subr.bf16.mxu1 %v1914_v0  ;;  %v1167_v56 = vor.u32 %v1166_v52, %v1163_v51 }
  0x29   : > { %v1158_v50 = vrot.slane %v1156_v45, 3 }
  0x2a   : > { %1761 = vmatmul.mubr.msk.bf16.vlgmr.msra.gmra.mrb[0].mxu1 %vm427_vm1, %v507_v63  ;;  %1807 = vmatpush3.bf16.msra.mxu0 %v1911_v61  ;;  %v1936_v61 = vld [vmem:[%s2265_s4 + $0x78] sm:$0xff]   ;;  %v1250_v63 = vld [vmem:[%s2067_s17 + $0x4] sm:$0x8] }
  0x2b   : > { %1765 = vmatpush3.bf16.msra.mxu1 %v1914_v0  ;;  %1772 = vmatprep.mubr.msk.bf16.mxu1 %vm427_vm1, %v1623_v3  ;;  %v1159_v53 = vor.u32 %v1158_v50, %v1155_v43  ;;  %v1937_v0 = vld [vmem:[%s2265_s4 + $0xf8] sm:$0xff]   ;;  %v1671_v1 = vcombine.low %v1250_v63, %v2122_v11  ;;  %v1463_v43 = vld [vmem:[%s2042_s27 + $0xc] sm:$0x7] }
  0x2c   : > { %1766 = vmatprep.subr.bf16.mxu1 %v1920_v7  ;;  %1812 = vmatprep.subr.bf16.mxu0 %v1919_v8 }
  0x2d   : > { %1809 = vmatmul.mubr.msk.bf16.vlgmr.msra.gmra.mrb[0].mxu0 %vm427_vm1, %v1648_v12  ;;  %v1168_v59 = vsel %vm1031_vm3, %v1159_v53, %v1167_v56  ;;  %v1263_v3 = vrot.slane %v1671_v1, 3  ;;  %vm1467_vm3 = vsmask.f32 7946 }
  0x2e   : > { %1813 = vmatpush3.bf16.msra.mxu0 %v1919_v8  ;;  %1820 = vmatprep.mubr.msk.bf16.mxu0 %vm427_vm1, %v1048_v35  ;;  %v1943_v8 = vld [vmem:[%s2265_s4 + $0x118] sm:$0xff]  }
  0x2f   : > { %1767 = vmatpush3.bf16.msra.mxu1 %v1920_v7  ;;  %1814 = vmatprep.subr.bf16.mxu0 %v1921_v13  ;;  %v1265_v6 = vsel %vm1262_vm4, %v1263_v3, %v1264_v4  ;;  %v1942_v7 = vld [vmem:[%s2265_s4 + $0x110] sm:$0xff]   ;;  %vm1468_vm4 = vmand %vm1466_vm2, %vm1467_vm3 }
  0x30   : > { %1768 = vmatprep.subr.bf16.mxu1 %v1922_v9 }
  0x32   : > { %1815 = vmatpush3.bf16.msra.mxu0 %v1921_v13 }
  0x33   : > { %1769 = vmatpush3.bf16.msra.mxu1 %v1922_v9  ;;  %1816 = vmatprep.subr.bf16.mxu0 %v1923_v31  ;;  %v1403_v9 = vld [vmem:[%s2042_s27] sm:$0xf] }
  0x34   : > { %1770 = vmatprep.subr.bf16.mxu1 %v1924_v24  ;;  %v1404_v10 = vsel %vm1402_vm7, 0, %v1403_v9 }
  0x35   : > { %1405 = vst [vmem:[%s2042_s27] sm:$0xf] %v1404_v10 }
  0x36   : > { %1817 = vmatpush3.bf16.msra.mxu0 %v1923_v31 }
  0x37   : > { %1771 = vmatpush3.bf16.msra.mxu1 %v1924_v24  ;;  %1818 = vmatprep.subr.bf16.mxu0 %v1925_v34 }
  0x38   : > { %1776 = vmatprep.subr.bf16.mxu1 %v1927_v36 }
  0x3a   : > { %1773 = vmatmul.mubr.msk.bf16.vlgmr.msra.gmra.mrb[0].mxu1 %vm427_vm1, %v1624_v40  ;;  %1819 = vmatpush3.bf16.msra.mxu0 %v1925_v34 }
  0x3b   : > { %1777 = vmatpush3.bf16.msra.mxu1 %v1927_v36  ;;  %1784 = vmatprep.mubr.msk.bf16.mxu1 %vm427_vm1, %v716_v46 }
  0x3c   : > { %1778 = vmatprep.subr.bf16.mxu1 %v1932_v42  ;;  %1824 = vmatprep.subr.bf16.mxu0 %v1930_v49 }
  0x3d   : > { %1821 = vmatmul.mubr.msk.bf16.vlgmr.msra.gmra.mrb[0].mxu0 %vm427_vm1, %v1047_v33 }
  0x3e   : > { %1825 = vmatpush3.bf16.msra.mxu0 %v1930_v49  ;;  %1832 = vmatprep.mubr.msk.bf16.mxu0 %vm427_vm1, %v1168_v59 }
  0x3f   : > { %1779 = vmatpush3.bf16.msra.mxu1 %v1932_v42  ;;  %1826 = vmatprep.subr.bf16.mxu0 %v1933_v58 }
  0x40   : > { %1780 = vmatprep.subr.bf16.mxu1 %v1934_v55 }
  0x42   : > { %1827 = vmatpush3.bf16.msra.mxu0 %v1933_v58 }
  0x43   : > { %1781 = vmatpush3.bf16.msra.mxu1 %v1934_v55  ;;  %1828 = vmatprep.subr.bf16.mxu0 %v1935_v62 }
  0x44   : > { %1782 = vmatprep.subr.bf16.mxu1 %v1936_v61 }
  0x46   : > { %1829 = vmatpush3.bf16.msra.mxu0 %v1935_v62 }
  0x47   : > { %1783 = vmatpush3.bf16.msra.mxu1 %v1936_v61  ;;  %1830 = vmatprep.subr.bf16.mxu0 %v1937_v0 }
  0x4a   : > { %1785 = vmatmul.mubr.msk.bf16.vlgmr.msra.gmra.mrb[0].mxu1 %vm427_vm1, %v715_v38  ;;  %1831 = vmatpush3.bf16.msra.mxu0 %v1937_v0  ;;  %v1454_v38 = vld [vmem:[%s2042_s27] sm:$0x8] }
  0x4b   : > { %1836 = vmatprep.subr.bf16.mxu0 %v1940_v2 }
  0x4d   : > { %1833 = vmatmul.mubr.msk.bf16.vlgmr.msra.gmra.mrb[0].mxu0 %vm427_vm1, %v1167_v56 }
  0x4e   : > { %1837 = vmatpush3.bf16.msra.mxu0 %v1940_v2  ;;  %1844 = vmatprep.mubr.msk.bf16.mxu0 %vm427_vm1, %v1265_v6 }
  0x4f   : > { %1838 = vmatprep.subr.bf16.mxu0 %v1941_v5 }
  0x52   : > { %1839 = vmatpush3.bf16.msra.mxu0 %v1941_v5 }
  0x53   : > { %1840 = vmatprep.subr.bf16.mxu0 %v1942_v7 }
  0x56   : > { %1841 = vmatpush3.bf16.msra.mxu0 %v1942_v7 }
  0x57   : > { %1842 = vmatprep.subr.bf16.mxu0 %v1943_v8 }
  0x5a   : > { %1843 = vmatpush3.bf16.msra.mxu0 %v1943_v8 }
  0x5d   : > { %1845 = vmatmul.mubr.msk.bf16.vlgmr.msra.gmra.mrb[0].mxu0 %vm427_vm1, %v1264_v4 }
  0xa0   : > { %v1353_v15 = vpop.permute.xlu0 %1352  ;;  %v1363_v17 = vpop.permute.xlu1 %1362 }
  0xa4   : > { %v1358_v31 = vpop.permute.xlu0 %1357 }
 0x11d   : > { %v1786_v11 = vpop.f32.mrb[0].mxu1 }
 0x11e   : > { %v781_v12 = vpop.f32.mrb[1].mxu1 }
 0x11f   : > { %v1787_v13 = vpop.f32.mrb[2].mxu1 }
 0x120   : > { %v784_v14 = vpop.f32.mrb[3].mxu1 }
 0x130   : > { %v1846_v16 = vpop.f32.mrb[0].mxu0 }
 0x131   : > { %v1848_v18 = vadd.f32 %v1846_v16, %v1786_v11  ;;  %v1330_v19 = vpop.f32.mrb[1].mxu0 }
 0x132   : > { %v1849_v20 = vadd.f32 %v1330_v19, %v781_v12  ;;  %v1847_v21 = vpop.f32.mrb[2].mxu0 }
 0x133   : > { %v1685_v22 = vpack.c.bf16 %v1848_v18, %v1848_v18  ;;  %v1367_v23 = vmul.f32 %v1848_v18, %v1363_v17  ;;  %v1333_v24 = vpop.f32.mrb[3].mxu0 }
 0x134   : > { %v1365_v25 = vmul.f32 %v1849_v20, %v1353_v15  ;;  %v1683_v26 = vpack.c.bf16 %v1849_v20, %v1849_v20  ;;  %v1850_v27 = vadd.f32 %v1333_v24, %v784_v14 }
 0x135   : > { %v1438_v28 = vshll.u32 %v1685_v22, 16  ;;  %v1442_v29 = vshrl.u32 %v1685_v22, 16  ;;  %v1372_v30 = vsel %vm1371_vm8, %v1367_v23, 0.0  ;;  %v1382_v42 = vmul.f32 %v1367_v23, %v1367_v23 }
 0x136   : > { %v1419_v32 = vshll.u32 %v1683_v26, 16  ;;  %v1422_v33 = vshrl.u32 %v1683_v26, 16  ;;  %v1380_v36 = vmul.f32 %v1365_v25, %v1365_v25  ;;  %v1366_v39 = vmul.f32 %v1850_v27, %v1358_v31 }
 0x137   : > { %v1440_v34 = vrot.slane %v1438_v28, 5  ;;  %v1444_v35 = vrot.slane %v1442_v29, 4  ;;  %v1684_v44 = vpack.c.bf16 %v1850_v27, %v1850_v27  ;;  %v1368_v46 = vsel %vm427_vm1, %v1365_v25, 0.0 }
 0x138   : > { %v1421_v40 = vrot.slane %v1419_v32, 5  ;;  %v1424_v41 = vrot.slane %v1422_v33, 4  ;;  %v1369_v47 = vsel %vm427_vm1, %v1366_v39, 0.0  ;;  %v1381_v48 = vmul.f32 %v1366_v39, %v1366_v39 }
 0x139   : > { %v1445_v45 = vor.u32 %v1444_v35, %v1440_v34  ;;  %v1370_v52 = vadd.f32 %v1369_v47, %v1368_v46  ;;  %v1428_v53 = vshll.u32 %v1684_v44, 16  ;;  %v1383_v55 = vsel %vm427_vm1, %v1380_v36, 0.0 }
 0x13a   : > { %v1425_v50 = vor.u32 %v1424_v41, %v1421_v40  ;;  %v1455_v51 = vsel %vm2214_vm14, %v1421_v40, %v1454_v38  ;;  %v1384_v56 = vsel %vm427_vm1, %v1381_v48, 0.0  ;;  %v1432_v58 = vshrl.u32 %v1684_v44, 16 }
 0x13b   : > { %v1446_v54 = vrot.slane %v1445_v45, 4  ;;  %1456 = vst [vmem:[%s2042_s27] sm:$0x8] %v1455_v51  ;;  %v1373_v60 = vadd.f32 %v1372_v30, %v1370_v52  ;;  %v1385_v61 = vadd.f32 %v1384_v56, %v1383_v55  ;;  %v1430_v62 = vrot.slane %v1428_v53, 5 }
 0x13c   : > { %v1426_v59 = vrot.slane %v1425_v50, 4  ;;  %v1386_v0 = vsel %vm1371_vm8, %v1382_v42, 0.0  ;;  %v1434_v1 = vrot.slane %v1432_v58, 4 }
 0x13d   : > { %v1464_v63 = vsel %vm2223_vm15, %v1446_v54, %v1463_v43  ;;  %v1387_v2 = vadd.f32 %v1386_v0, %v1385_v61  ;;  %v1374_v15 = vrot.slane %v1373_v60, 4 }
 0x13e   : > { %1465 = vst [vmem:[%s2042_s27 + $0xc] sm:$0x7] %v1464_v63  ;;  %v1431_v3 = vsel %vm2235_vm0, %v1426_v59, %v1430_v62  ;;  %v1435_v4 = vor.u32 %v1434_v1, %v1430_v62 }
 0x13f   : > { %1458 = vst.msk [vmem:[%s2042_s27 + $0x4] sm:$0xf] %vm1400_vm5, %v1431_v3  ;;  %v1388_v5 = vrot.slane %v1387_v2, 4  ;;  %v1375_v16 = vadd.f32 %v1374_v15, %v1373_v60 }
 0x140   : > { %v1436_v6 = vrot.slane %v1435_v4, 4 }
 0x141   : > { %v1389_v7 = vadd.f32 %v1388_v5, %v1387_v2  ;;  %v1376_v17 = vrot.slane %v1375_v16, 2 }
 0x142   : > { %v1441_v8 = vsel %vm2235_vm0, %v1436_v6, %v1440_v34 }
 0x143   : > { %1459 = vst.msk [vmem:[%s2042_s27 + $0x8] sm:$0xf] %vm1400_vm5, %v1441_v8  ;;  %v1390_v9 = vrot.slane %v1389_v7, 2  ;;  %v1377_v18 = vadd.f32 %v1376_v17, %v1375_v16 }
 0x145   : > { %v1469_v10 = vld [vmem:[%s2042_s27 + $0xc] sm:$0xc]  ;;  %v1391_v12 = vadd.f32 %v1390_v9, %v1389_v7  ;;  %v1378_v19 = vrot.slane %v1377_v18, 1 }
 0x146   : > { %v1470_v11 = vsel %vm1468_vm4, 0, %v1469_v10 }
 0x147   : > { %1471 = vst [vmem:[%s2042_s27 + $0xc] sm:$0xc] %v1470_v11  ;;  %v1392_v13 = vrot.slane %v1391_v12, 1  ;;  %v1379_v20 = vadd.f32 %v1378_v19, %v1377_v18 }
 0x149   : > { %v1393_v14 = vadd.f32 %v1392_v13, %v1391_v12 }
 0x14b   : > { %1395 = vrot.lane.b32.xlu1 %v1393_v14, %s1954_s21 }
 0x1bd   : > { %v1396_v21 = vpop.permute.xlu1 %1395 }
 0x1be   : > { %v1398_v22 = vsel %vm427_vm1, %v1379_v20, %v1396_v21 }
 0x1bf   : > { %1399 = vst [vmem:[%s349_s28] sm:$0x1] %v1398_v22 }
 0x1c0 PF: > { %s18_s24 = sadd.s32 1, %s1951_s24  }
 0x1c1   : > { %p15_p4 = scmp.ge.s32.totalorder %s18_s24, 4  }
 0x1c3   :  { %17 = sbr.rel (!%p15_p4) target bundleno = 1 (0x1), region = 95 }

// kernel: fc_discriminator.15
= control target key start
LH: loop header
LB: loop body
LE: loop exit
PB: predicated region body
PF: predicated region fallthrough
CT: control target
= control target key end

     0   :  { %s1719_s15 = smov 0   ;;  %s1985_s0 = inlined_call_operand.vmem [shape: bf16[2,36,64], index: 0, kind: input, shape index: {}]   ;;  %s1986_s1 = inlined_call_operand.vmem [shape: bf16[576,64], index: 1, kind: input, shape index: {}]   ;;  %s1987_s2 = inlined_call_operand.vmem [shape: f32[36,1], index: 2, kind: input, shape index: {}]   ;;  %s1988_s3 = inlined_call_operand.vmem [shape: bf16[2,36,64], index: 3, kind: output, shape index: {0}]   ;;  %s1989_s4 = inlined_call_operand.vmem [shape: f32[2,8,128], index: 4, kind: output, shape index: {1}]  }
   0x1 LB: > { %s1346_s16 = sadd.s32 4294967295, %s1690_s15   ;;  %p1350_p0 = scmp.ge.s32.totalorder %s1690_s15, 1  ;;  %s1690_s15 = sphi %s1719_s15, %s15_s15  }
   0x2   : > { %p165_p1 = scmp.lt.s32.totalorder %s1690_s15, 3 }
   0x4   : > { %p166_p2 = pnand %p1350_p0, %p165_p1 }
   0x5   : > { %v1635_v0 = vld [vmem:[%s1986_s1 + $0x20] sm:$0xff] (!%p166_p2)   ;;  %p195_p3 = scmp.lt.s32.totalorder (!%p166_p2), %s1346_s16, 1  ;;  %v1637_v2 = vld [vmem:[%s1986_s1 + $0x28] sm:$0xff] (!%p166_p2)   ;;  %v1639_v4 = vld [vmem:[%s1986_s1 + $0x30] sm:$0xff] (!%p166_p2)   ;;  %vm238_vm0 = vsmask.f32 (!%p166_p2), 7424 }
   0x6   : > { %169 = sbr.rel (%p166_p2) target bundleno = 450 (0x1c2), region = 32  ;;  %v1636_v1 = vld [vmem:[%s1986_s1 + $0x80] sm:$0xff] (!%p166_p2)   ;;  %1483 = vmatprep.subr.bf16.mxu1 (!%p166_p2), %v1635_v0  ;;  %v1638_v3 = vld [vmem:[%s1986_s1 + $0x88] sm:$0xff] (!%p166_p2)   ;;  %v1640_v5 = vld [vmem:[%s1986_s1 + $0x90] sm:$0xff] (!%p166_p2)   ;;  %v1692_v12 = vmov (!%p166_p2), 0   ;;  %vm1258_vm1 = vcmask (!%p166_p2), 517120  }
   0x7   : > { %1531 = vmatprep.subr.bf16.mxu0 (!%p166_p2), %v1636_v1  ;;  %1484 = vmatpush3.bf16.msra.mxu1 (!%p166_p2), %v1635_v0  ;;  %v1641_v6 = vld [vmem:[%s1986_s1 + $0x38] sm:$0xff] (!%p166_p2)   ;;  %v1645_v19 = vld [vmem:[%s1986_s1] sm:$0xff] (!%p166_p2)   ;;  %vm278_vm2 = vcmask (!%p166_p2), 523264   ;;  %v1650_v35 = vld [vmem:[%s1986_s1 + $0x8] sm:$0xff] (!%p166_p2)   ;;  %vm629_vm3 = vsmask.f32 (!%p166_p2), 4352 }
   0x8   : > { %1532 = vmatpush3.bf16.msra.mxu0 (!%p166_p2), %v1636_v1  ;;  %1485 = vmatprep.subr.bf16.mxu1 (!%p166_p2), %v1637_v2  ;;  %v1642_v7 = vld [vmem:[%s1986_s1 + $0x98] sm:$0xff] (!%p166_p2)   ;;  %v1649_v28 = vld [vmem:[%s1986_s1 + $0xa0] sm:$0xff] (!%p166_p2)   ;;  %v1651_v41 = vld [vmem:[%s1986_s1 + $0xa8] sm:$0xff] (!%p166_p2)   ;;  %vm425_vm4 = vcmask (!%p166_p2), 1046528   ;;  %vm841_vm5 = vcmask (!%p166_p2), 1045504   ;;  %vm532_vm6 = vcmask (!%p166_p2), 1044480  }
   0x9   : > { %1533 = vmatprep.subr.bf16.mxu0 (!%p166_p2), %v1638_v3  ;;  %1633 = vset.pattern.permute.xlu0 (!%p166_p2), %v1692_v12  ;;  %v1652_v43 = vld [vmem:[%s1986_s1 + $0x10] sm:$0xff] (!%p166_p2)   ;;  %v1654_v46 = vld [vmem:[%s1986_s1 + $0x18] sm:$0xff] (!%p166_p2)   ;;  %v1656_v48 = vld [vmem:[%s1986_s1 + $0x40] sm:$0xff] (!%p166_p2)   ;;  %vm938_vm7 = vsmask.f32 (!%p166_p2), 5376  ;;  %vm1186_vm8 = vcmask (!%p166_p2), 519168  }
   0xa   : > { %1634 = vset.pattern.permute.xlu1 (!%p166_p2), %v1692_v12  ;;  %v1653_v45 = vld [vmem:[%s1986_s1 + $0xb0] sm:$0xff] (!%p166_p2)   ;;  %v1655_v47 = vld [vmem:[%s1986_s1 + $0xb8] sm:$0xff] (!%p166_p2)   ;;  %v1658_v56 = vld [vmem:[%s1986_s1 + $0xc0] sm:$0xff] (!%p166_p2)   ;;  %vm1187_vm9 = vsmask.f32 (!%p166_p2), 3328  ;;  %vm1157_vm11 = vcmask (!%p166_p2), 521216  }
   0xb   : > { %1486 = vmatpush3.bf16.msra.mxu1 (!%p166_p2), %v1637_v2  ;;  %v1660_v57 = vld [vmem:[%s1986_s1 + $0x48] sm:$0xff] (!%p166_p2)   ;;  %vm1188_vm10 = vmand (!%p166_p2), %vm1186_vm8, %vm1187_vm9  ;;  %vm1237_vm12 = vcmask (!%p166_p2), 519171   ;;  %vm1238_vm13 = vsmask.f32 (!%p166_p2), 7950  ;;  %vm1246_vm14 = vcmask (!%p166_p2), 518144   ;;  %s1693_s7 = smov (!%p166_p2), 64  }
   0xc   : > { %1534 = vmatpush3.bf16.msra.mxu0 (!%p166_p2), %v1638_v3  ;;  %1487 = vmatprep.subr.bf16.mxu1 (!%p166_p2), %v1639_v4  ;;  %v1661_v63 = vld [vmem:[%s1986_s1 + $0xc8] sm:$0xff] (!%p166_p2)   ;;  %vm1247_vm15 = vsmask.f32 (!%p166_p2), 2304 }
   0xd   : > { %s1997_s16 = smov (!%p195_p3, %s1346_s16), 1  ;;  %1535 = vmatprep.subr.bf16.mxu0 %v1640_v5 }
   0xe   : > { %s1622_s27 = smul.u32 20, %s1997_s16  ;;  %s1353_s9 = sshll.u32 %s1997_s16, 3 }
   0xf   : > { %1488 = vmatpush3.bf16.msra.mxu1 %v1639_v4  ;;  %v1662_v4 = vld [vmem:[%s1986_s1 + $0x50] sm:$0xff]   ;;  %s208_s12 = scalar_lea.vmem %s1989_s4, %s1353_s9 }
  0x10   : > { %s1754_s8 = scalar_lea.vmem %s1985_s0, %s1622_s27  ;;  %s1771_s13 = scalar_lea.vmem %s1988_s3, %s1622_s27  ;;  %1536 = vmatpush3.bf16.msra.mxu0 %v1640_v5  ;;  %1489 = vmatprep.subr.bf16.mxu1 %v1641_v6 }
  0x11   : > { %v210_v8 = vld [vmem:[%s1754_s8] sm:$0xf]  ;;  %v1761_v9 = vld [vmem:[%s1754_s8 + $0x4] sm:$0xf]  ;;  %v1765_v11 = vld [vmem:[%s1754_s8 + $0x8] ss:$0 sps:$4 sm:$0xff]   ;;  %1537 = vmatprep.subr.bf16.mxu0 %v1642_v7 }
  0x12   : > { %v1354_v10 = vcombine.low %v210_v8, %v1761_v9  ;;  %v510_v13 = vld [vmem:[%s1754_s8] sm:$0x8]  ;;  %v247_v16 = vshll.u32 %v1765_v11, 16  ;;  %v251_v17 = vshrl.u32 %v1765_v11, 16  ;;  %v511_v18 = vld [vmem:[%s1754_s8 + $0x4] sm:$0xf] }
  0x13   : > { %1259 = vst.msk [vmem:[%s1771_s13 + $0x10] sm:$0x3] %vm1258_vm1, %v1692_v12  ;;  %v1781_v20 = vld [vmem:[%s1754_s8 + $0x8] sm:$0xf]  ;;  %v1783_v21 = vcombine.low %v510_v13, %v511_v18  ;;  %v1786_v22 = vld [vmem:[%s1754_s8 + $0xc] sm:$0x7]  ;;  %1490 = vmatpush3.bf16.msra.mxu1 %v1641_v6  ;;  %vm1938_vm1 = vmand %vm1237_vm12, %vm1238_vm13 }
  0x14   : > { %v240_v14 = vshrl.u32 %v1354_v10, 16  ;;  %v242_v15 = vshll.u32 %v1354_v10, 16  ;;  %v249_v24 = vrot.slane %v247_v16, 1  ;;  %v1384_v25 = vcombine.low %v1781_v20, %v1786_v22  ;;  %1538 = vmatpush3.bf16.msra.mxu0 %v1642_v7  ;;  %1495 = vmatprep.subr.bf16.mxu1 %v1645_v19  ;;  %v1659_v49 = vld [vmem:[%s1754_s8 + $0x8] ss:$0 sps:$4 sm:$0x77]  }
  0x15   : > { %v631_v26 = vshrl.u32 %v1783_v21, 16  ;;  %v634_v27 = vshll.u32 %v1783_v21, 16  ;;  %1543 = vmatprep.subr.bf16.mxu0 %v1649_v28  ;;  %v1391_v44 = vcombine.low %v511_v18, %v1781_v20  ;;  %v413_v50 = vld [vmem:[%s1754_s8] sm:$0xe]  ;;  %v427_v52 = vrot.slane %v1765_v11, 1  ;;  %v1663_v7 = vld [vmem:[%s1986_s1 + $0xd0] sm:$0xff]  }
  0x16   : > { %v244_v23 = vrot.slane %v242_v15, 1  ;;  %v253_v30 = vor.u32 %v251_v17, %v249_v24  ;;  %v639_v31 = vshrl.u32 %v1384_v25, 16  ;;  %v642_v32 = vshll.u32 %v1384_v25, 16  ;;  %v819_v53 = vld [vmem:[%s1754_s8 + $0x4] sm:$0xc]  ;;  %v1665_v16 = vld [vmem:[%s1986_s1 + $0xd8] sm:$0xff]  }
  0x17   : > { %v633_v33 = vrot.slane %v631_v26, 3  ;;  %v636_v34 = vrot.slane %v634_v27, 4  ;;  %v1369_v51 = vcombine.low %v413_v50, %v1761_v9  ;;  %v1830_v54 = vld [vmem:[%s1754_s8 + $0x8] sm:$0xf]  ;;  %v821_v55 = vld [vmem:[%s1754_s8 + $0xc] sm:$0xf]  ;;  %v1392_v62 = vcombine.low %v1786_v22, %v1786_v22 }
  0x18   : > { %v245_v29 = vor.u32 %v244_v23, %v240_v14  ;;  %v641_v37 = vrot.slane %v639_v31, 3  ;;  %v644_v38 = vrot.slane %v642_v32, 4  ;;  %v822_v59 = vld [vmem:[%s1754_s8 + $0x10] sm:$0x1]  ;;  %v1399_v60 = vcombine.low %v819_v53, %v1830_v54  ;;  %v513_v8 = vld [vmem:[%s1754_s8 + $0xc] sm:$0x3] }
  0x19   : > { %v637_v39 = vor.u32 %v636_v34, %v633_v33  ;;  %v426_v58 = vrot.slane %v1369_v51, 1  ;;  %v1400_v61 = vcombine.low %v821_v55, %v822_v59  ;;  %v926_v3 = vld [vmem:[%s1754_s8 + $0x10] sm:$0x3]  ;;  %v1664_v9 = vld [vmem:[%s1986_s1 + $0x58] sm:$0xff]   ;;  %v1377_v13 = vcombine.low %v1781_v20, %v513_v8  ;;  %v1667_v17 = vld [vmem:[%s1986_s1 + $0x60] sm:$0xff]  }
  0x1a   : > { %v250_v36 = vsel %vm238_vm0, %v245_v29, %v249_v24  ;;  %v645_v40 = vor.u32 %v644_v38, %v641_v37  ;;  %v842_v1 = vrot.slane %v1399_v60, 2  ;;  %v1855_v6 = vcombine.low %v821_v55, %v926_v3  ;;  %v1133_v18 = vld [vmem:[%s1987_s2 + $0x7] sm:$0xff]  ;;  %v1135_v22 = vld [vmem:[%s1987_s2 + $0x17] sm:$0x3f]  ;;  %v1134_v27 = vld [vmem:[%s1987_s2 + $0xf] sm:$0xff] }
  0x1b   : > { %1491 = vmatprep.mubr.msk.bf16.mxu1 %vm278_vm2, %v250_v36  ;;  %v428_v0 = vsel %vm425_vm4, %v426_v58, %v427_v52  ;;  %v843_v2 = vrot.slane %v1400_v61, 2  ;;  %v943_v12 = vshll.u32 %v1399_v60, 16  ;;  %1138 = vperm.xlu0 %1633, %v1133_v18   ;;  %v534_v23 = vrot.slane %v1377_v13, 3  ;;  %v1673_v32 = vld [vmem:[%s1986_s1 + $0xe8] sm:$0xff]   ;;  %v1674_v11 = vld [vmem:[%s1986_s1 + $0x70] sm:$0xff]   ;;  %v1677_v37 = vld [vmem:[%s1986_s1 + $0xf8] sm:$0xff]  }
  0x1c   : > { %1492 = vmatmul.mubr.msk.bf16.vlgmr.msra.gmra.mrb[0].mxu1 %vm278_vm2, %v253_v30  ;;  %v646_v42 = vsel %vm629_vm3, %v637_v39, %v645_v40  ;;  %v948_v14 = vshrl.u32 %v1855_v6, 16  ;;  %v951_v15 = vshll.u32 %v1855_v6, 16  ;;  %1148 = vperm.xlu1 %1634, %v1135_v22   ;;  %v1675_v34 = vld [vmem:[%s1986_s1 + $0xf0] sm:$0xff]   ;;  %v1037_v36 = vld [vmem:[%s1754_s8 + $0x4] sm:$0x8]  ;;  %vm1947_vm3 = vmand %vm1246_vm14, %vm1247_vm15 }
  0x1d   : > { %1496 = vmatpush3.bf16.msra.mxu1 %v1645_v19  ;;  %1503 = vmatprep.mubr.msk.bf16.mxu1 %vm278_vm2, %v1354_v10  ;;  %v844_v5 = vsel %vm841_vm5, %v842_v1, %v843_v2  ;;  %v940_v10 = vshrl.u32 %v1399_v60, 16  ;;  %v533_v19 = vrot.slane %v1783_v21, 3  ;;  %v945_v24 = vrot.slane %v943_v12, 3  ;;  %v1671_v21 = vld [vmem:[%s1986_s1 + $0xe0] sm:$0xff]  }
  0x1e   : > { %1497 = vmatprep.subr.bf16.mxu1 %v1650_v35  ;;  %1539 = vmatprep.mubr.msk.bf16.mxu0 %vm278_vm2, %v646_v42  ;;  %v950_v25 = vrot.slane %v948_v14, 2  ;;  %v953_v26 = vrot.slane %v951_v15, 3  ;;  %v1414_v38 = vcombine.low %v1037_v36, %v1830_v54  ;;  %v1679_v39 = vld [vmem:[%s1986_s1 + $0x100] sm:$0xff]   ;;  %v1680_v42 = vld [vmem:[%s1986_s1 + $0x108] sm:$0xff]   ;;  %vm1202_vm0 = vsmask.f32 7440 }
  0x1f   : > { %1540 = vmatmul.mubr.msk.bf16.vlgmr.msra.gmra.mrb[0].mxu0 %vm278_vm2, %v645_v40  ;;  %v942_v20 = vrot.slane %v940_v10, 2  ;;  %1143 = vperm.xlu0 %1633, %v1134_v27   ;;  %v535_v29 = vsel %vm532_vm6, %v533_v19, %v534_v23  ;;  %vm1959_vm4 = vmor %vm1187_vm9, %vm1202_vm0  ;;  %vm1252_vm5 = vcmask 519170  }
  0x20   : > { %1544 = vmatpush3.bf16.msra.mxu0 %v1649_v28  ;;  %1551 = vmatprep.mubr.msk.bf16.mxu0 %vm278_vm2, %v1391_v44  ;;  %v1672_v28 = vld [vmem:[%s1986_s1 + $0x68] sm:$0xff]   ;;  %v954_v31 = vor.u32 %v953_v26, %v950_v25  ;;  %v1049_v40 = vrot.slane %v1414_v38, 3  ;;  %v1681_v44 = vld [vmem:[%s1986_s1 + $0x110] sm:$0xff]  }
  0x21   : > { %1498 = vmatpush3.bf16.msra.mxu1 %v1650_v35  ;;  %1545 = vmatprep.subr.bf16.mxu0 %v1651_v41  ;;  %v946_v30 = vor.u32 %v945_v24, %v942_v20  ;;  %v1676_v35 = vld [vmem:[%s1986_s1 + $0x78] sm:$0xff]   ;;  %v1249_v24 = vld [vmem:[%s1771_s13 + $0xc] sm:$0x7] }
  0x22   : > { %1499 = vmatprep.subr.bf16.mxu1 %v1652_v43 }
  0x23   : > { %v955_v33 = vsel %vm938_vm7, %v946_v30, %v954_v31 }
  0x24   : > { %1546 = vmatpush3.bf16.msra.mxu0 %v1651_v41  ;;  %v1050_v41 = vrot.slane %v1855_v6, 3 }
  0x25   : > { %1500 = vmatpush3.bf16.msra.mxu1 %v1652_v43  ;;  %1547 = vmatprep.subr.bf16.mxu0 %v1653_v45 }
  0x26   : > { %1501 = vmatprep.subr.bf16.mxu1 %v1654_v46  ;;  %v1051_v43 = vsel %vm532_vm6, %v1049_v40, %v1050_v41  ;;  %vm1253_vm6 = vsmask.f32 7946 }
  0x27   : > { %vm1254_vm7 = vmand %vm1252_vm5, %vm1253_vm6 }
  0x28   : > { %1548 = vmatpush3.bf16.msra.mxu0 %v1653_v45  ;;  %v1682_v45 = vld [vmem:[%s1986_s1 + $0x118] sm:$0xff]  }
  0x29   : > { %1502 = vmatpush3.bf16.msra.mxu1 %v1654_v46  ;;  %1549 = vmatprep.subr.bf16.mxu0 %v1655_v47  ;;  %v1189_v46 = vld [vmem:[%s1771_s13] sm:$0xf] }
  0x2a   : > { %1507 = vmatprep.subr.bf16.mxu1 %v1656_v48 }
  0x2c   : > { %1504 = vmatmul.mubr.msk.bf16.vlgmr.msra.gmra.mrb[0].mxu1 %vm278_vm2, %v1659_v49  ;;  %1550 = vmatpush3.bf16.msra.mxu0 %v1655_v47  ;;  %v1190_v47 = vsel %vm1188_vm10, 0, %v1189_v46 }
  0x2d   : > { %1508 = vmatpush3.bf16.msra.mxu1 %v1656_v48  ;;  %1555 = vmatprep.subr.bf16.mxu0 %v1658_v56  ;;  %1191 = vst [vmem:[%s1771_s13] sm:$0xf] %v1190_v47 }
  0x2e   : > { %1509 = vmatprep.subr.bf16.mxu1 %v1660_v57  ;;  %1515 = vmatprep.mubr.msk.bf16.mxu1 %vm278_vm2, %v428_v0 }
  0x2f   : > { %1552 = vmatmul.mubr.msk.bf16.vlgmr.msra.gmra.mrb[0].mxu0 %vm278_vm2, %v1392_v62 }
  0x30   : > { %1556 = vmatpush3.bf16.msra.mxu0 %v1658_v56  ;;  %1563 = vmatprep.mubr.msk.bf16.mxu0 %vm278_vm2, %v844_v5 }
  0x31   : > { %1510 = vmatpush3.bf16.msra.mxu1 %v1660_v57  ;;  %1557 = vmatprep.subr.bf16.mxu0 %v1661_v63 }
  0x32   : > { %1511 = vmatprep.subr.bf16.mxu1 %v1662_v4 }
  0x34   : > { %1558 = vmatpush3.bf16.msra.mxu0 %v1661_v63  ;;  %v1240_v12 = vld [vmem:[%s1771_s13] sm:$0x8] }
  0x35   : > { %1512 = vmatpush3.bf16.msra.mxu1 %v1662_v4  ;;  %1559 = vmatprep.subr.bf16.mxu0 %v1663_v7 }
  0x36   : > { %1513 = vmatprep.subr.bf16.mxu1 %v1664_v9 }
  0x38   : > { %1560 = vmatpush3.bf16.msra.mxu0 %v1663_v7 }
  0x39   : > { %1514 = vmatpush3.bf16.msra.mxu1 %v1664_v9  ;;  %1561 = vmatprep.subr.bf16.mxu0 %v1665_v16 }
  0x3a   : > { %1519 = vmatprep.subr.bf16.mxu1 %v1667_v17 }
  0x3c   : > { %1516 = vmatmul.mubr.msk.bf16.vlgmr.msra.gmra.mrb[0].mxu1 %vm278_vm2, %v427_v52  ;;  %1562 = vmatpush3.bf16.msra.mxu0 %v1665_v16 }
  0x3d   : > { %1520 = vmatpush3.bf16.msra.mxu1 %v1667_v17  ;;  %1567 = vmatprep.subr.bf16.mxu0 %v1671_v21 }
  0x3e   : > { %1521 = vmatprep.subr.bf16.mxu1 %v1672_v28  ;;  %1527 = vmatprep.mubr.msk.bf16.mxu1 %vm278_vm2, %v535_v29 }
  0x3f   : > { %1564 = vmatmul.mubr.msk.bf16.vlgmr.msra.gmra.mrb[0].mxu0 %vm278_vm2, %v843_v2 }
  0x40   : > { %1568 = vmatpush3.bf16.msra.mxu0 %v1671_v21  ;;  %1575 = vmatprep.mubr.msk.bf16.mxu0 %vm278_vm2, %v955_v33 }
  0x41   : > { %1522 = vmatpush3.bf16.msra.mxu1 %v1672_v28  ;;  %1569 = vmatprep.subr.bf16.mxu0 %v1673_v32 }
  0x42   : > { %1523 = vmatprep.subr.bf16.mxu1 %v1674_v11 }
  0x44   : > { %1570 = vmatpush3.bf16.msra.mxu0 %v1673_v32 }
  0x45   : > { %1524 = vmatpush3.bf16.msra.mxu1 %v1674_v11  ;;  %1571 = vmatprep.subr.bf16.mxu0 %v1675_v34 }
  0x46   : > { %1525 = vmatprep.subr.bf16.mxu1 %v1676_v35 }
  0x48   : > { %1572 = vmatpush3.bf16.msra.mxu0 %v1675_v34 }
  0x49   : > { %1526 = vmatpush3.bf16.msra.mxu1 %v1676_v35  ;;  %1573 = vmatprep.subr.bf16.mxu0 %v1677_v37 }
  0x4c   : > { %1528 = vmatmul.mubr.msk.bf16.vlgmr.msra.gmra.mrb[0].mxu1 %vm278_vm2, %v534_v23  ;;  %1574 = vmatpush3.bf16.msra.mxu0 %v1677_v37 }
  0x4d   : > { %1579 = vmatprep.subr.bf16.mxu0 %v1679_v39 }
  0x4f   : > { %1576 = vmatmul.mubr.msk.bf16.vlgmr.msra.gmra.mrb[0].mxu0 %vm278_vm2, %v954_v31 }
  0x50   : > { %1580 = vmatpush3.bf16.msra.mxu0 %v1679_v39  ;;  %1587 = vmatprep.mubr.msk.bf16.mxu0 %vm278_vm2, %v1051_v43 }
  0x51   : > { %1581 = vmatprep.subr.bf16.mxu0 %v1680_v42 }
  0x54   : > { %1582 = vmatpush3.bf16.msra.mxu0 %v1680_v42 }
  0x55   : > { %1583 = vmatprep.subr.bf16.mxu0 %v1681_v44 }
  0x58   : > { %1584 = vmatpush3.bf16.msra.mxu0 %v1681_v44 }
  0x59   : > { %1585 = vmatprep.subr.bf16.mxu0 %v1682_v45 }
  0x5c   : > { %1586 = vmatpush3.bf16.msra.mxu0 %v1682_v45 }
  0x5f   : > { %1588 = vmatmul.mubr.msk.bf16.vlgmr.msra.gmra.mrb[0].mxu0 %vm278_vm2, %v1050_v41 }
  0x9a   : > { %v1139_v52 = vpop.permute.xlu0 %1138 }
  0x9b   : > { %v1149_v54 = vpop.permute.xlu1 %1148 }
  0x9e   : > { %v1144_v4 = vpop.permute.xlu0 %1143 }
 0x11f   : > { %v1529_v48 = vpop.f32.mrb[0].mxu1 }
 0x120   : > { %v600_v49 = vpop.f32.mrb[1].mxu1 }
 0x121   : > { %v1530_v50 = vpop.f32.mrb[2].mxu1 }
 0x122   : > { %v603_v51 = vpop.f32.mrb[3].mxu1 }
 0x132   : > { %v1589_v53 = vpop.f32.mrb[0].mxu0 }
 0x133   : > { %v1591_v55 = vadd.f32 %v1589_v53, %v1529_v48  ;;  %v1116_v56 = vpop.f32.mrb[1].mxu0 }
 0x134   : > { %v1592_v57 = vadd.f32 %v1116_v56, %v600_v49  ;;  %v1590_v58 = vpop.f32.mrb[2].mxu0 }
 0x135   : > { %v1428_v59 = vpack.c.bf16 %v1591_v55, %v1591_v55  ;;  %v1153_v60 = vmul.f32 %v1591_v55, %v1149_v54  ;;  %v1119_v61 = vpop.f32.mrb[3].mxu0 }
 0x136   : > { %v1151_v62 = vmul.f32 %v1592_v57, %v1139_v52  ;;  %v1426_v63 = vpack.c.bf16 %v1592_v57, %v1592_v57  ;;  %v1593_v0 = vadd.f32 %v1119_v61, %v603_v51 }
 0x137   : > { %v1224_v1 = vshll.u32 %v1428_v59, 16  ;;  %v1228_v2 = vshrl.u32 %v1428_v59, 16  ;;  %v1158_v3 = vsel %vm1157_vm11, %v1153_v60, 0.0  ;;  %v1168_v16 = vmul.f32 %v1153_v60, %v1153_v60 }
 0x138   : > { %v1205_v5 = vshll.u32 %v1426_v63, 16  ;;  %v1208_v6 = vshrl.u32 %v1426_v63, 16  ;;  %v1166_v9 = vmul.f32 %v1151_v62, %v1151_v62  ;;  %v1152_v13 = vmul.f32 %v1593_v0, %v1144_v4 }
 0x139   : > { %v1226_v7 = vrot.slane %v1224_v1, 5  ;;  %v1230_v8 = vrot.slane %v1228_v2, 4  ;;  %v1427_v17 = vpack.c.bf16 %v1593_v0, %v1593_v0  ;;  %v1154_v19 = vsel %vm278_vm2, %v1151_v62, 0.0 }
 0x13a   : > { %v1207_v14 = vrot.slane %v1205_v5, 5  ;;  %v1210_v15 = vrot.slane %v1208_v6, 4  ;;  %v1155_v20 = vsel %vm278_vm2, %v1152_v13, 0.0  ;;  %v1167_v22 = vmul.f32 %v1152_v13, %v1152_v13 }
 0x13b   : > { %v1231_v18 = vor.u32 %v1230_v8, %v1226_v7  ;;  %v1156_v27 = vadd.f32 %v1155_v20, %v1154_v19  ;;  %v1214_v21 = vshll.u32 %v1427_v17, 16  ;;  %v1169_v29 = vsel %vm278_vm2, %v1166_v9, 0.0 }
 0x13c   : > { %v1211_v25 = vor.u32 %v1210_v15, %v1207_v14  ;;  %v1241_v26 = vsel %vm1938_vm1, %v1207_v14, %v1240_v12  ;;  %v1170_v30 = vsel %vm278_vm2, %v1167_v22, 0.0  ;;  %v1218_v32 = vshrl.u32 %v1427_v17, 16 }
 0x13d   : > { %v1232_v28 = vrot.slane %v1231_v18, 4  ;;  %1242 = vst [vmem:[%s1771_s13] sm:$0x8] %v1241_v26  ;;  %v1159_v33 = vadd.f32 %v1158_v3, %v1156_v27  ;;  %v1171_v34 = vadd.f32 %v1170_v30, %v1169_v29  ;;  %v1216_v35 = vrot.slane %v1214_v21, 5 }
 0x13e   : > { %v1212_v11 = vrot.slane %v1211_v25, 4  ;;  %v1172_v37 = vsel %vm1157_vm11, %v1168_v16, 0.0  ;;  %v1220_v38 = vrot.slane %v1218_v32, 4 }
 0x13f   : > { %v1250_v36 = vsel %vm1947_vm3, %v1232_v28, %v1249_v24  ;;  %v1173_v39 = vadd.f32 %v1172_v37, %v1171_v34  ;;  %v1160_v52 = vrot.slane %v1159_v33, 4 }
 0x140   : > { %1251 = vst [vmem:[%s1771_s13 + $0xc] sm:$0x7] %v1250_v36  ;;  %v1217_v40 = vsel %vm1959_vm4, %v1212_v11, %v1216_v35  ;;  %v1221_v41 = vor.u32 %v1220_v38, %v1216_v35 }
 0x141   : > { %1244 = vst.msk [vmem:[%s1771_s13 + $0x4] sm:$0xf] %vm1186_vm8, %v1217_v40  ;;  %v1174_v42 = vrot.slane %v1173_v39, 4  ;;  %v1161_v53 = vadd.f32 %v1160_v52, %v1159_v33 }
 0x142   : > { %v1222_v43 = vrot.slane %v1221_v41, 4 }
 0x143   : > { %v1175_v44 = vadd.f32 %v1174_v42, %v1173_v39  ;;  %v1162_v54 = vrot.slane %v1161_v53, 2 }
 0x144   : > { %v1227_v45 = vsel %vm1959_vm4, %v1222_v43, %v1226_v7 }
 0x145   : > { %1245 = vst.msk [vmem:[%s1771_s13 + $0x8] sm:$0xf] %vm1186_vm8, %v1227_v45  ;;  %v1176_v46 = vrot.slane %v1175_v44, 2  ;;  %v1163_v55 = vadd.f32 %v1162_v54, %v1161_v53 }
 0x147   : > { %v1255_v47 = vld [vmem:[%s1771_s13 + $0xc] sm:$0xc]  ;;  %v1177_v49 = vadd.f32 %v1176_v46, %v1175_v44  ;;  %v1164_v56 = vrot.slane %v1163_v55, 1 }
 0x148   : > { %v1256_v48 = vsel %vm1254_vm7, 0, %v1255_v47 }
 0x149   : > { %1257 = vst [vmem:[%s1771_s13 + $0xc] sm:$0xc] %v1256_v48  ;;  %v1178_v50 = vrot.slane %v1177_v49, 1  ;;  %v1165_v57 = vadd.f32 %v1164_v56, %v1163_v55 }
 0x14b   : > { %v1179_v51 = vadd.f32 %v1178_v50, %v1177_v49 }
 0x14d   : > { %1181 = vrot.lane.b32.xlu1 %v1179_v51, %s1693_s7 }
 0x1bf   : > { %v1182_v58 = vpop.permute.xlu1 %1181 }
 0x1c0   : > { %v1184_v59 = vsel %vm278_vm2, %v1165_v57, %v1182_v58 }
 0x1c1   : > { %1185 = vst [vmem:[%s208_s12] sm:$0x1] %v1184_v59 }
 0x1c2 PF: > { %s15_s15 = sadd.s32 1, %s1690_s15  }
 0x1c3   : > { %p12_p4 = scmp.ge.s32.totalorder %s15_s15, 4  }
 0x1c5   :  { %14 = sbr.rel (!%p12_p4) target bundleno = 1 (0x1), region = 74 }

// kernel: fc_discriminator.17
= control target key start
LH: loop header
LB: loop body
LE: loop exit
PB: predicated region body
PF: predicated region fallthrough
CT: control target
= control target key end

     0   :  { %s1525_s21 = smov 0   ;;  %s1758_s0 = inlined_call_operand.vmem [shape: bf16[2,16,64], index: 0, kind: input, shape index: {}]   ;;  %s1759_s1 = inlined_call_operand.vmem [shape: bf16[2,16,64], index: 1, kind: input, shape index: {}]   ;;  %s1760_s2 = inlined_call_operand.vmem [shape: bf16[2,16,64], index: 2, kind: input, shape index: {}]   ;;  %s1761_s3 = inlined_call_operand.vmem [shape: bf16[2,16,64], index: 3, kind: input, shape index: {}]   ;;  %s1762_s4 = inlined_call_operand.vmem [shape: bf16[576,128], index: 4, kind: input, shape index: {}]   ;;  %s1763_s5 = inlined_call_operand.vmem [shape: f32[1,128], index: 5, kind: input, shape index: {}]   ;;  %s1764_s6 = inlined_call_operand.vmem [shape: f32[2,16,128], index: 6, kind: output, shape index: {}]  }
   0x1 LB: > { %s1195_s22 = sadd.s32 4294967295, %s1486_s21   ;;  %p1199_p0 = scmp.ge.s32.totalorder %s1486_s21, 1  ;;  %s1486_s21 = sphi %s1525_s21, %s16_s21  }
   0x2   : > { %p242_p1 = scmp.lt.s32.totalorder %s1486_s21, 3 }
   0x4   : > { %p243_p2 = pnand %p1199_p0, %p242_p1 }
   0x5   : > { %v1435_v0 = vld [vmem:[%s1762_s4 + $0x20] sm:$0xff] (!%p243_p2)   ;;  %v1488_v1 = vmov (!%p243_p2), 0.0   ;;  %v1437_v3 = vld [vmem:[%s1762_s4 + $0x28] sm:$0xff] (!%p243_p2)   ;;  %vm1489_vm0 = vmmov (!%p243_p2), 0   ;;  %p287_p3 = scmp.lt.s32.totalorder (!%p243_p2), %s1195_s22, 1  ;;  %v1439_v5 = vld [vmem:[%s1762_s4 + $0x30] sm:$0xff] (!%p243_p2)  }
   0x6   : > { %246 = sbr.rel (%p243_p2) target bundleno = 304 (0x130), region = 44  ;;  %1317 = vmatprep.subr.bf16.mxu0 (!%p243_p2), %v1488_v1  ;;  %1329 = vmatprep.subr.bf16.mxu1 (!%p243_p2), %v1488_v1  ;;  %v1436_v2 = vld [vmem:[%s1762_s4] sm:$0xff] (!%p243_p2)   ;;  %v1438_v4 = vld [vmem:[%s1762_s4 + $0x8] sm:$0xff] (!%p243_p2)   ;;  %v1440_v6 = vld [vmem:[%s1762_s4 + $0x10] sm:$0xff] (!%p243_p2)   ;;  %vm370_vm1 = vcmask (!%p243_p2), 523264  }
   0x7   : > { %1318 = vmatpush3.bf16.msra.mxu0 (!%p243_p2), %v1435_v0  ;;  %1325 = vmatprep.mubr.msk.bf16.mxu0 (!%p243_p2), %vm1489_vm0, %v1488_v1  ;;  %v1441_v10 = vld [vmem:[%s1762_s4 + $0x38] sm:$0xff] (!%p243_p2)   ;;  %v1445_v22 = vld [vmem:[%s1762_s4 + $0x40] sm:$0xff] (!%p243_p2)   ;;  %v1447_v25 = vld [vmem:[%s1762_s4 + $0x48] sm:$0xff] (!%p243_p2)  }
   0x8   : > { %1330 = vmatpush3.bf16.msra.mxu1 (!%p243_p2), %v1436_v2  ;;  %1319 = vmatprep.subr.bf16.mxu0 (!%p243_p2), %v1488_v1  ;;  %v1442_v11 = vld [vmem:[%s1762_s4 + $0x18] sm:$0xff] (!%p243_p2)   ;;  %v1446_v23 = vld [vmem:[%s1762_s4 + $0x60] sm:$0xff] (!%p243_p2)   ;;  %v1448_v26 = vld [vmem:[%s1762_s4 + $0x68] sm:$0xff] (!%p243_p2)  }
   0x9   : > { %1331 = vmatprep.subr.bf16.mxu1 (!%p243_p2), %v1488_v1  ;;  %1337 = vmatprep.mubr.msk.bf16.mxu1 (!%p243_p2), %vm1489_vm0, %v1488_v1  ;;  %v1449_v29 = vld [vmem:[%s1762_s4 + $0x50] sm:$0xff] (!%p243_p2)   ;;  %v1451_v35 = vld [vmem:[%s1762_s4 + $0x58] sm:$0xff] (!%p243_p2)   ;;  %v1454_v41 = vld [vmem:[%s1762_s4 + $0x80] sm:$0xff] (!%p243_p2)  }
   0xa   : > { %v1450_v32 = vld [vmem:[%s1762_s4 + $0x70] sm:$0xff] (!%p243_p2)   ;;  %v1452_v39 = vld [vmem:[%s1762_s4 + $0x78] sm:$0xff] (!%p243_p2)   ;;  %v1456_v43 = vld [vmem:[%s1762_s4 + $0xa0] sm:$0xff] (!%p243_p2)  }
   0xb   : > { %1320 = vmatpush3.bf16.msra.mxu0 (!%p243_p2), %v1437_v3  ;;  %v1457_v45 = vld [vmem:[%s1762_s4 + $0x88] sm:$0xff] (!%p243_p2)   ;;  %v1459_v49 = vld [vmem:[%s1762_s4 + $0x90] sm:$0xff] (!%p243_p2)   ;;  %v1461_v54 = vld [vmem:[%s1762_s4 + $0x98] sm:$0xff] (!%p243_p2)  }
   0xc   : > { %1332 = vmatpush3.bf16.msra.mxu1 (!%p243_p2), %v1438_v4  ;;  %1321 = vmatprep.subr.bf16.mxu0 (!%p243_p2), %v1488_v1  ;;  %v1458_v46 = vld [vmem:[%s1762_s4 + $0xa8] sm:$0xff] (!%p243_p2)   ;;  %v1460_v50 = vld [vmem:[%s1762_s4 + $0xb0] sm:$0xff] (!%p243_p2)   ;;  %v1462_v56 = vld [vmem:[%s1762_s4 + $0xb8] sm:$0xff] (!%p243_p2)  }
   0xd   : > { %s1766_s22 = smov (!%p287_p3, %s1195_s22), 1  ;;  %1333 = vmatprep.subr.bf16.mxu1 %v1488_v1  ;;  %v1464_v58 = vld [vmem:[%s1762_s4 + $0xc0] sm:$0xff]   ;;  %v1467_v62 = vld [vmem:[%s1762_s4 + $0xc8] sm:$0xff]   ;;  %v1469_v3 = vld [vmem:[%s1762_s4 + $0xd0] sm:$0xff]  }
   0xe   : > { %s1559_s9 = sshll.u32 %s1766_s22, 3  ;;  %v1466_v60 = vld [vmem:[%s1762_s4 + $0xe0] sm:$0xff]   ;;  %v1468_v0 = vld [vmem:[%s1762_s4 + $0xe8] sm:$0xff]   ;;  %s1271_s26 = sshll.u32 %s1766_s22, 4 }
   0xf   : > { %s1569_s14 = scalar_lea.vmem %s1759_s1, %s1559_s9  ;;  %s1575_s17 = scalar_lea.vmem %s1758_s0, %s1559_s9  ;;  %1322 = vmatpush3.bf16.msra.mxu0 %v1439_v5  ;;  %v1470_v5 = vld [vmem:[%s1762_s4 + $0xf0] sm:$0xff]  }
  0x10   : > { %v1443_v7 = vld [vmem:[%s1569_s14] sm:$0x3c]   ;;  %1334 = vmatpush3.bf16.msra.mxu1 %v1440_v6  ;;  %1323 = vmatprep.subr.bf16.mxu0 %v1488_v1  ;;  %s1601_s30 = scalar_lea.vmem %s1760_s2, %s1559_s9  ;;  %s306_s24 = scalar_lea.vmem %s1761_s3, %s1559_s9 }
  0x11   : > { %v313_v8 = vld [vmem:[%s1575_s17] sm:$0xc]  ;;  %v314_v9 = vld [vmem:[%s1575_s17 + $0x4] sm:$0x3]  ;;  %v339_v12 = vshrl.u32 %v1443_v7, 16  ;;  %v342_v13 = vshll.u32 %v1443_v7, 16  ;;  %1335 = vmatprep.subr.bf16.mxu1 %v1488_v1  ;;  %s1745_s29 = scalar_lea.vmem %s1764_s6, %s1271_s26 }
  0x12   : > { %v1216_v14 = vcombine.low %v313_v8, %v314_v9  ;;  %v575_v27 = vld [vmem:[%s1601_s30] sm:$0xc]  ;;  %v576_v28 = vld [vmem:[%s1601_s30 + $0x4] sm:$0x3]  ;;  %v1471_v8 = vld [vmem:[%s1762_s4 + $0xd8] sm:$0xff]   ;;  %1101 = vst [vmem:[%s1745_s29] sm:$0x1f] %v1488_v1 }
  0x13   : > { %v341_v15 = vrot.slane %v339_v12, 2  ;;  %v344_v16 = vrot.slane %v342_v13, 3  ;;  %1324 = vmatpush3.bf16.msra.mxu0 %v1441_v10  ;;  %v1228_v30 = vcombine.low %v575_v27, %v576_v28  ;;  %v494_v31 = vld [vmem:[%s1575_s17] sm:$0x8]  ;;  %v1473_v61 = vld [vmem:[%s1575_s17 + $0x4] ss:$0 sps:$4 sm:$0xff]  }
  0x14   : > { %v420_v17 = vshrl.u32 %v1216_v14, 16  ;;  %v423_v18 = vshll.u32 %v1216_v14, 16  ;;  %1336 = vmatpush3.bf16.msra.mxu1 %v1442_v11  ;;  %1341 = vmatprep.subr.bf16.mxu0 %v1488_v1  ;;  %v1222_v36 = vcombine.low %v494_v31, %v314_v9  ;;  %v1463_v44 = vld [vmem:[%s306_s24] sm:$0x3c]   ;;  %v853_v2 = vshll.u32 %v1473_v61, 16  ;;  %v1472_v11 = vld [vmem:[%s1762_s4 + $0xf8] sm:$0xff]  }
  0x15   : > { %v345_v19 = vor.u32 %v344_v16, %v341_v15  ;;  %1353 = vmatprep.subr.bf16.mxu1 %v1488_v1  ;;  %v591_v33 = vshrl.u32 %v1228_v30, 16  ;;  %v594_v34 = vshll.u32 %v1228_v30, 16  ;;  %v682_v47 = vshrl.u32 %v1463_v44, 16  ;;  %v757_v51 = vld [vmem:[%s1601_s30] sm:$0x8]  ;;  %v1476_v15 = vld [vmem:[%s1762_s4 + $0x108] sm:$0xff]  }
  0x16   : > { %v422_v20 = vrot.slane %v420_v17, 2  ;;  %v425_v21 = vrot.slane %v423_v18, 3  ;;  %v506_v40 = vrot.slane %v1222_v36, 3  ;;  %v685_v48 = vshll.u32 %v1463_v44, 16  ;;  %v1475_v63 = vld [vmem:[%s1569_s14 + $0x4] ss:$0 sps:$4 sm:$0xff]  }
  0x17   : > { %1326 = vmatmul.mubr.msk.bf16.vlgmr.msra.gmra.mrb[0].mxu0 %vm370_vm1, %v345_v19  ;;  %v593_v37 = vrot.slane %v591_v33, 2  ;;  %v596_v38 = vrot.slane %v594_v34, 3  ;;  %v684_v52 = vrot.slane %v682_v47, 2  ;;  %v1240_v55 = vcombine.low %v757_v51, %v576_v28  ;;  %v1474_v13 = vld [vmem:[%s1762_s4 + $0x100] sm:$0xff]   ;;  %v1477_v16 = vld [vmem:[%s1762_s4 + $0x110] sm:$0xff]   ;;  %v1478_v18 = vld [vmem:[%s1762_s4 + $0x118] sm:$0xff]  }
  0x18   : > { %v426_v24 = vor.u32 %v425_v21, %v422_v20  ;;  %1342 = vmatpush3.bf16.msra.mxu0 %v1445_v22  ;;  %1349 = vmatprep.mubr.msk.bf16.mxu0 %vm1489_vm0, %v1488_v1  ;;  %v687_v53 = vrot.slane %v685_v48, 3  ;;  %v940_v4 = vshll.u32 %v1475_v63, 16  ;;  %v851_v6 = vshrl.u32 %v1473_v61, 16  ;;  %v1479_v17 = vld [vmem:[%s1575_s17 + $0x4] ss:$0 sps:$4 sm:$0xee]  }
  0x19   : > { %1343 = vmatprep.subr.bf16.mxu0 %v1488_v1  ;;  %v597_v42 = vor.u32 %v596_v38, %v593_v37  ;;  %v769_v59 = vrot.slane %v1240_v55, 3  ;;  %v855_v7 = vrot.slane %v853_v2, 1  ;;  %v938_v9 = vshrl.u32 %v1475_v63, 16  ;;  %1103 = vst [vmem:[%s1745_s29 + $0xb] sm:$0x1f] %v1488_v1 }
  0x1a   : > { %1338 = vmatmul.mubr.msk.bf16.vlgmr.msra.gmra.mrb[0].mxu1 %vm370_vm1, %v426_v24  ;;  %v688_v57 = vor.u32 %v687_v53, %v684_v52  ;;  %v942_v10 = vrot.slane %v940_v4, 1  ;;  %v1024_v19 = vrot.slane %v1479_v17, 1 }
  0x1b   : > { %1354 = vmatpush3.bf16.msra.mxu1 %v1446_v23  ;;  %1361 = vmatprep.mubr.msk.bf16.mxu1 %vm1489_vm0, %v1488_v1  ;;  %v856_v12 = vor.u32 %v855_v7, %v851_v6 }
  0x1c   : > { %1355 = vmatprep.subr.bf16.mxu1 %v1488_v1  ;;  %1344 = vmatpush3.bf16.msra.mxu0 %v1447_v25  ;;  %v943_v14 = vor.u32 %v942_v10, %v938_v9 }
  0x1d   : > { %1345 = vmatprep.subr.bf16.mxu0 %v1488_v1 }
  0x1f   : > { %1356 = vmatpush3.bf16.msra.mxu1 %v1448_v26 }
  0x20   : > { %1357 = vmatprep.subr.bf16.mxu1 %v1488_v1  ;;  %1346 = vmatpush3.bf16.msra.mxu0 %v1449_v29 }
  0x21   : > { %1347 = vmatprep.subr.bf16.mxu0 %v1488_v1 }
  0x23   : > { %1358 = vmatpush3.bf16.msra.mxu1 %v1450_v32 }
  0x24   : > { %1359 = vmatprep.subr.bf16.mxu1 %v1488_v1  ;;  %1348 = vmatpush3.bf16.msra.mxu0 %v1451_v35 }
  0x25   : > { %1365 = vmatprep.subr.bf16.mxu0 %v1488_v1 }
  0x27   : > { %1360 = vmatpush3.bf16.msra.mxu1 %v1452_v39  ;;  %1350 = vmatmul.mubr.msk.bf16.vlgmr.msra.gmra.mrb[4].mxu0 %vm370_vm1, %v506_v40 }
  0x28   : > { %1377 = vmatprep.subr.bf16.mxu1 %v1488_v1  ;;  %1366 = vmatpush3.bf16.msra.mxu0 %v1454_v41 }
  0x29   : > { %1367 = vmatprep.subr.bf16.mxu0 %v1488_v1  ;;  %1373 = vmatprep.mubr.msk.bf16.mxu0 %vm1489_vm0, %v1488_v1 }
  0x2a   : > { %1362 = vmatmul.mubr.msk.bf16.vlgmr.msra.gmra.mrb[4].mxu1 %vm370_vm1, %v597_v42 }
  0x2b   : > { %1378 = vmatpush3.bf16.msra.mxu1 %v1456_v43  ;;  %1385 = vmatprep.mubr.msk.bf16.mxu1 %vm1489_vm0, %v1488_v1 }
  0x2c   : > { %1379 = vmatprep.subr.bf16.mxu1 %v1488_v1  ;;  %1368 = vmatpush3.bf16.msra.mxu0 %v1457_v45 }
  0x2d   : > { %1369 = vmatprep.subr.bf16.mxu0 %v1488_v1 }
  0x2f   : > { %1380 = vmatpush3.bf16.msra.mxu1 %v1458_v46 }
  0x30   : > { %1381 = vmatprep.subr.bf16.mxu1 %v1488_v1  ;;  %1370 = vmatpush3.bf16.msra.mxu0 %v1459_v49 }
  0x31   : > { %1371 = vmatprep.subr.bf16.mxu0 %v1488_v1 }
  0x33   : > { %1382 = vmatpush3.bf16.msra.mxu1 %v1460_v50 }
  0x34   : > { %1383 = vmatprep.subr.bf16.mxu1 %v1488_v1  ;;  %1372 = vmatpush3.bf16.msra.mxu0 %v1461_v54 }
  0x35   : > { %1389 = vmatprep.subr.bf16.mxu0 %v1488_v1 }
  0x37   : > { %1384 = vmatpush3.bf16.msra.mxu1 %v1462_v56  ;;  %1374 = vmatmul.mubr.msk.bf16.vlgmr.msra.gmra.mrb[8].mxu0 %vm370_vm1, %v688_v57 }
  0x38   : > { %1401 = vmatprep.subr.bf16.mxu1 %v1488_v1  ;;  %1390 = vmatpush3.bf16.msra.mxu0 %v1464_v58 }
  0x39   : > { %1391 = vmatprep.subr.bf16.mxu0 %v1488_v1  ;;  %1397 = vmatprep.mubr.msk.bf16.mxu0 %vm1489_vm0, %v1488_v1 }
  0x3a   : > { %1386 = vmatmul.mubr.msk.bf16.vlgmr.msra.gmra.mrb[8].mxu1 %vm370_vm1, %v769_v59  ;;  %v1264_v59 = vld [vmem:[%s1763_s5] ss:$0 sm:$0xff] }
  0x3b   : > { %1402 = vmatpush3.bf16.msra.mxu1 %v1466_v60  ;;  %1409 = vmatprep.mubr.msk.bf16.mxu1 %vm1489_vm0, %v1488_v1 }
  0x3c   : > { %1403 = vmatprep.subr.bf16.mxu1 %v1488_v1  ;;  %1392 = vmatpush3.bf16.msra.mxu0 %v1467_v62 }
  0x3d   : > { %1393 = vmatprep.subr.bf16.mxu0 %v1488_v1 }
  0x3f   : > { %1404 = vmatpush3.bf16.msra.mxu1 %v1468_v0 }
  0x40   : > { %1405 = vmatprep.subr.bf16.mxu1 %v1488_v1  ;;  %1394 = vmatpush3.bf16.msra.mxu0 %v1469_v3 }
  0x41   : > { %1395 = vmatprep.subr.bf16.mxu0 %v1488_v1 }
  0x43   : > { %1406 = vmatpush3.bf16.msra.mxu1 %v1470_v5 }
  0x44   : > { %1407 = vmatprep.subr.bf16.mxu1 %v1488_v1  ;;  %1396 = vmatpush3.bf16.msra.mxu0 %v1471_v8 }
  0x45   : > { %1413 = vmatprep.subr.bf16.mxu0 %v1488_v1 }
  0x47   : > { %1408 = vmatpush3.bf16.msra.mxu1 %v1472_v11  ;;  %1398 = vmatmul.mubr.msk.bf16.vlgmr.msra.gmra.mrb[12].mxu0 %vm370_vm1, %v856_v12 }
  0x48   : > { %1414 = vmatpush3.bf16.msra.mxu0 %v1474_v13  ;;  %1421 = vmatprep.mubr.msk.bf16.mxu0 %vm1489_vm0, %v1488_v1 }
  0x49   : > { %1415 = vmatprep.subr.bf16.mxu0 %v1488_v1 }
  0x4a   : > { %1410 = vmatmul.mubr.msk.bf16.vlgmr.msra.gmra.mrb[12].mxu1 %vm370_vm1, %v943_v14 }
  0x4c   : > { %1416 = vmatpush3.bf16.msra.mxu0 %v1476_v15 }
  0x4d   : > { %1417 = vmatprep.subr.bf16.mxu0 %v1488_v1 }
  0x50   : > { %1418 = vmatpush3.bf16.msra.mxu0 %v1477_v16 }
  0x51   : > { %1419 = vmatprep.subr.bf16.mxu0 %v1488_v1 }
  0x54   : > { %1420 = vmatpush3.bf16.msra.mxu0 %v1478_v18 }
  0x57   : > { %1422 = vmatmul.mubr.msk.bf16.vlgmr.msra.gmra.mrb[16].mxu0 %vm370_vm1, %v1024_v19 }
  0xea   : > { %v408_v20 = vpop.f32.mrb[0].mxu0 }
  0xeb   : > { %v1327_v21 = vpop.f32.mrb[1].mxu0 }
  0xec   : > { %v411_v24 = vpop.f32.mrb[2].mxu0 }
  0xed   : > { %v488_v22 = vpop.f32.mrb[0].mxu1  ;;  %v1328_v26 = vpop.f32.mrb[3].mxu0 }
  0xee   : > { %v489_v23 = vadd.f32 %v488_v22, %v408_v20  ;;  %v1339_v25 = vpop.f32.mrb[1].mxu1 }
  0xef   : > { %v491_v27 = vpop.f32.mrb[2].mxu1 }
  0xf0   : > { %v1340_v28 = vpop.f32.mrb[3].mxu1 }
  0xfa   : > { %v568_v29 = vpop.f32.mrb[4].mxu0 }
  0xfb   : > { %v574_v30 = vadd.f32 %v568_v29, %v489_v23  ;;  %v1351_v31 = vpop.f32.mrb[5].mxu0 }
  0xfc   : > { %v571_v33 = vpop.f32.mrb[6].mxu0 }
  0xfd   : > { %v659_v32 = vpop.f32.mrb[4].mxu1  ;;  %v1352_v36 = vpop.f32.mrb[7].mxu0 }
  0xfe   : > { %v1363_v34 = vpop.f32.mrb[5].mxu1  ;;  %v665_v35 = vadd.f32 %v659_v32, %v574_v30 }
  0xff   : > { %v662_v37 = vpop.f32.mrb[6].mxu1 }
 0x100   : > { %v1364_v38 = vpop.f32.mrb[7].mxu1 }
 0x10a   : > { %v750_v1 = vpop.f32.mrb[8].mxu0 }
 0x10b   : > { %v756_v39 = vadd.f32 %v750_v1, %v665_v35  ;;  %v1375_v40 = vpop.f32.mrb[9].mxu0 }
 0x10c   : > { %v753_v42 = vpop.f32.mrb[10].mxu0 }
 0x10d   : > { %v831_v41 = vpop.f32.mrb[8].mxu1  ;;  %v1376_v45 = vpop.f32.mrb[11].mxu0 }
 0x10e   : > { %v1387_v43 = vpop.f32.mrb[9].mxu1  ;;  %v837_v44 = vadd.f32 %v831_v41, %v756_v39 }
 0x10f   : > { %v834_v46 = vpop.f32.mrb[10].mxu1 }
 0x110   : > { %v1388_v47 = vpop.f32.mrb[11].mxu1 }
 0x11a   : > { %v918_v48 = vpop.f32.mrb[12].mxu0 }
 0x11b   : > { %v924_v49 = vadd.f32 %v918_v48, %v837_v44  ;;  %v1399_v50 = vpop.f32.mrb[13].mxu0 }
 0x11c   : > { %v921_v52 = vpop.f32.mrb[14].mxu0 }
 0x11d   : > { %v1005_v51 = vpop.f32.mrb[12].mxu1  ;;  %v1400_v55 = vpop.f32.mrb[15].mxu0 }
 0x11e   : > { %v1411_v53 = vpop.f32.mrb[13].mxu1  ;;  %v1011_v54 = vadd.f32 %v1005_v51, %v924_v49 }
 0x11f   : > { %v1008_v56 = vpop.f32.mrb[14].mxu1 }
 0x120   : > { %v1412_v57 = vpop.f32.mrb[15].mxu1 }
 0x12a   : > { %v1086_v58 = vpop.f32.mrb[16].mxu0 }
 0x12b   : > { %v1092_v60 = vadd.f32 %v1086_v58, %v1011_v54  ;;  %v1423_v61 = vpop.f32.mrb[17].mxu0 }
 0x12c   : > { %v1089_v62 = vpop.f32.mrb[18].mxu0 }
 0x12d   : > { %v1100_v63 = vadd.f32 %v1264_v59, %v1092_v60  ;;  %v1424_v0 = vpop.f32.mrb[19].mxu0 }
 0x12f   : > { %1102 = vst [vmem:[%s1745_s29 + $0x5] sm:$0x3f] %v1100_v63 }
 0x130 PF: > { %s16_s21 = sadd.s32 1, %s1486_s21  }
 0x131   : > { %p13_p4 = scmp.ge.s32.totalorder %s16_s21, 4  }
 0x133   :  { %15 = sbr.rel (!%p13_p4) target bundleno = 1 (0x1), region = 83 }

</bundles_post_ra>
